<compile_context>
chip_gen: v5e
topology: v5e:2x2
jax: 0.10.0
libtpu: 0.0.40
codegen_flags: <defaults>
</compile_context>

<pallas_src>
import math
import jax
import jax.numpy as jnp
from jax.experimental import pallas as pl
from jax.experimental.pallas import tpu as pltpu

GROUPS = 16                 # nn.GroupNorm(16, channels)
EPS = 1e-5                  # PyTorch GroupNorm default eps
MXU_DTYPE = jnp.bfloat16    # MXU-native input dtype (accumulation stays f32)


def _pack_banded_weights(w_hwio, Wo, padl, wp):
    """(3,3,Cin,Cout) HWIO conv weights -> (3, WP*C, Wo*C) block-banded matrices.

    G[dy, ((padl-1)+wo+dx)*C + ci, wo*C + co] = w[dy, dx, ci, co], zero elsewhere,
    so  out_slab = sum_dy act_scratch[dy:dy+Ho, :] @ G[dy]  is the 3x3 "same"
    convolution of the lane-dense (rows, cols*C) activation scratch.
    """
    C = w_hwio.shape[2]
    wo = jnp.arange(Wo)
    g5 = jnp.zeros((3, wp, Wo, C, C), jnp.float32)
    for dy in range(3):
        for dx in range(3):
            g5 = g5.at[dy, (padl - 1) + wo + dx, wo].set(
                jnp.broadcast_to(w_hwio[dy, dx], (Wo, C, C)))
    # (dy, col, ci, wo, co) -> rows = col*C+ci, cols = wo*C+co
    return g5.transpose(0, 1, 3, 2, 4).reshape(3, wp * C, Wo * C)


@jax.jit
def down_forward(x_nchw, params):
    """Down.forward: NCHW in, NCHW out.  One fused pallas_call, grid over batch."""
    N, C, H, W = x_nchw.shape
    assert H % 2 == 0 and W % 2 == 0 and C % GROUPS == 0
    Ho, Wo = H // 2, W // 2
    gs = C // GROUPS
    # The lane roll-reductions below assume power-of-two extents.
    assert Wo & (Wo - 1) == 0 and gs & (gs - 1) == 0

    # Left halo padded so the interior starts 128-lane aligned (4 cols at C=32).
    PADL = 128 // C if 128 % C == 0 else 1
    PADR = 1
    while ((PADL + Wo + PADR) * C) % 128 != 0:
        PADR += 1
    WP = PADL + Wo + PADR            # scratch width in columns
    WOC = Wo * C                     # lane-dense interior row width
    LANE0 = PADL * C                 # first interior lane (multiple of 128)
    inv_cnt = 1.0 / float(Ho * Wo * gs)

    # --- wrapper-side layout (fused by XLA with the NCHW->NHWC transpose it
    # already performs, so HBM traffic matches materialising the transpose). ---
    x = jnp.transpose(x_nchw, (0, 2, 3, 1))                  # NCHW -> NHWC
    p00 = x[:, 0::2, 0::2, :].reshape(N, Ho, WOC)            # 2x2 pool parity
    p01 = x[:, 0::2, 1::2, :].reshape(N, Ho, WOC)            # slabs, lane-dense
    p10 = x[:, 1::2, 0::2, :].reshape(N, Ho, WOC)
    p11 = x[:, 1::2, 1::2, :].reshape(N, Ho, WOC)

    g_all = jnp.stack([_pack_banded_weights(p["w"], Wo, PADL, WP)
                       for p in params]).astype(MXU_DTYPE)   # (3, 3, WP*C, Wo*C)

    def lane_tile(v):                                        # (C,) -> (1, Wo*C)
        return jnp.tile(v, Wo).reshape(1, WOC)

    b_all = jnp.stack([lane_tile(p["b"]) for p in params])       # (3, 1, Wo*C)
    gm_all = jnp.stack([lane_tile(p["gamma"]) for p in params])
    bt_all = jnp.stack([lane_tile(p["beta"]) for p in params])
    al_all = jnp.stack([lane_tile(p["alpha"]) for p in params])

    def kernel(p00_r, p01_r, p10_r, p11_r, g_r, b_r, gm_r, bt_r, al_r,
               o_r, act_r):
        f32 = jnp.float32

        # Zero only the conv halo strips (interior is fully rewritten below).
        act_r[0:1, :] = jnp.zeros((1, WP * C), f32)                 # top row
        act_r[Ho + 1:Ho + 2, :] = jnp.zeros((1, WP * C), f32)       # bottom row
        act_r[1:1 + Ho, 0:LANE0] = jnp.zeros((Ho, LANE0), f32)      # left cols
        act_r[1:1 + Ho, LANE0 + WOC:WP * C] = jnp.zeros(
            (Ho, WP * C - LANE0 - WOC), f32)                        # right cols

        # MaxPool2d(2): three lane-aligned VPU maxes of the parity slabs.
        pooled = jnp.maximum(jnp.maximum(p00_r[0], p01_r[0]),
                             jnp.maximum(p10_r[0], p11_r[0]))
        act_r[1:1 + Ho, LANE0:LANE0 + WOC] = pooled.astype(f32)

        lane_c = jax.lax.broadcasted_iota(jnp.int32, (1, WOC), 1) % C

        def group_sum(row):
            # row: (1, Wo*C) -> every lane := sum over its GroupNorm group
            # (all Wo width positions x its gs channels).  Cyclic lane rolls +
            # adds only (XLU/VPU slots; no MXU, no relayouts).
            shift, w = C, Wo
            while w > 1:                       # fold the Wo width blocks
                row = row + pltpu.roll(row, shift=shift, axis=1)
                shift *= 2
                w //= 2
            k = 1
            while k < gs:                      # fold the gs channels of a group
                up = pltpu.roll(row, shift=WOC - k, axis=1)    # value from lane+k
                dn = pltpu.roll(row, shift=k, axis=1)          # value from lane-k
                row = row + jnp.where(lane_c % (2 * k) < k, up, dn)
                k *= 2
            return row

        for l in range(3):                     # conv3x3 -> GroupNorm(16) -> PReLU
            # 3x3 conv: one aligned full-width slab @ banded weights per kernel
            # row dy; each matmul emits a lane-dense (Ho, Wo*C) slab directly.
            acc = jnp.zeros((Ho, WOC), f32)
            for dy in range(3):
                slab = act_r[dy:dy + Ho, :].astype(MXU_DTYPE)
                acc = acc + jnp.dot(slab, g_r[l, dy],
                                    preferred_element_type=f32)
            acc = acc + b_r[l]

            # GroupNorm(16): two-pass stats, fully lane-dense.
            mean = group_sum(jnp.sum(acc, axis=0, keepdims=True)) * inv_cnt
            cen = acc - mean
            var = group_sum(jnp.sum(cen * cen, axis=0, keepdims=True)) * inv_cnt
            y = cen * jax.lax.rsqrt(var + EPS) * gm_r[l] + bt_r[l]
            y = jnp.where(y > 0, y, al_r[l] * y)               # PReLU(C)

            if l < 2:
                # stays resident in VMEM for the next conv (aligned interior).
                act_r[1:1 + Ho, LANE0:LANE0 + WOC] = y
            else:
                # lane-dense, 128-aligned output store.
                o_r[0] = y.astype(o_r.dtype)

    def const_spec(shape):
        return pl.BlockSpec(shape, lambda n: (0,) * len(shape))

    out = pl.pallas_call(
        kernel,
        out_shape=jax.ShapeDtypeStruct((N, Ho, WOC), x.dtype),
        grid=(N,),
        in_specs=[
            pl.BlockSpec((1, Ho, WOC), lambda n: (n, 0, 0)),
            pl.BlockSpec((1, Ho, WOC), lambda n: (n, 0, 0)),
            pl.BlockSpec((1, Ho, WOC), lambda n: (n, 0, 0)),
            pl.BlockSpec((1, Ho, WOC), lambda n: (n, 0, 0)),
            const_spec((3, 3, WP * C, WOC)),
            const_spec((3, 1, WOC)),
            const_spec((3, 1, WOC)),
            const_spec((3, 1, WOC)),
            const_spec((3, 1, WOC)),
        ],
        out_specs=pl.BlockSpec((1, Ho, WOC), lambda n: (n, 0, 0)),
        scratch_shapes=[pltpu.VMEM((Ho + 2, WP * C), jnp.float32)],
        compiler_params=pltpu.CompilerParams(
            dimension_semantics=("parallel",),
            vmem_limit_bytes=32 * 1024 * 1024),
    )(p00, p01, p10, p11, g_all, b_all, gm_all, bt_all, al_all)

    out = out.reshape(N, Ho, Wo, C)
    return jnp.transpose(out, (0, 3, 1, 2))                   # NHWC -> NCHW


# ---------------------------------------------------------------------------
# Pure-JAX reference (numerical sanity check, f32 throughout)
# ---------------------------------------------------------------------------
@jax.jit
def ref_forward(x_nchw, params):
    x = jnp.transpose(x_nchw, (0, 2, 3, 1))
    N, H, W, C = x.shape
    x = x.reshape(N, H // 2, 2, W // 2, 2, C).max(axis=(2, 4))
    for p in params:
        y = jax.lax.conv_general_dilated(
            x, p["w"], window_strides=(1, 1), padding="SAME",
            dimension_numbers=("NHWC", "HWIO", "NHWC"))
        y = y + p["b"]
        Nn, Hh, Ww, Cc = y.shape
        g = y.reshape(Nn, Hh, Ww, GROUPS, Cc // GROUPS)
        mean = g.mean(axis=(1, 2, 4), keepdims=True)
        var = ((g - mean) ** 2).mean(axis=(1, 2, 4), keepdims=True)
        g = (g - mean) / jnp.sqrt(var + EPS)
        y = g.reshape(Nn, Hh, Ww, Cc) * p["gamma"] + p["beta"]
        x = jnp.where(y > 0, y, p["alpha"] * y)
    return jnp.transpose(x, (0, 3, 1, 2))


# ---------------------------------------------------------------------------
# Main
# ---------------------------------------------------------------------------
if __name__ == "__main__":
    N, C, H, W = 2, 32, 16, 16          # GroupNorm(16, C) requires C % 16 == 0
    key = jax.random.PRNGKey(0)

    params = []
    bound = 1.0 / math.sqrt(C * 3 * 3)
    for _ in range(3):
        key, kw, kb = jax.random.split(key, 3)
        params.append(dict(
            w=jax.random.uniform(kw, (3, 3, C, C), jnp.float32, -bound, bound),
            b=jax.random.uniform(kb, (C,), jnp.float32, -bound, bound),
            gamma=jnp.ones((C,), jnp.float32),
            beta=jnp.zeros((C,), jnp.float32),
            alpha=jnp.full((C,), 0.25, jnp.float32),   # PReLU default init
        ))

    key, kx = jax.random.split(key)
    x = jax.random.normal(kx, (N, C, H, W), jnp.float32)

    out = jax.block_until_ready(down_forward(x, params))
    assert out.shape == (N, C, H // 2, W // 2), out.shape

    ref = jax.block_until_ready(ref_forward(x, params))
    err = float(jnp.max(jnp.abs(out - ref)))
    # bf16 MXU inputs (f32 accumulation + f32 GroupNorm) -> relaxed tolerance.
    assert err < 5e-2, f"max abs error {err}"

    print("KERNEL_OK")
</pallas_src>

<mosaic_0001>
module attributes {stable_mosaic.version = 11 : i64} {
  func.func @kernel(%arg0: i32, %arg1: memref<1x8x256xf32, #tpu.memory_space<vmem>>, %arg2: memref<1x8x256xf32, #tpu.memory_space<vmem>>, %arg3: memref<1x8x256xf32, #tpu.memory_space<vmem>>, %arg4: memref<1x8x256xf32, #tpu.memory_space<vmem>>, %arg5: memref<3x3x512x256xbf16, #tpu.memory_space<vmem>>, %arg6: memref<3x1x256xf32, #tpu.memory_space<vmem>>, %arg7: memref<3x1x256xf32, #tpu.memory_space<vmem>>, %arg8: memref<3x1x256xf32, #tpu.memory_space<vmem>>, %arg9: memref<3x1x256xf32, #tpu.memory_space<vmem>>, %arg10: memref<1x8x256xf32, #tpu.memory_space<vmem>>, %arg11: memref<10x512xf32, #tpu.memory_space<vmem>>) attributes {dimension_semantics = [#tpu.dimension_semantics<parallel>], iteration_bounds = array<i64: 2>, scalar_prefetch = 0 : i64, scratch_operands = 1 : i64, tpu.core_type = #tpu.core_type<tc>, window_params = [{transform_indices = @transform_0, window_bounds = array<i64: 1, 8, 256>}, {transform_indices = @transform_1, window_bounds = array<i64: 1, 8, 256>}, {transform_indices = @transform_2, window_bounds = array<i64: 1, 8, 256>}, {transform_indices = @transform_3, window_bounds = array<i64: 1, 8, 256>}, {pipeline_mode = #tpu.pipeline_mode<synchronous>, transform_indices = @transform_4, window_bounds = array<i64: 3, 3, 512, 256>}, {pipeline_mode = #tpu.pipeline_mode<synchronous>, transform_indices = @transform_5, window_bounds = array<i64: 3, 1, 256>}, {pipeline_mode = #tpu.pipeline_mode<synchronous>, transform_indices = @transform_6, window_bounds = array<i64: 3, 1, 256>}, {pipeline_mode = #tpu.pipeline_mode<synchronous>, transform_indices = @transform_7, window_bounds = array<i64: 3, 1, 256>}, {pipeline_mode = #tpu.pipeline_mode<synchronous>, transform_indices = @transform_8, window_bounds = array<i64: 3, 1, 256>}, {transform_indices = @transform_9, window_bounds = array<i64: 1, 8, 256>}]} {
    %cst = arith.constant 0.000000e+00 : f32
    %0 = vector.broadcast %cst : f32 to vector<1x512xf32>
    %c0 = arith.constant 0 : index
    %c0_0 = arith.constant 0 : index
    %1 = vector.load %arg11[%c0, %c0_0] : memref<10x512xf32, #tpu.memory_space<vmem>>, vector<1x512xf32>
    tpu.vector_store %arg11[%c0, %c0_0], %0 {strides = array<i32>} : memref<10x512xf32, #tpu.memory_space<vmem>>, vector<1x512xf32>,
    %cst_1 = arith.constant 0.000000e+00 : f32
    %2 = vector.broadcast %cst_1 : f32 to vector<1x512xf32>
    %c9 = arith.constant 9 : index
    %c0_2 = arith.constant 0 : index
    %3 = vector.load %arg11[%c9, %c0_2] : memref<10x512xf32, #tpu.memory_space<vmem>>, vector<1x512xf32>
    tpu.vector_store %arg11[%c9, %c0_2], %2 {strides = array<i32>} : memref<10x512xf32, #tpu.memory_space<vmem>>, vector<1x512xf32>,
    %cst_3 = arith.constant 0.000000e+00 : f32
    %4 = vector.broadcast %cst_3 : f32 to vector<8x128xf32>
    %c1 = arith.constant 1 : index
    %c0_4 = arith.constant 0 : index
    %5 = vector.load %arg11[%c1, %c0_4] : memref<10x512xf32, #tpu.memory_space<vmem>>, vector<8x128xf32>
    tpu.vector_store %arg11[%c1, %c0_4], %4 {strides = array<i32>} : memref<10x512xf32, #tpu.memory_space<vmem>>, vector<8x128xf32>,
    %cst_5 = arith.constant 0.000000e+00 : f32
    %6 = vector.broadcast %cst_5 : f32 to vector<8x128xf32>
    %c1_6 = arith.constant 1 : index
    %c384 = arith.constant 384 : index
    %7 = vector.load %arg11[%c1_6, %c384] : memref<10x512xf32, #tpu.memory_space<vmem>>, vector<8x128xf32>
    tpu.vector_store %arg11[%c1_6, %c384], %6 {strides = array<i32>} : memref<10x512xf32, #tpu.memory_space<vmem>>, vector<8x128xf32>,
    %c0_7 = arith.constant 0 : index
    %c0_8 = arith.constant 0 : index
    %c0_9 = arith.constant 0 : index
    %8 = vector.load %arg1[%c0_7, %c0_8, %c0_9] : memref<1x8x256xf32, #tpu.memory_space<vmem>>, vector<1x8x256xf32>
    %9 = vector.shape_cast %8 : vector<1x8x256xf32> to vector<8x256xf32>
    %c0_10 = arith.constant 0 : index
    %c0_11 = arith.constant 0 : index
    %c0_12 = arith.constant 0 : index
    %10 = vector.load %arg2[%c0_10, %c0_11, %c0_12] : memref<1x8x256xf32, #tpu.memory_space<vmem>>, vector<1x8x256xf32>
    %11 = vector.shape_cast %10 : vector<1x8x256xf32> to vector<8x256xf32>
    %12 = arith.maximumf %9, %11 : vector<8x256xf32>
    %c0_13 = arith.constant 0 : index
    %c0_14 = arith.constant 0 : index
    %c0_15 = arith.constant 0 : index
    %13 = vector.load %arg3[%c0_13, %c0_14, %c0_15] : memref<1x8x256xf32, #tpu.memory_space<vmem>>, vector<1x8x256xf32>
    %14 = vector.shape_cast %13 : vector<1x8x256xf32> to vector<8x256xf32>
    %c0_16 = arith.constant 0 : index
    %c0_17 = arith.constant 0 : index
    %c0_18 = arith.constant 0 : index
    %15 = vector.load %arg4[%c0_16, %c0_17, %c0_18] : memref<1x8x256xf32, #tpu.memory_space<vmem>>, vector<1x8x256xf32>
    %16 = vector.shape_cast %15 : vector<1x8x256xf32> to vector<8x256xf32>
    %17 = arith.maximumf %14, %16 : vector<8x256xf32>
    %18 = arith.maximumf %12, %17 : vector<8x256xf32>
    %c1_19 = arith.constant 1 : index
    %c128 = arith.constant 128 : index
    %19 = vector.load %arg11[%c1_19, %c128] : memref<10x512xf32, #tpu.memory_space<vmem>>, vector<8x256xf32>
    tpu.vector_store %arg11[%c1_19, %c128], %18 {strides = array<i32>} : memref<10x512xf32, #tpu.memory_space<vmem>>, vector<8x256xf32>,
    %20 = tpu.iota {dimensions = array<i32: 1>} : vector<1x256xi32>
    %c32_i32 = arith.constant 32 : i32
    %c0_i32 = arith.constant 0 : i32
    %21 = arith.cmpi eq, %c32_i32, %c0_i32 : i32
    %c1_i32 = arith.constant 1 : i32
    %22 = arith.select %21, %c1_i32, %c32_i32 : i32
    %23 = vector.broadcast %22 : i32 to vector<1x256xi32>
    %24 = arith.remsi %20, %23 : vector<1x256xi32>
    %c0_i32_20 = arith.constant 0 : i32
    %25 = vector.broadcast %c0_i32_20 : i32 to vector<1x256xi32>
    %26 = arith.cmpi ne, %24, %25 : vector<1x256xi32>
    %c0_i32_21 = arith.constant 0 : i32
    %27 = vector.broadcast %c0_i32_21 : i32 to vector<1x256xi32>
    %28 = arith.cmpi slt, %24, %27 : vector<1x256xi32>
    %c0_i32_22 = arith.constant 0 : i32
    %29 = arith.cmpi slt, %22, %c0_i32_22 : i32
    %30 = vector.broadcast %29 : i1 to vector<1x256xi1>
    %31 = vector.broadcast %30 : vector<1x256xi1> to vector<1x256xi1>
    %32 = arith.xori %28, %31 : vector<1x256xi1>
    %33 = arith.andi %32, %26 : vector<1x256xi1>
    %34 = vector.broadcast %22 : i32 to vector<1x256xi32>
    %35 = arith.addi %24, %34 : vector<1x256xi32>
    %36 = arith.select %33, %35, %24 : vector<1x256xi1>, vector<1x256xi32>
    %cst_23 = arith.constant 0.000000e+00 : f32
    %37 = vector.broadcast %cst_23 : f32 to vector<8x256xf32>
    %c0_24 = arith.constant 0 : index
    %c0_25 = arith.constant 0 : index
    %38 = vector.load %arg11[%c0_24, %c0_25] : memref<10x512xf32, #tpu.memory_space<vmem>>, vector<8x512xf32>
    %39 = arith.truncf %38 : vector<8x512xf32> to vector<8x512xbf16>
    %c0_26 = arith.constant 0 : index
    %c0_27 = arith.constant 0 : index
    %c0_28 = arith.constant 0 : index
    %c0_29 = arith.constant 0 : index
    %40 = vector.load %arg5[%c0_26, %c0_27, %c0_28, %c0_29] : memref<3x3x512x256xbf16, #tpu.memory_space<vmem>>, vector<1x1x512x256xbf16>
    %41 = vector.shape_cast %40 : vector<1x1x512x256xbf16> to vector<512x256xbf16>
    %cst_30 = arith.constant dense<0.000000e+00> : vector<8x256xf32>
    %42 = tpu.matmul %39, %41, %cst_30 {dimension_numbers = #tpu.dot_dimension_numbers<[1], [0], [0], [1], [0, 0, 1, 1], [], []>} : vector<8x512xbf16>, vector<512x256xbf16>, vector<8x256xf32> -> vector<8x256xf32>
    %43 = arith.addf %37, %42 : vector<8x256xf32>
    %c1_31 = arith.constant 1 : index
    %c0_32 = arith.constant 0 : index
    %44 = vector.load %arg11[%c1_31, %c0_32] : memref<10x512xf32, #tpu.memory_space<vmem>>, vector<8x512xf32>
    %45 = arith.truncf %44 : vector<8x512xf32> to vector<8x512xbf16>
    %c0_33 = arith.constant 0 : index
    %c1_34 = arith.constant 1 : index
    %c0_35 = arith.constant 0 : index
    %c0_36 = arith.constant 0 : index
    %46 = vector.load %arg5[%c0_33, %c1_34, %c0_35, %c0_36] : memref<3x3x512x256xbf16, #tpu.memory_space<vmem>>, vector<1x1x512x256xbf16>
    %47 = vector.shape_cast %46 : vector<1x1x512x256xbf16> to vector<512x256xbf16>
    %cst_37 = arith.constant dense<0.000000e+00> : vector<8x256xf32>
    %48 = tpu.matmul %45, %47, %cst_37 {dimension_numbers = #tpu.dot_dimension_numbers<[1], [0], [0], [1], [0, 0, 1, 1], [], []>} : vector<8x512xbf16>, vector<512x256xbf16>, vector<8x256xf32> -> vector<8x256xf32>
    %49 = arith.addf %43, %48 : vector<8x256xf32>
    %c2 = arith.constant 2 : index
    %c0_38 = arith.constant 0 : index
    %50 = vector.load %arg11[%c2, %c0_38] : memref<10x512xf32, #tpu.memory_space<vmem>>, vector<8x512xf32>
    %51 = arith.truncf %50 : vector<8x512xf32> to vector<8x512xbf16>
    %c0_39 = arith.constant 0 : index
    %c2_40 = arith.constant 2 : index
    %c0_41 = arith.constant 0 : index
    %c0_42 = arith.constant 0 : index
    %52 = vector.load %arg5[%c0_39, %c2_40, %c0_41, %c0_42] : memref<3x3x512x256xbf16, #tpu.memory_space<vmem>>, vector<1x1x512x256xbf16>
    %53 = vector.shape_cast %52 : vector<1x1x512x256xbf16> to vector<512x256xbf16>
    %cst_43 = arith.constant dense<0.000000e+00> : vector<8x256xf32>
    %54 = tpu.matmul %51, %53, %cst_43 {dimension_numbers = #tpu.dot_dimension_numbers<[1], [0], [0], [1], [0, 0, 1, 1], [], []>} : vector<8x512xbf16>, vector<512x256xbf16>, vector<8x256xf32> -> vector<8x256xf32>
    %55 = arith.addf %49, %54 : vector<8x256xf32>
    %c0_44 = arith.constant 0 : index
    %c0_45 = arith.constant 0 : index
    %c0_46 = arith.constant 0 : index
    %56 = vector.load %arg6[%c0_44, %c0_45, %c0_46] : memref<3x1x256xf32, #tpu.memory_space<vmem>>, vector<1x1x256xf32>
    %57 = vector.shape_cast %56 : vector<1x1x256xf32> to vector<1x256xf32>
    %58 = vector.broadcast %57 : vector<1x256xf32> to vector<8x256xf32>
    %59 = arith.addf %55, %58 : vector<8x256xf32>
    %cst_47 = arith.constant dense<0.000000e+00> : vector<256xf32>
    %60 = vector.multi_reduction <add>, %59, %cst_47 [0] : vector<8x256xf32> to vector<256xf32>
    %61 = vector.shape_cast %60 : vector<256xf32> to vector<1x256xf32>
    %c32_i32_48 = arith.constant 32 : i32
    %62 = tpu.dynamic_rotate %61 by %c32_i32_48 dim 1 : vector<1x256xf32>, i32 -> vector<1x256xf32>
    %63 = arith.addf %61, %62 : vector<1x256xf32>
    %c64_i32 = arith.constant 64 : i32
    %64 = tpu.dynamic_rotate %63 by %c64_i32 dim 1 : vector<1x256xf32>, i32 -> vector<1x256xf32>
    %65 = arith.addf %63, %64 : vector<1x256xf32>
    %c128_i32 = arith.constant 128 : i32
    %66 = tpu.dynamic_rotate %65 by %c128_i32 dim 1 : vector<1x256xf32>, i32 -> vector<1x256xf32>
    %67 = arith.addf %65, %66 : vector<1x256xf32>
    %c255_i32 = arith.constant 255 : i32
    %68 = tpu.dynamic_rotate %67 by %c255_i32 dim 1 : vector<1x256xf32>, i32 -> vector<1x256xf32>
    %c1_i32_49 = arith.constant 1 : i32
    %69 = tpu.dynamic_rotate %67 by %c1_i32_49 dim 1 : vector<1x256xf32>, i32 -> vector<1x256xf32>
    %c2_i32 = arith.constant 2 : i32
    %c0_i32_50 = arith.constant 0 : i32
    %70 = arith.cmpi eq, %c2_i32, %c0_i32_50 : i32
    %c1_i32_51 = arith.constant 1 : i32
    %71 = arith.select %70, %c1_i32_51, %c2_i32 : i32
    %72 = vector.broadcast %71 : i32 to vector<1x256xi32>
    %73 = arith.remsi %36, %72 : vector<1x256xi32>
    %c0_i32_52 = arith.constant 0 : i32
    %74 = vector.broadcast %c0_i32_52 : i32 to vector<1x256xi32>
    %75 = arith.cmpi ne, %73, %74 : vector<1x256xi32>
    %c0_i32_53 = arith.constant 0 : i32
    %76 = vector.broadcast %c0_i32_53 : i32 to vector<1x256xi32>
    %77 = arith.cmpi slt, %73, %76 : vector<1x256xi32>
    %c0_i32_54 = arith.constant 0 : i32
    %78 = arith.cmpi slt, %71, %c0_i32_54 : i32
    %79 = vector.broadcast %78 : i1 to vector<1x256xi1>
    %80 = vector.broadcast %79 : vector<1x256xi1> to vector<1x256xi1>
    %81 = arith.xori %77, %80 : vector<1x256xi1>
    %82 = arith.andi %81, %75 : vector<1x256xi1>
    %83 = vector.broadcast %71 : i32 to vector<1x256xi32>
    %84 = arith.addi %73, %83 : vector<1x256xi32>
    %85 = arith.select %82, %84, %73 : vector<1x256xi1>, vector<1x256xi32>
    %c1_i32_55 = arith.constant 1 : i32
    %86 = vector.broadcast %c1_i32_55 : i32 to vector<1x256xi32>
    %87 = arith.cmpi slt, %85, %86 : vector<1x256xi32>
    %88 = arith.select %87, %68, %69 : vector<1x256xi1>, vector<1x256xf32>
    %89 = arith.addf %67, %88 : vector<1x256xf32>
    %cst_56 = arith.constant 7.812500e-03 : f32
    %90 = vector.broadcast %cst_56 : f32 to vector<1x256xf32>
    %91 = arith.mulf %89, %90 : vector<1x256xf32>
    %92 = vector.broadcast %91 : vector<1x256xf32> to vector<8x256xf32>
    %93 = arith.subf %59, %92 : vector<8x256xf32>
    %94 = arith.mulf %93, %93 : vector<8x256xf32>
    %cst_57 = arith.constant dense<0.000000e+00> : vector<256xf32>
    %95 = vector.multi_reduction <add>, %94, %cst_57 [0] : vector<8x256xf32> to vector<256xf32>
    %96 = vector.shape_cast %95 : vector<256xf32> to vector<1x256xf32>
    %c32_i32_58 = arith.constant 32 : i32
    %97 = tpu.dynamic_rotate %96 by %c32_i32_58 dim 1 : vector<1x256xf32>, i32 -> vector<1x256xf32>
    %98 = arith.addf %96, %97 : vector<1x256xf32>
    %c64_i32_59 = arith.constant 64 : i32
    %99 = tpu.dynamic_rotate %98 by %c64_i32_59 dim 1 : vector<1x256xf32>, i32 -> vector<1x256xf32>
    %100 = arith.addf %98, %99 : vector<1x256xf32>
    %c128_i32_60 = arith.constant 128 : i32
    %101 = tpu.dynamic_rotate %100 by %c128_i32_60 dim 1 : vector<1x256xf32>, i32 -> vector<1x256xf32>
    %102 = arith.addf %100, %101 : vector<1x256xf32>
    %c255_i32_61 = arith.constant 255 : i32
    %103 = tpu.dynamic_rotate %102 by %c255_i32_61 dim 1 : vector<1x256xf32>, i32 -> vector<1x256xf32>
    %c1_i32_62 = arith.constant 1 : i32
    %104 = tpu.dynamic_rotate %102 by %c1_i32_62 dim 1 : vector<1x256xf32>, i32 -> vector<1x256xf32>
    %c2_i32_63 = arith.constant 2 : i32
    %c0_i32_64 = arith.constant 0 : i32
    %105 = arith.cmpi eq, %c2_i32_63, %c0_i32_64 : i32
    %c1_i32_65 = arith.constant 1 : i32
    %106 = arith.select %105, %c1_i32_65, %c2_i32_63 : i32
    %107 = vector.broadcast %106 : i32 to vector<1x256xi32>
    %108 = arith.remsi %36, %107 : vector<1x256xi32>
    %c0_i32_66 = arith.constant 0 : i32
    %109 = vector.broadcast %c0_i32_66 : i32 to vector<1x256xi32>
    %110 = arith.cmpi ne, %108, %109 : vector<1x256xi32>
    %c0_i32_67 = arith.constant 0 : i32
    %111 = vector.broadcast %c0_i32_67 : i32 to vector<1x256xi32>
    %112 = arith.cmpi slt, %108, %111 : vector<1x256xi32>
    %c0_i32_68 = arith.constant 0 : i32
    %113 = arith.cmpi slt, %106, %c0_i32_68 : i32
    %114 = vector.broadcast %113 : i1 to vector<1x256xi1>
    %115 = vector.broadcast %114 : vector<1x256xi1> to vector<1x256xi1>
    %116 = arith.xori %112, %115 : vector<1x256xi1>
    %117 = arith.andi %116, %110 : vector<1x256xi1>
    %118 = vector.broadcast %106 : i32 to vector<1x256xi32>
    %119 = arith.addi %108, %118 : vector<1x256xi32>
    %120 = arith.select %117, %119, %108 : vector<1x256xi1>, vector<1x256xi32>
    %c1_i32_69 = arith.constant 1 : i32
    %121 = vector.broadcast %c1_i32_69 : i32 to vector<1x256xi32>
    %122 = arith.cmpi slt, %120, %121 : vector<1x256xi32>
    %123 = arith.select %122, %103, %104 : vector<1x256xi1>, vector<1x256xf32>
    %124 = arith.addf %102, %123 : vector<1x256xf32>
    %cst_70 = arith.constant 7.812500e-03 : f32
    %125 = vector.broadcast %cst_70 : f32 to vector<1x256xf32>
    %126 = arith.mulf %124, %125 : vector<1x256xf32>
    %cst_71 = arith.constant 9.99999974E-6 : f32
    %127 = vector.broadcast %cst_71 : f32 to vector<1x256xf32>
    %128 = arith.addf %126, %127 : vector<1x256xf32>
    %129 = math.rsqrt %128 : vector<1x256xf32>
    %130 = vector.broadcast %129 : vector<1x256xf32> to vector<8x256xf32>
    %131 = arith.mulf %93, %130 : vector<8x256xf32>
    %c0_72 = arith.constant 0 : index
    %c0_73 = arith.constant 0 : index
    %c0_74 = arith.constant 0 : index
    %132 = vector.load %arg7[%c0_72, %c0_73, %c0_74] : memref<3x1x256xf32, #tpu.memory_space<vmem>>, vector<1x1x256xf32>
    %133 = vector.shape_cast %132 : vector<1x1x256xf32> to vector<1x256xf32>
    %134 = vector.broadcast %133 : vector<1x256xf32> to vector<8x256xf32>
    %135 = arith.mulf %131, %134 : vector<8x256xf32>
    %c0_75 = arith.constant 0 : index
    %c0_76 = arith.constant 0 : index
    %c0_77 = arith.constant 0 : index
    %136 = vector.load %arg8[%c0_75, %c0_76, %c0_77] : memref<3x1x256xf32, #tpu.memory_space<vmem>>, vector<1x1x256xf32>
    %137 = vector.shape_cast %136 : vector<1x1x256xf32> to vector<1x256xf32>
    %138 = vector.broadcast %137 : vector<1x256xf32> to vector<8x256xf32>
    %139 = arith.addf %135, %138 : vector<8x256xf32>
    %cst_78 = arith.constant 0.000000e+00 : f32
    %140 = vector.broadcast %cst_78 : f32 to vector<8x256xf32>
    %141 = arith.cmpf ogt, %139, %140 : vector<8x256xf32>
    %c0_79 = arith.constant 0 : index
    %c0_80 = arith.constant 0 : index
    %c0_81 = arith.constant 0 : index
    %142 = vector.load %arg9[%c0_79, %c0_80, %c0_81] : memref<3x1x256xf32, #tpu.memory_space<vmem>>, vector<1x1x256xf32>
    %143 = vector.shape_cast %142 : vector<1x1x256xf32> to vector<1x256xf32>
    %144 = vector.broadcast %143 : vector<1x256xf32> to vector<8x256xf32>
    %145 = arith.mulf %144, %139 : vector<8x256xf32>
    %146 = arith.select %141, %139, %145 : vector<8x256xi1>, vector<8x256xf32>
    %c1_82 = arith.constant 1 : index
    %c128_83 = arith.constant 128 : index
    %147 = vector.load %arg11[%c1_82, %c128_83] : memref<10x512xf32, #tpu.memory_space<vmem>>, vector<8x256xf32>
    tpu.vector_store %arg11[%c1_82, %c128_83], %146 {strides = array<i32>} : memref<10x512xf32, #tpu.memory_space<vmem>>, vector<8x256xf32>,
    %cst_84 = arith.constant 0.000000e+00 : f32
    %148 = vector.broadcast %cst_84 : f32 to vector<8x256xf32>
    %c0_85 = arith.constant 0 : index
    %c0_86 = arith.constant 0 : index
    %149 = vector.load %arg11[%c0_85, %c0_86] : memref<10x512xf32, #tpu.memory_space<vmem>>, vector<8x512xf32>
    %150 = arith.truncf %149 : vector<8x512xf32> to vector<8x512xbf16>
    %c1_87 = arith.constant 1 : index
    %c0_88 = arith.constant 0 : index
    %c0_89 = arith.constant 0 : index
    %c0_90 = arith.constant 0 : index
    %151 = vector.load %arg5[%c1_87, %c0_88, %c0_89, %c0_90] : memref<3x3x512x256xbf16, #tpu.memory_space<vmem>>, vector<1x1x512x256xbf16>
    %152 = vector.shape_cast %151 : vector<1x1x512x256xbf16> to vector<512x256xbf16>
    %cst_91 = arith.constant dense<0.000000e+00> : vector<8x256xf32>
    %153 = tpu.matmul %150, %152, %cst_91 {dimension_numbers = #tpu.dot_dimension_numbers<[1], [0], [0], [1], [0, 0, 1, 1], [], []>} : vector<8x512xbf16>, vector<512x256xbf16>, vector<8x256xf32> -> vector<8x256xf32>
    %154 = arith.addf %148, %153 : vector<8x256xf32>
    %c1_92 = arith.constant 1 : index
    %c0_93 = arith.constant 0 : index
    %155 = vector.load %arg11[%c1_92, %c0_93] : memref<10x512xf32, #tpu.memory_space<vmem>>, vector<8x512xf32>
    %156 = arith.truncf %155 : vector<8x512xf32> to vector<8x512xbf16>
    %c1_94 = arith.constant 1 : index
    %c1_95 = arith.constant 1 : index
    %c0_96 = arith.constant 0 : index
    %c0_97 = arith.constant 0 : index
    %157 = vector.load %arg5[%c1_94, %c1_95, %c0_96, %c0_97] : memref<3x3x512x256xbf16, #tpu.memory_space<vmem>>, vector<1x1x512x256xbf16>
    %158 = vector.shape_cast %157 : vector<1x1x512x256xbf16> to vector<512x256xbf16>
    %cst_98 = arith.constant dense<0.000000e+00> : vector<8x256xf32>
    %159 = tpu.matmul %156, %158, %cst_98 {dimension_numbers = #tpu.dot_dimension_numbers<[1], [0], [0], [1], [0, 0, 1, 1], [], []>} : vector<8x512xbf16>, vector<512x256xbf16>, vector<8x256xf32> -> vector<8x256xf32>
    %160 = arith.addf %154, %159 : vector<8x256xf32>
    %c2_99 = arith.constant 2 : index
    %c0_100 = arith.constant 0 : index
    %161 = vector.load %arg11[%c2_99, %c0_100] : memref<10x512xf32, #tpu.memory_space<vmem>>, vector<8x512xf32>
    %162 = arith.truncf %161 : vector<8x512xf32> to vector<8x512xbf16>
    %c1_101 = arith.constant 1 : index
    %c2_102 = arith.constant 2 : index
    %c0_103 = arith.constant 0 : index
    %c0_104 = arith.constant 0 : index
    %163 = vector.load %arg5[%c1_101, %c2_102, %c0_103, %c0_104] : memref<3x3x512x256xbf16, #tpu.memory_space<vmem>>, vector<1x1x512x256xbf16>
    %164 = vector.shape_cast %163 : vector<1x1x512x256xbf16> to vector<512x256xbf16>
    %cst_105 = arith.constant dense<0.000000e+00> : vector<8x256xf32>
    %165 = tpu.matmul %162, %164, %cst_105 {dimension_numbers = #tpu.dot_dimension_numbers<[1], [0], [0], [1], [0, 0, 1, 1], [], []>} : vector<8x512xbf16>, vector<512x256xbf16>, vector<8x256xf32> -> vector<8x256xf32>
    %166 = arith.addf %160, %165 : vector<8x256xf32>
    %c1_106 = arith.constant 1 : index
    %c0_107 = arith.constant 0 : index
    %c0_108 = arith.constant 0 : index
    %167 = vector.load %arg6[%c1_106, %c0_107, %c0_108] : memref<3x1x256xf32, #tpu.memory_space<vmem>>, vector<1x1x256xf32>
    %168 = vector.shape_cast %167 : vector<1x1x256xf32> to vector<1x256xf32>
    %169 = vector.broadcast %168 : vector<1x256xf32> to vector<8x256xf32>
    %170 = arith.addf %166, %169 : vector<8x256xf32>
    %cst_109 = arith.constant dense<0.000000e+00> : vector<256xf32>
    %171 = vector.multi_reduction <add>, %170, %cst_109 [0] : vector<8x256xf32> to vector<256xf32>
    %172 = vector.shape_cast %171 : vector<256xf32> to vector<1x256xf32>
    %c32_i32_110 = arith.constant 32 : i32
    %173 = tpu.dynamic_rotate %172 by %c32_i32_110 dim 1 : vector<1x256xf32>, i32 -> vector<1x256xf32>
    %174 = arith.addf %172, %173 : vector<1x256xf32>
    %c64_i32_111 = arith.constant 64 : i32
    %175 = tpu.dynamic_rotate %174 by %c64_i32_111 dim 1 : vector<1x256xf32>, i32 -> vector<1x256xf32>
    %176 = arith.addf %174, %175 : vector<1x256xf32>
    %c128_i32_112 = arith.constant 128 : i32
    %177 = tpu.dynamic_rotate %176 by %c128_i32_112 dim 1 : vector<1x256xf32>, i32 -> vector<1x256xf32>
    %178 = arith.addf %176, %177 : vector<1x256xf32>
    %c255_i32_113 = arith.constant 255 : i32
    %179 = tpu.dynamic_rotate %178 by %c255_i32_113 dim 1 : vector<1x256xf32>, i32 -> vector<1x256xf32>
    %c1_i32_114 = arith.constant 1 : i32
    %180 = tpu.dynamic_rotate %178 by %c1_i32_114 dim 1 : vector<1x256xf32>, i32 -> vector<1x256xf32>
    %c2_i32_115 = arith.constant 2 : i32
    %c0_i32_116 = arith.constant 0 : i32
    %181 = arith.cmpi eq, %c2_i32_115, %c0_i32_116 : i32
    %c1_i32_117 = arith.constant 1 : i32
    %182 = arith.select %181, %c1_i32_117, %c2_i32_115 : i32
    %183 = vector.broadcast %182 : i32 to vector<1x256xi32>
    %184 = arith.remsi %36, %183 : vector<1x256xi32>
    %c0_i32_118 = arith.constant 0 : i32
    %185 = vector.broadcast %c0_i32_118 : i32 to vector<1x256xi32>
    %186 = arith.cmpi ne, %184, %185 : vector<1x256xi32>
    %c0_i32_119 = arith.constant 0 : i32
    %187 = vector.broadcast %c0_i32_119 : i32 to vector<1x256xi32>
    %188 = arith.cmpi slt, %184, %187 : vector<1x256xi32>
    %c0_i32_120 = arith.constant 0 : i32
    %189 = arith.cmpi slt, %182, %c0_i32_120 : i32
    %190 = vector.broadcast %189 : i1 to vector<1x256xi1>
    %191 = vector.broadcast %190 : vector<1x256xi1> to vector<1x256xi1>
    %192 = arith.xori %188, %191 : vector<1x256xi1>
    %193 = arith.andi %192, %186 : vector<1x256xi1>
    %194 = vector.broadcast %182 : i32 to vector<1x256xi32>
    %195 = arith.addi %184, %194 : vector<1x256xi32>
    %196 = arith.select %193, %195, %184 : vector<1x256xi1>, vector<1x256xi32>
    %c1_i32_121 = arith.constant 1 : i32
    %197 = vector.broadcast %c1_i32_121 : i32 to vector<1x256xi32>
    %198 = arith.cmpi slt, %196, %197 : vector<1x256xi32>
    %199 = arith.select %198, %179, %180 : vector<1x256xi1>, vector<1x256xf32>
    %200 = arith.addf %178, %199 : vector<1x256xf32>
    %cst_122 = arith.constant 7.812500e-03 : f32
    %201 = vector.broadcast %cst_122 : f32 to vector<1x256xf32>
    %202 = arith.mulf %200, %201 : vector<1x256xf32>
    %203 = vector.broadcast %202 : vector<1x256xf32> to vector<8x256xf32>
    %204 = arith.subf %170, %203 : vector<8x256xf32>
    %205 = arith.mulf %204, %204 : vector<8x256xf32>
    %cst_123 = arith.constant dense<0.000000e+00> : vector<256xf32>
    %206 = vector.multi_reduction <add>, %205, %cst_123 [0] : vector<8x256xf32> to vector<256xf32>
    %207 = vector.shape_cast %206 : vector<256xf32> to vector<1x256xf32>
    %c32_i32_124 = arith.constant 32 : i32
    %208 = tpu.dynamic_rotate %207 by %c32_i32_124 dim 1 : vector<1x256xf32>, i32 -> vector<1x256xf32>
    %209 = arith.addf %207, %208 : vector<1x256xf32>
    %c64_i32_125 = arith.constant 64 : i32
    %210 = tpu.dynamic_rotate %209 by %c64_i32_125 dim 1 : vector<1x256xf32>, i32 -> vector<1x256xf32>
    %211 = arith.addf %209, %210 : vector<1x256xf32>
    %c128_i32_126 = arith.constant 128 : i32
    %212 = tpu.dynamic_rotate %211 by %c128_i32_126 dim 1 : vector<1x256xf32>, i32 -> vector<1x256xf32>
    %213 = arith.addf %211, %212 : vector<1x256xf32>
    %c255_i32_127 = arith.constant 255 : i32
    %214 = tpu.dynamic_rotate %213 by %c255_i32_127 dim 1 : vector<1x256xf32>, i32 -> vector<1x256xf32>
    %c1_i32_128 = arith.constant 1 : i32
    %215 = tpu.dynamic_rotate %213 by %c1_i32_128 dim 1 : vector<1x256xf32>, i32 -> vector<1x256xf32>
    %c2_i32_129 = arith.constant 2 : i32
    %c0_i32_130 = arith.constant 0 : i32
    %216 = arith.cmpi eq, %c2_i32_129, %c0_i32_130 : i32
    %c1_i32_131 = arith.constant 1 : i32
    %217 = arith.select %216, %c1_i32_131, %c2_i32_129 : i32
    %218 = vector.broadcast %217 : i32 to vector<1x256xi32>
    %219 = arith.remsi %36, %218 : vector<1x256xi32>
    %c0_i32_132 = arith.constant 0 : i32
    %220 = vector.broadcast %c0_i32_132 : i32 to vector<1x256xi32>
    %221 = arith.cmpi ne, %219, %220 : vector<1x256xi32>
    %c0_i32_133 = arith.constant 0 : i32
    %222 = vector.broadcast %c0_i32_133 : i32 to vector<1x256xi32>
    %223 = arith.cmpi slt, %219, %222 : vector<1x256xi32>
    %c0_i32_134 = arith.constant 0 : i32
    %224 = arith.cmpi slt, %217, %c0_i32_134 : i32
    %225 = vector.broadcast %224 : i1 to vector<1x256xi1>
    %226 = vector.broadcast %225 : vector<1x256xi1> to vector<1x256xi1>
    %227 = arith.xori %223, %226 : vector<1x256xi1>
    %228 = arith.andi %227, %221 : vector<1x256xi1>
    %229 = vector.broadcast %217 : i32 to vector<1x256xi32>
    %230 = arith.addi %219, %229 : vector<1x256xi32>
    %231 = arith.select %228, %230, %219 : vector<1x256xi1>, vector<1x256xi32>
    %c1_i32_135 = arith.constant 1 : i32
    %232 = vector.broadcast %c1_i32_135 : i32 to vector<1x256xi32>
    %233 = arith.cmpi slt, %231, %232 : vector<1x256xi32>
    %234 = arith.select %233, %214, %215 : vector<1x256xi1>, vector<1x256xf32>
    %235 = arith.addf %213, %234 : vector<1x256xf32>
    %cst_136 = arith.constant 7.812500e-03 : f32
    %236 = vector.broadcast %cst_136 : f32 to vector<1x256xf32>
    %237 = arith.mulf %235, %236 : vector<1x256xf32>
    %cst_137 = arith.constant 9.99999974E-6 : f32
    %238 = vector.broadcast %cst_137 : f32 to vector<1x256xf32>
    %239 = arith.addf %237, %238 : vector<1x256xf32>
    %240 = math.rsqrt %239 : vector<1x256xf32>
    %241 = vector.broadcast %240 : vector<1x256xf32> to vector<8x256xf32>
    %242 = arith.mulf %204, %241 : vector<8x256xf32>
    %c1_138 = arith.constant 1 : index
    %c0_139 = arith.constant 0 : index
    %c0_140 = arith.constant 0 : index
    %243 = vector.load %arg7[%c1_138, %c0_139, %c0_140] : memref<3x1x256xf32, #tpu.memory_space<vmem>>, vector<1x1x256xf32>
    %244 = vector.shape_cast %243 : vector<1x1x256xf32> to vector<1x256xf32>
    %245 = vector.broadcast %244 : vector<1x256xf32> to vector<8x256xf32>
    %246 = arith.mulf %242, %245 : vector<8x256xf32>
    %c1_141 = arith.constant 1 : index
    %c0_142 = arith.constant 0 : index
    %c0_143 = arith.constant 0 : index
    %247 = vector.load %arg8[%c1_141, %c0_142, %c0_143] : memref<3x1x256xf32, #tpu.memory_space<vmem>>, vector<1x1x256xf32>
    %248 = vector.shape_cast %247 : vector<1x1x256xf32> to vector<1x256xf32>
    %249 = vector.broadcast %248 : vector<1x256xf32> to vector<8x256xf32>
    %250 = arith.addf %246, %249 : vector<8x256xf32>
    %cst_144 = arith.constant 0.000000e+00 : f32
    %251 = vector.broadcast %cst_144 : f32 to vector<8x256xf32>
    %252 = arith.cmpf ogt, %250, %251 : vector<8x256xf32>
    %c1_145 = arith.constant 1 : index
    %c0_146 = arith.constant 0 : index
    %c0_147 = arith.constant 0 : index
    %253 = vector.load %arg9[%c1_145, %c0_146, %c0_147] : memref<3x1x256xf32, #tpu.memory_space<vmem>>, vector<1x1x256xf32>
    %254 = vector.shape_cast %253 : vector<1x1x256xf32> to vector<1x256xf32>
    %255 = vector.broadcast %254 : vector<1x256xf32> to vector<8x256xf32>
    %256 = arith.mulf %255, %250 : vector<8x256xf32>
    %257 = arith.select %252, %250, %256 : vector<8x256xi1>, vector<8x256xf32>
    %c1_148 = arith.constant 1 : index
    %c128_149 = arith.constant 128 : index
    %258 = vector.load %arg11[%c1_148, %c128_149] : memref<10x512xf32, #tpu.memory_space<vmem>>, vector<8x256xf32>
    tpu.vector_store %arg11[%c1_148, %c128_149], %257 {strides = array<i32>} : memref<10x512xf32, #tpu.memory_space<vmem>>, vector<8x256xf32>,
    %cst_150 = arith.constant 0.000000e+00 : f32
    %259 = vector.broadcast %cst_150 : f32 to vector<8x256xf32>
    %c0_151 = arith.constant 0 : index
    %c0_152 = arith.constant 0 : index
    %260 = vector.load %arg11[%c0_151, %c0_152] : memref<10x512xf32, #tpu.memory_space<vmem>>, vector<8x512xf32>
    %261 = arith.truncf %260 : vector<8x512xf32> to vector<8x512xbf16>
    %c2_153 = arith.constant 2 : index
    %c0_154 = arith.constant 0 : index
    %c0_155 = arith.constant 0 : index
    %c0_156 = arith.constant 0 : index
    %262 = vector.load %arg5[%c2_153, %c0_154, %c0_155, %c0_156] : memref<3x3x512x256xbf16, #tpu.memory_space<vmem>>, vector<1x1x512x256xbf16>
    %263 = vector.shape_cast %262 : vector<1x1x512x256xbf16> to vector<512x256xbf16>
    %cst_157 = arith.constant dense<0.000000e+00> : vector<8x256xf32>
    %264 = tpu.matmul %261, %263, %cst_157 {dimension_numbers = #tpu.dot_dimension_numbers<[1], [0], [0], [1], [0, 0, 1, 1], [], []>} : vector<8x512xbf16>, vector<512x256xbf16>, vector<8x256xf32> -> vector<8x256xf32>
    %265 = arith.addf %259, %264 : vector<8x256xf32>
    %c1_158 = arith.constant 1 : index
    %c0_159 = arith.constant 0 : index
    %266 = vector.load %arg11[%c1_158, %c0_159] : memref<10x512xf32, #tpu.memory_space<vmem>>, vector<8x512xf32>
    %267 = arith.truncf %266 : vector<8x512xf32> to vector<8x512xbf16>
    %c2_160 = arith.constant 2 : index
    %c1_161 = arith.constant 1 : index
    %c0_162 = arith.constant 0 : index
    %c0_163 = arith.constant 0 : index
    %268 = vector.load %arg5[%c2_160, %c1_161, %c0_162, %c0_163] : memref<3x3x512x256xbf16, #tpu.memory_space<vmem>>, vector<1x1x512x256xbf16>
    %269 = vector.shape_cast %268 : vector<1x1x512x256xbf16> to vector<512x256xbf16>
    %cst_164 = arith.constant dense<0.000000e+00> : vector<8x256xf32>
    %270 = tpu.matmul %267, %269, %cst_164 {dimension_numbers = #tpu.dot_dimension_numbers<[1], [0], [0], [1], [0, 0, 1, 1], [], []>} : vector<8x512xbf16>, vector<512x256xbf16>, vector<8x256xf32> -> vector<8x256xf32>
    %271 = arith.addf %265, %270 : vector<8x256xf32>
    %c2_165 = arith.constant 2 : index
    %c0_166 = arith.constant 0 : index
    %272 = vector.load %arg11[%c2_165, %c0_166] : memref<10x512xf32, #tpu.memory_space<vmem>>, vector<8x512xf32>
    %273 = arith.truncf %272 : vector<8x512xf32> to vector<8x512xbf16>
    %c2_167 = arith.constant 2 : index
    %c2_168 = arith.constant 2 : index
    %c0_169 = arith.constant 0 : index
    %c0_170 = arith.constant 0 : index
    %274 = vector.load %arg5[%c2_167, %c2_168, %c0_169, %c0_170] : memref<3x3x512x256xbf16, #tpu.memory_space<vmem>>, vector<1x1x512x256xbf16>
    %275 = vector.shape_cast %274 : vector<1x1x512x256xbf16> to vector<512x256xbf16>
    %cst_171 = arith.constant dense<0.000000e+00> : vector<8x256xf32>
    %276 = tpu.matmul %273, %275, %cst_171 {dimension_numbers = #tpu.dot_dimension_numbers<[1], [0], [0], [1], [0, 0, 1, 1], [], []>} : vector<8x512xbf16>, vector<512x256xbf16>, vector<8x256xf32> -> vector<8x256xf32>
    %277 = arith.addf %271, %276 : vector<8x256xf32>
    %c2_172 = arith.constant 2 : index
    %c0_173 = arith.constant 0 : index
    %c0_174 = arith.constant 0 : index
    %278 = vector.load %arg6[%c2_172, %c0_173, %c0_174] : memref<3x1x256xf32, #tpu.memory_space<vmem>>, vector<1x1x256xf32>
    %279 = vector.shape_cast %278 : vector<1x1x256xf32> to vector<1x256xf32>
    %280 = vector.broadcast %279 : vector<1x256xf32> to vector<8x256xf32>
    %281 = arith.addf %277, %280 : vector<8x256xf32>
    %cst_175 = arith.constant dense<0.000000e+00> : vector<256xf32>
    %282 = vector.multi_reduction <add>, %281, %cst_175 [0] : vector<8x256xf32> to vector<256xf32>
    %283 = vector.shape_cast %282 : vector<256xf32> to vector<1x256xf32>
    %c32_i32_176 = arith.constant 32 : i32
    %284 = tpu.dynamic_rotate %283 by %c32_i32_176 dim 1 : vector<1x256xf32>, i32 -> vector<1x256xf32>
    %285 = arith.addf %283, %284 : vector<1x256xf32>
    %c64_i32_177 = arith.constant 64 : i32
    %286 = tpu.dynamic_rotate %285 by %c64_i32_177 dim 1 : vector<1x256xf32>, i32 -> vector<1x256xf32>
    %287 = arith.addf %285, %286 : vector<1x256xf32>
    %c128_i32_178 = arith.constant 128 : i32
    %288 = tpu.dynamic_rotate %287 by %c128_i32_178 dim 1 : vector<1x256xf32>, i32 -> vector<1x256xf32>
    %289 = arith.addf %287, %288 : vector<1x256xf32>
    %c255_i32_179 = arith.constant 255 : i32
    %290 = tpu.dynamic_rotate %289 by %c255_i32_179 dim 1 : vector<1x256xf32>, i32 -> vector<1x256xf32>
    %c1_i32_180 = arith.constant 1 : i32
    %291 = tpu.dynamic_rotate %289 by %c1_i32_180 dim 1 : vector<1x256xf32>, i32 -> vector<1x256xf32>
    %c2_i32_181 = arith.constant 2 : i32
    %c0_i32_182 = arith.constant 0 : i32
    %292 = arith.cmpi eq, %c2_i32_181, %c0_i32_182 : i32
    %c1_i32_183 = arith.constant 1 : i32
    %293 = arith.select %292, %c1_i32_183, %c2_i32_181 : i32
    %294 = vector.broadcast %293 : i32 to vector<1x256xi32>
    %295 = arith.remsi %36, %294 : vector<1x256xi32>
    %c0_i32_184 = arith.constant 0 : i32
    %296 = vector.broadcast %c0_i32_184 : i32 to vector<1x256xi32>
    %297 = arith.cmpi ne, %295, %296 : vector<1x256xi32>
    %c0_i32_185 = arith.constant 0 : i32
    %298 = vector.broadcast %c0_i32_185 : i32 to vector<1x256xi32>
    %299 = arith.cmpi slt, %295, %298 : vector<1x256xi32>
    %c0_i32_186 = arith.constant 0 : i32
    %300 = arith.cmpi slt, %293, %c0_i32_186 : i32
    %301 = vector.broadcast %300 : i1 to vector<1x256xi1>
    %302 = vector.broadcast %301 : vector<1x256xi1> to vector<1x256xi1>
    %303 = arith.xori %299, %302 : vector<1x256xi1>
    %304 = arith.andi %303, %297 : vector<1x256xi1>
    %305 = vector.broadcast %293 : i32 to vector<1x256xi32>
    %306 = arith.addi %295, %305 : vector<1x256xi32>
    %307 = arith.select %304, %306, %295 : vector<1x256xi1>, vector<1x256xi32>
    %c1_i32_187 = arith.constant 1 : i32
    %308 = vector.broadcast %c1_i32_187 : i32 to vector<1x256xi32>
    %309 = arith.cmpi slt, %307, %308 : vector<1x256xi32>
    %310 = arith.select %309, %290, %291 : vector<1x256xi1>, vector<1x256xf32>
    %311 = arith.addf %289, %310 : vector<1x256xf32>
    %cst_188 = arith.constant 7.812500e-03 : f32
    %312 = vector.broadcast %cst_188 : f32 to vector<1x256xf32>
    %313 = arith.mulf %311, %312 : vector<1x256xf32>
    %314 = vector.broadcast %313 : vector<1x256xf32> to vector<8x256xf32>
    %315 = arith.subf %281, %314 : vector<8x256xf32>
    %316 = arith.mulf %315, %315 : vector<8x256xf32>
    %cst_189 = arith.constant dense<0.000000e+00> : vector<256xf32>
    %317 = vector.multi_reduction <add>, %316, %cst_189 [0] : vector<8x256xf32> to vector<256xf32>
    %318 = vector.shape_cast %317 : vector<256xf32> to vector<1x256xf32>
    %c32_i32_190 = arith.constant 32 : i32
    %319 = tpu.dynamic_rotate %318 by %c32_i32_190 dim 1 : vector<1x256xf32>, i32 -> vector<1x256xf32>
    %320 = arith.addf %318, %319 : vector<1x256xf32>
    %c64_i32_191 = arith.constant 64 : i32
    %321 = tpu.dynamic_rotate %320 by %c64_i32_191 dim 1 : vector<1x256xf32>, i32 -> vector<1x256xf32>
    %322 = arith.addf %320, %321 : vector<1x256xf32>
    %c128_i32_192 = arith.constant 128 : i32
    %323 = tpu.dynamic_rotate %322 by %c128_i32_192 dim 1 : vector<1x256xf32>, i32 -> vector<1x256xf32>
    %324 = arith.addf %322, %323 : vector<1x256xf32>
    %c255_i32_193 = arith.constant 255 : i32
    %325 = tpu.dynamic_rotate %324 by %c255_i32_193 dim 1 : vector<1x256xf32>, i32 -> vector<1x256xf32>
    %c1_i32_194 = arith.constant 1 : i32
    %326 = tpu.dynamic_rotate %324 by %c1_i32_194 dim 1 : vector<1x256xf32>, i32 -> vector<1x256xf32>
    %c2_i32_195 = arith.constant 2 : i32
    %c0_i32_196 = arith.constant 0 : i32
    %327 = arith.cmpi eq, %c2_i32_195, %c0_i32_196 : i32
    %c1_i32_197 = arith.constant 1 : i32
    %328 = arith.select %327, %c1_i32_197, %c2_i32_195 : i32
    %329 = vector.broadcast %328 : i32 to vector<1x256xi32>
    %330 = arith.remsi %36, %329 : vector<1x256xi32>
    %c0_i32_198 = arith.constant 0 : i32
    %331 = vector.broadcast %c0_i32_198 : i32 to vector<1x256xi32>
    %332 = arith.cmpi ne, %330, %331 : vector<1x256xi32>
    %c0_i32_199 = arith.constant 0 : i32
    %333 = vector.broadcast %c0_i32_199 : i32 to vector<1x256xi32>
    %334 = arith.cmpi slt, %330, %333 : vector<1x256xi32>
    %c0_i32_200 = arith.constant 0 : i32
    %335 = arith.cmpi slt, %328, %c0_i32_200 : i32
    %336 = vector.broadcast %335 : i1 to vector<1x256xi1>
    %337 = vector.broadcast %336 : vector<1x256xi1> to vector<1x256xi1>
    %338 = arith.xori %334, %337 : vector<1x256xi1>
    %339 = arith.andi %338, %332 : vector<1x256xi1>
    %340 = vector.broadcast %328 : i32 to vector<1x256xi32>
    %341 = arith.addi %330, %340 : vector<1x256xi32>
    %342 = arith.select %339, %341, %330 : vector<1x256xi1>, vector<1x256xi32>
    %c1_i32_201 = arith.constant 1 : i32
    %343 = vector.broadcast %c1_i32_201 : i32 to vector<1x256xi32>
    %344 = arith.cmpi slt, %342, %343 : vector<1x256xi32>
    %345 = arith.select %344, %325, %326 : vector<1x256xi1>, vector<1x256xf32>
    %346 = arith.addf %324, %345 : vector<1x256xf32>
    %cst_202 = arith.constant 7.812500e-03 : f32
    %347 = vector.broadcast %cst_202 : f32 to vector<1x256xf32>
    %348 = arith.mulf %346, %347 : vector<1x256xf32>
    %cst_203 = arith.constant 9.99999974E-6 : f32
    %349 = vector.broadcast %cst_203 : f32 to vector<1x256xf32>
    %350 = arith.addf %348, %349 : vector<1x256xf32>
    %351 = math.rsqrt %350 : vector<1x256xf32>
    %352 = vector.broadcast %351 : vector<1x256xf32> to vector<8x256xf32>
    %353 = arith.mulf %315, %352 : vector<8x256xf32>
    %c2_204 = arith.constant 2 : index
    %c0_205 = arith.constant 0 : index
    %c0_206 = arith.constant 0 : index
    %354 = vector.load %arg7[%c2_204, %c0_205, %c0_206] : memref<3x1x256xf32, #tpu.memory_space<vmem>>, vector<1x1x256xf32>
    %355 = vector.shape_cast %354 : vector<1x1x256xf32> to vector<1x256xf32>
    %356 = vector.broadcast %355 : vector<1x256xf32> to vector<8x256xf32>
    %357 = arith.mulf %353, %356 : vector<8x256xf32>
    %c2_207 = arith.constant 2 : index
    %c0_208 = arith.constant 0 : index
    %c0_209 = arith.constant 0 : index
    %358 = vector.load %arg8[%c2_207, %c0_208, %c0_209] : memref<3x1x256xf32, #tpu.memory_space<vmem>>, vector<1x1x256xf32>
    %359 = vector.shape_cast %358 : vector<1x1x256xf32> to vector<1x256xf32>
    %360 = vector.broadcast %359 : vector<1x256xf32> to vector<8x256xf32>
    %361 = arith.addf %357, %360 : vector<8x256xf32>
    %cst_210 = arith.constant 0.000000e+00 : f32
    %362 = vector.broadcast %cst_210 : f32 to vector<8x256xf32>
    %363 = arith.cmpf ogt, %361, %362 : vector<8x256xf32>
    %c2_211 = arith.constant 2 : index
    %c0_212 = arith.constant 0 : index
    %c0_213 = arith.constant 0 : index
    %364 = vector.load %arg9[%c2_211, %c0_212, %c0_213] : memref<3x1x256xf32, #tpu.memory_space<vmem>>, vector<1x1x256xf32>
    %365 = vector.shape_cast %364 : vector<1x1x256xf32> to vector<1x256xf32>
    %366 = vector.broadcast %365 : vector<1x256xf32> to vector<8x256xf32>
    %367 = arith.mulf %366, %361 : vector<8x256xf32>
    %368 = arith.select %363, %361, %367 : vector<8x256xi1>, vector<8x256xf32>
    %c0_214 = arith.constant 0 : index
    %c0_215 = arith.constant 0 : index
    %c0_216 = arith.constant 0 : index
    %369 = vector.load %arg10[%c0_214, %c0_215, %c0_216] : memref<1x8x256xf32, #tpu.memory_space<vmem>>, vector<1x8x256xf32>
    %370 = vector.shape_cast %369 : vector<1x8x256xf32> to vector<8x256xf32>
    %371 = vector.shape_cast %368 : vector<8x256xf32> to vector<1x8x256xf32>
    tpu.vector_store %arg10[%c0_214, %c0_215, %c0_216], %371 {strides = array<i32>} : memref<1x8x256xf32, #tpu.memory_space<vmem>>, vector<1x8x256xf32>,
    return
  }
  func.func @transform_0(%arg0: i32) -> (i32, i32, i32) {
    %c0_i32 = arith.constant 0 : i32
    %c0_i32_0 = arith.constant 0 : i32
    %c0_i32_1 = arith.constant 0 : i32
    return %arg0, %c0_i32, %c0_i32_0 : i32, i32, i32
  }
  func.func @transform_1(%arg0: i32) -> (i32, i32, i32) {
    %c0_i32 = arith.constant 0 : i32
    %c0_i32_0 = arith.constant 0 : i32
    %c0_i32_1 = arith.constant 0 : i32
    return %arg0, %c0_i32, %c0_i32_0 : i32, i32, i32
  }
  func.func @transform_2(%arg0: i32) -> (i32, i32, i32) {
    %c0_i32 = arith.constant 0 : i32
    %c0_i32_0 = arith.constant 0 : i32
    %c0_i32_1 = arith.constant 0 : i32
    return %arg0, %c0_i32, %c0_i32_0 : i32, i32, i32
  }
  func.func @transform_3(%arg0: i32) -> (i32, i32, i32) {
    %c0_i32 = arith.constant 0 : i32
    %c0_i32_0 = arith.constant 0 : i32
    %c0_i32_1 = arith.constant 0 : i32
    return %arg0, %c0_i32, %c0_i32_0 : i32, i32, i32
  }
  func.func @transform_4(%arg0: i32) -> (i32, i32, i32, i32) {
    %c0_i32 = arith.constant 0 : i32
    %c0_i32_0 = arith.constant 0 : i32
    %c0_i32_1 = arith.constant 0 : i32
    %c0_i32_2 = arith.constant 0 : i32
    %c0_i32_3 = arith.constant 0 : i32
    return %c0_i32, %c0_i32_0, %c0_i32_1, %c0_i32_2 : i32, i32, i32, i32
  }
  func.func @transform_5(%arg0: i32) -> (i32, i32, i32) {
    %c0_i32 = arith.constant 0 : i32
    %c0_i32_0 = arith.constant 0 : i32
    %c0_i32_1 = arith.constant 0 : i32
    %c0_i32_2 = arith.constant 0 : i32
    return %c0_i32, %c0_i32_0, %c0_i32_1 : i32, i32, i32
  }
  func.func @transform_6(%arg0: i32) -> (i32, i32, i32) {
    %c0_i32 = arith.constant 0 : i32
    %c0_i32_0 = arith.constant 0 : i32
    %c0_i32_1 = arith.constant 0 : i32
    %c0_i32_2 = arith.constant 0 : i32
    return %c0_i32, %c0_i32_0, %c0_i32_1 : i32, i32, i32
  }
  func.func @transform_7(%arg0: i32) -> (i32, i32, i32) {
    %c0_i32 = arith.constant 0 : i32
    %c0_i32_0 = arith.constant 0 : i32
    %c0_i32_1 = arith.constant 0 : i32
    %c0_i32_2 = arith.constant 0 : i32
    return %c0_i32, %c0_i32_0, %c0_i32_1 : i32, i32, i32
  }
  func.func @transform_8(%arg0: i32) -> (i32, i32, i32) {
    %c0_i32 = arith.constant 0 : i32
    %c0_i32_0 = arith.constant 0 : i32
    %c0_i32_1 = arith.constant 0 : i32
    %c0_i32_2 = arith.constant 0 : i32
    return %c0_i32, %c0_i32_0, %c0_i32_1 : i32, i32, i32
  }
  func.func @transform_9(%arg0: i32) -> (i32, i32, i32) {
    %c0_i32 = arith.constant 0 : i32
    %c0_i32_0 = arith.constant 0 : i32
    %c0_i32_1 = arith.constant 0 : i32
    return %arg0, %c0_i32, %c0_i32_0 : i32, i32, i32
  }
}

</mosaic_0001>

<bundles_post_ra>
// kernel: tile.63
= control target key start
LH: loop header
LB: loop body
LE: loop exit
PB: predicated region body
PF: predicated region fallthrough
CT: control target
= control target key end

     0   :  { %s22_s0 = inlined_call_operand.vmem [shape: f32[32], index: 0, kind: input, shape index: {}]   ;;  %s23_s1 = inlined_call_operand.vmem [shape: f32[8,32], index: 1, kind: output, shape index: {}]  }
   0x1   :  { %v4_v0 = vld [vmem:[%s22_s0] ss:$0 sm:$0xff] }
   0x2   :  { %5 = vst [vmem:[%s23_s1] sm:$0xff] %v4_v0 }

// kernel: tile.72
= control target key start
LH: loop header
LB: loop body
LE: loop exit
PB: predicated region body
PF: predicated region fallthrough
CT: control target
= control target key end

     0   :  { %s7_s6 = smov 3  ;;  %s46_s9 = smov 96   ;;  %vm4_vm0 = vcmask 261120   ;;  %vm11_vm1 = vcmask 1048320   ;;  %vm18_vm2 = vcmask 785920   ;;  %vm25_vm3 = vcmask 523520   ;;  %s77_s0 = inlined_call_operand.vmem [shape: f32[8,32], index: 0, kind: input, shape index: {}]   ;;  %s78_s1 = inlined_call_operand.vmem [shape: f32[1,1,256], index: 1, kind: output, shape index: {}]  }
   0x1   :  { %v39_v0 = vld [vmem:[%s77_s0 + $0x3] ss:$4 sm:%s7_s6]   ;;  %s21_s10 = smov 3  ;;  %s14_s13 = smov 3 }
   0x2   :  { %9 = vrot.lane.b32.xlu0 %v39_v0, %s46_s9  ;;  %v41_v1 = vld [vmem:[%s77_s0 + $0x1] ss:$4 sm:%s21_s10]   ;;  %s47_s14 = smov 32   ;;  %s48_s17 = smov 64  }
   0x3   :  { %23 = vrot.lane.b32.xlu1 %v41_v1, %s47_s14  ;;  %v40_v2 = vld [vmem:[%s77_s0 + $0x2] ss:$4 sm:%s14_s13]   ;;  %s2_s18 = smov 3 }
   0x4   :  { %v3_v3 = vld [vmem:[%s77_s0] ss:$4 sm:%s2_s18]  }
   0x5   :  { %5 = vst.msk [vmem:[#allocation0] ss:$8 sm:$0x3] %vm4_vm0, %v3_v3  }
   0xa   :  { %16 = vrot.lane.b32.xlu0 %v40_v2, %s48_s17 }
  0x74   :  { %v10_v4 = vpop.permute.xlu0 %9  }
  0x75   :  { %12 = vst.msk [vmem:[#allocation0] ss:$8 sm:$0x3] %vm11_vm1, %v10_v4   ;;  %v24_v5 = vpop.permute.xlu1 %23  }
  0x7c   :  { %v17_v6 = vpop.permute.xlu0 %16  }
  0x7d   :  { %19 = vst.msk [vmem:[#allocation0] ss:$8 sm:$0x3] %vm18_vm2, %v17_v6  }
  0x7e   :  { %26 = vst.msk [vmem:[#allocation0] ss:$8 sm:$0x3] %vm25_vm3, %v24_v5  }
  0x85   :  { %v29_v7 = vld [vmem:[#allocation0] sm:$0x1]  ;;  %v34_v8 = vld [vmem:[#allocation0 + $0x8] sm:$0x1] }
  0x86   :  { %32 = vst [vmem:[%s78_s1] sm:$0x1] %v29_v7 }
  0x87   :  { %42 = vst [vmem:[%s78_s1 + $0x1] sm:$0x1] %v34_v8 }

// kernel: down_forward.1
= control target key start
LH: loop header
LB: loop body
LE: loop exit
PB: predicated region body
PF: predicated region fallthrough
CT: control target
= control target key end

     0   :  { %s9188_s30 = smov 0   ;;  %s13143_s0 = inlined_call_operand.vmem [shape: f32[2,8,256], index: 0, kind: input, shape index: {}]   ;;  %s13144_s1 = inlined_call_operand.vmem [shape: f32[2,8,256], index: 1, kind: input, shape index: {}]   ;;  %s13145_s2 = inlined_call_operand.vmem [shape: f32[2,8,256], index: 2, kind: input, shape index: {}]   ;;  %s13146_s3 = inlined_call_operand.vmem [shape: f32[2,8,256], index: 3, kind: input, shape index: {}]   ;;  %s13147_s4 = inlined_call_operand.vmem [shape: bf16[3,3,512,256], index: 4, kind: input, shape index: {}]   ;;  %s13148_s5 = inlined_call_operand.vmem [shape: f32[3,1,256], index: 5, kind: input, shape index: {}]   ;;  %s13149_s6 = inlined_call_operand.vmem [shape: f32[3,1,256], index: 6, kind: input, shape index: {}]   ;;  %s13150_s7 = inlined_call_operand.vmem [shape: f32[3,1,256], index: 7, kind: input, shape index: {}]   ;;  %s13151_s8 = inlined_call_operand.vmem [shape: f32[3,1,256], index: 8, kind: input, shape index: {}]   ;;  %s13152_s9 = inlined_call_operand.vmem [shape: f32[2,8,256], index: 9, kind: output, shape index: {}]  }
   0x1 LB: > { %s5678_s10 = sadd.s32 4294967295, %s9131_s30   ;;  %p5682_p0 = scmp.ge.s32.totalorder %s9131_s30, 1  ;;  %s9131_s30 = sphi %s9188_s30, %s19_s30  }
   0x2   : > { %p317_p1 = scmp.lt.s32.totalorder %s9131_s30, 3 }
   0x4   : > { %p318_p2 = pnand %p5682_p0, %p317_p1 }
   0x5   : > { %p368_p3 = scmp.lt.s32.totalorder (!%p318_p2), %s5678_s10, 1  ;;  %s9134_s14 = smov (!%p318_p2), 32  }
   0x6   : > { %321 = sbr.rel (%p318_p2) target bundleno = 3250 (0xcb2), region = 56  ;;  %s9136_s16 = smov (!%p318_p2), 127  }
   0x7   : > { %s9137_s17 = smov (!%p318_p2), 1  }
   0xb   : > { %v5815_v0 = vld [vmem:[%s13147_s4 + $0x270] sm:$0xf]  ;;  %v8603_v1 = vld [vmem:[%s13147_s4 + $0x274] sm:$0xf0]  ;;  %v5807_v11 = vld [vmem:[%s13147_s4 + $0x260] sm:$0xf] }
   0xc   : > { %v5879_v2 = vld [vmem:[%s13147_s4 + $0x2f0] sm:$0xf]  ;;  %v5816_v3 = vor.u32 %v8603_v1, %v5815_v0  ;;  %v8619_v4 = vld [vmem:[%s13147_s4 + $0x2f4] sm:$0xf0]  ;;  %v8601_v13 = vld [vmem:[%s13147_s4 + $0x264] sm:$0xf0] }
   0xd   : > { %v5943_v5 = vld [vmem:[%s13147_s4 + $0x370] sm:$0xf]  ;;  %v8635_v6 = vld [vmem:[%s13147_s4 + $0x374] sm:$0xf0]  ;;  %v5880_v7 = vor.u32 %v8619_v4, %v5879_v2  ;;  %v5871_v14 = vld [vmem:[%s13147_s4 + $0x2e0] sm:$0xf]  ;;  %v5808_v16 = vor.u32 %v8601_v13, %v5807_v11 }
   0xe   : > { %v5944_v8 = vor.u32 %v8635_v6, %v5943_v5  ;;  %v6007_v9 = vld [vmem:[%s13147_s4 + $0x3f0] sm:$0xf]  ;;  %v8651_v10 = vld [vmem:[%s13147_s4 + $0x3f4] sm:$0xf0]  ;;  %958 = vmatpush.bf16.msra.mxu0 %v5816_v3  ;;  %v8617_v15 = vld [vmem:[%s13147_s4 + $0x2e4] sm:$0xf0] }
   0xf   : > { %v6008_v12 = vor.u32 %v8651_v10, %v6007_v9  ;;  %971 = vmatpush.bf16.msra.mxu1 %v5880_v7  ;;  %v5872_v17 = vor.u32 %v8617_v15, %v5871_v14  ;;  %v5935_v18 = vld [vmem:[%s13147_s4 + $0x360] sm:$0xf]  ;;  %v8633_v19 = vld [vmem:[%s13147_s4 + $0x364] sm:$0xf0]  ;;  %v5799_v23 = vld [vmem:[%s13147_s4 + $0x250] sm:$0xf] }
  0x10   : > { %984 = vmatpush.bf16.msra.mxu2 %v5944_v8  ;;  %v5999_v20 = vld [vmem:[%s13147_s4 + $0x3e0] sm:$0xf]  ;;  %v5936_v21 = vor.u32 %v8633_v19, %v5935_v18  ;;  %v8649_v22 = vld [vmem:[%s13147_s4 + $0x3e4] sm:$0xf0]  ;;  %v8599_v24 = vld [vmem:[%s13147_s4 + $0x254] sm:$0xf0] }
  0x11   : > { %997 = vmatpush.bf16.msra.mxu3 %v6008_v12  ;;  %v6000_v25 = vor.u32 %v8649_v22, %v5999_v20  ;;  %v5863_v26 = vld [vmem:[%s13147_s4 + $0x2d0] sm:$0xf]  ;;  %v8615_v27 = vld [vmem:[%s13147_s4 + $0x2d4] sm:$0xf0]  ;;  %v5800_v29 = vor.u32 %v8599_v24, %v5799_v23  ;;  %v5791_v35 = vld [vmem:[%s13147_s4 + $0x240] sm:$0xf] }
  0x12   : > { %v5927_v28 = vld [vmem:[%s13147_s4 + $0x350] sm:$0xf]  ;;  %959 = vmatpush.bf16.msra.mxu0 %v5808_v16  ;;  %v8631_v30 = vld [vmem:[%s13147_s4 + $0x354] sm:$0xf0]  ;;  %v5864_v33 = vor.u32 %v8615_v27, %v5863_v26  ;;  %v8597_v36 = vld [vmem:[%s13147_s4 + $0x244] sm:$0xf0] }
  0x13   : > { %v5991_v31 = vld [vmem:[%s13147_s4 + $0x3d0] sm:$0xf]  ;;  %v8647_v32 = vld [vmem:[%s13147_s4 + $0x3d4] sm:$0xf0]  ;;  %972 = vmatpush.bf16.msra.mxu1 %v5872_v17  ;;  %v5928_v34 = vor.u32 %v8631_v30, %v5927_v28  ;;  %v5855_v37 = vld [vmem:[%s13147_s4 + $0x2c0] sm:$0xf]  ;;  %v5792_v44 = vor.u32 %v8597_v36, %v5791_v35 }
  0x14   : > { %985 = vmatpush.bf16.msra.mxu2 %v5936_v21  ;;  %v5992_v38 = vor.u32 %v8647_v32, %v5991_v31  ;;  %v8613_v39 = vld [vmem:[%s13147_s4 + $0x2c4] sm:$0xf0]  ;;  %v5919_v40 = vld [vmem:[%s13147_s4 + $0x340] sm:$0xf]  ;;  %v5783_v47 = vld [vmem:[%s13147_s4 + $0x230] sm:$0xf] }
  0x15   : > { %998 = vmatpush.bf16.msra.mxu3 %v6000_v25  ;;  %v8629_v41 = vld [vmem:[%s13147_s4 + $0x344] sm:$0xf0]  ;;  %v5983_v42 = vld [vmem:[%s13147_s4 + $0x3c0] sm:$0xf]  ;;  %v5856_v45 = vor.u32 %v8613_v39, %v5855_v37  ;;  %v8595_v48 = vld [vmem:[%s13147_s4 + $0x234] sm:$0xf0] }
  0x16   : > { %v8645_v43 = vld [vmem:[%s13147_s4 + $0x3c4] sm:$0xf0]  ;;  %960 = vmatpush.bf16.msra.mxu0 %v5800_v29  ;;  %v5920_v46 = vor.u32 %v8629_v41, %v5919_v40  ;;  %v5847_v49 = vld [vmem:[%s13147_s4 + $0x2b0] sm:$0xf]  ;;  %v8611_v51 = vld [vmem:[%s13147_s4 + $0x2b4] sm:$0xf0]  ;;  %v5784_v56 = vor.u32 %v8595_v48, %v5783_v47 }
  0x17   : > { %973 = vmatpush.bf16.msra.mxu1 %v5864_v33  ;;  %v5984_v50 = vor.u32 %v8645_v43, %v5983_v42  ;;  %v5911_v52 = vld [vmem:[%s13147_s4 + $0x330] sm:$0xf]  ;;  %v8627_v53 = vld [vmem:[%s13147_s4 + $0x334] sm:$0xf0]  ;;  %v5848_v57 = vor.u32 %v8611_v51, %v5847_v49  ;;  %v5775_v59 = vld [vmem:[%s13147_s4 + $0x220] sm:$0xf] }
  0x18   : > { %986 = vmatpush.bf16.msra.mxu2 %v5928_v34  ;;  %v5975_v54 = vld [vmem:[%s13147_s4 + $0x3b0] sm:$0xf]  ;;  %v8643_v55 = vld [vmem:[%s13147_s4 + $0x3b4] sm:$0xf0]  ;;  %v5912_v58 = vor.u32 %v8627_v53, %v5911_v52  ;;  %v8593_v60 = vld [vmem:[%s13147_s4 + $0x224] sm:$0xf0] }
  0x19   : > { %999 = vmatpush.bf16.msra.mxu3 %v5992_v38  ;;  %v5839_v61 = vld [vmem:[%s13147_s4 + $0x2a0] sm:$0xf]  ;;  %v5976_v62 = vor.u32 %v8643_v55, %v5975_v54  ;;  %v8609_v63 = vld [vmem:[%s13147_s4 + $0x2a4] sm:$0xf0]  ;;  %v5776_v4 = vor.u32 %v8593_v60, %v5775_v59  ;;  %v5767_v7 = vld [vmem:[%s13147_s4 + $0x210] sm:$0xf] }
  0x1a   : > { %961 = vmatpush.bf16.msra.mxu0 %v5792_v44  ;;  %v5903_v0 = vld [vmem:[%s13147_s4 + $0x320] sm:$0xf]  ;;  %v8625_v1 = vld [vmem:[%s13147_s4 + $0x324] sm:$0xf0]  ;;  %v5840_v5 = vor.u32 %v8609_v63, %v5839_v61  ;;  %v8591_v8 = vld [vmem:[%s13147_s4 + $0x214] sm:$0xf0] }
  0x1b   : > { %974 = vmatpush.bf16.msra.mxu1 %v5856_v45  ;;  %v5967_v2 = vld [vmem:[%s13147_s4 + $0x3a0] sm:$0xf]  ;;  %v8641_v3 = vld [vmem:[%s13147_s4 + $0x3a4] sm:$0xf0]  ;;  %v5904_v6 = vor.u32 %v8625_v1, %v5903_v0  ;;  %v5831_v9 = vld [vmem:[%s13147_s4 + $0x290] sm:$0xf]  ;;  %v5768_v16 = vor.u32 %v8591_v8, %v5767_v7 }
  0x1c   : > { %987 = vmatpush.bf16.msra.mxu2 %v5920_v46  ;;  %v5968_v10 = vor.u32 %v8641_v3, %v5967_v2  ;;  %v8607_v11 = vld [vmem:[%s13147_s4 + $0x294] sm:$0xf0]  ;;  %v5895_v12 = vld [vmem:[%s13147_s4 + $0x310] sm:$0xf]  ;;  %v5759_v17 = vld [vmem:[%s13147_s4 + $0x200] sm:$0xf] }
  0x1d   : > { %1000 = vmatpush.bf16.msra.mxu3 %v5984_v50  ;;  %v8623_v13 = vld [vmem:[%s13147_s4 + $0x314] sm:$0xf0]  ;;  %v5959_v14 = vld [vmem:[%s13147_s4 + $0x390] sm:$0xf]  ;;  %v8589_v18 = vld [vmem:[%s13147_s4 + $0x204] sm:$0xf0]  ;;  %v5832_v19 = vor.u32 %v8607_v11, %v5831_v9 }
  0x1e   : > { %962 = vmatpush.bf16.msra.mxu0 %v5784_v56  ;;  %v8639_v15 = vld [vmem:[%s13147_s4 + $0x394] sm:$0xf0]  ;;  %v5896_v20 = vor.u32 %v8623_v13, %v5895_v12  ;;  %v5823_v21 = vld [vmem:[%s13147_s4 + $0x280] sm:$0xf]  ;;  %v8605_v22 = vld [vmem:[%s13147_s4 + $0x284] sm:$0xf0]  ;;  %v5760_v31 = vor.u32 %v8589_v18, %v5759_v17 }
  0x1f   : > { %975 = vmatpush.bf16.msra.mxu1 %v5848_v57  ;;  %v5887_v23 = vld [vmem:[%s13147_s4 + $0x300] sm:$0xf]  ;;  %v5960_v24 = vor.u32 %v8639_v15, %v5959_v14  ;;  %v8621_v25 = vld [vmem:[%s13147_s4 + $0x304] sm:$0xf0]  ;;  %v8602_v28 = vld [vmem:[%s13147_s4 + $0x274] sm:$0xf]  ;;  %v5824_v35 = vor.u32 %v8605_v22, %v5823_v21 }
  0x20   : > { %988 = vmatpush.bf16.msra.mxu2 %v5912_v58  ;;  %v5951_v26 = vld [vmem:[%s13147_s4 + $0x380] sm:$0xf]  ;;  %v8637_v27 = vld [vmem:[%s13147_s4 + $0x384] sm:$0xf0]  ;;  %v5817_v29 = vld [vmem:[%s13147_s4 + $0x278] sm:$0xf0]  ;;  %v5888_v36 = vor.u32 %v8621_v25, %v5887_v23 }
  0x21   : > { %1001 = vmatpush.bf16.msra.mxu3 %v5976_v62  ;;  %v8618_v30 = vld [vmem:[%s13147_s4 + $0x2f4] sm:$0xf]  ;;  %v5881_v32 = vld [vmem:[%s13147_s4 + $0x2f8] sm:$0xf0]  ;;  %v5952_v39 = vor.u32 %v8637_v27, %v5951_v26  ;;  %v5820_v40 = vor.u32 %v8602_v28, %v5817_v29  ;;  %v8600_v43 = vld [vmem:[%s13147_s4 + $0x264] sm:$0xf] }
  0x22   : > { %963 = vmatpush.bf16.msra.mxu0 %v5776_v4  ;;  %v8634_v33 = vld [vmem:[%s13147_s4 + $0x374] sm:$0xf]  ;;  %v5945_v34 = vld [vmem:[%s13147_s4 + $0x378] sm:$0xf0]  ;;  %v5884_v41 = vor.u32 %v8618_v30, %v5881_v32  ;;  %v5809_v44 = vld [vmem:[%s13147_s4 + $0x268] sm:$0xf0] }
  0x23   : > { %976 = vmatpush.bf16.msra.mxu1 %v5840_v5  ;;  %v8650_v37 = vld [vmem:[%s13147_s4 + $0x3f4] sm:$0xf]  ;;  %v6009_v38 = vld [vmem:[%s13147_s4 + $0x3f8] sm:$0xf0]  ;;  %v5948_v42 = vor.u32 %v8634_v33, %v5945_v34  ;;  %v8616_v45 = vld [vmem:[%s13147_s4 + $0x2e4] sm:$0xf]  ;;  %v5812_v52 = vor.u32 %v8600_v43, %v5809_v44 }
  0x24   : > { %989 = vmatpush.bf16.msra.mxu2 %v5904_v6  ;;  %v6012_v46 = vor.u32 %v8650_v37, %v6009_v38  ;;  %v5873_v47 = vld [vmem:[%s13147_s4 + $0x2e8] sm:$0xf0]  ;;  %v8632_v48 = vld [vmem:[%s13147_s4 + $0x364] sm:$0xf]  ;;  %v8598_v53 = vld [vmem:[%s13147_s4 + $0x254] sm:$0xf] }
  0x25   : > { %1002 = vmatpush.bf16.msra.mxu3 %v5968_v10  ;;  %v5937_v49 = vld [vmem:[%s13147_s4 + $0x368] sm:$0xf0]  ;;  %v8648_v50 = vld [vmem:[%s13147_s4 + $0x3e4] sm:$0xf]  ;;  %v5876_v54 = vor.u32 %v8616_v45, %v5873_v47  ;;  %v5801_v56 = vld [vmem:[%s13147_s4 + $0x258] sm:$0xf0] }
  0x26   : > { %964 = vmatpush.bf16.msra.mxu0 %v5768_v16  ;;  %v6001_v51 = vld [vmem:[%s13147_s4 + $0x3e8] sm:$0xf0]  ;;  %v5940_v55 = vor.u32 %v8632_v48, %v5937_v49  ;;  %v8614_v57 = vld [vmem:[%s13147_s4 + $0x2d4] sm:$0xf]  ;;  %v5865_v58 = vld [vmem:[%s13147_s4 + $0x2d8] sm:$0xf0]  ;;  %v5804_v2 = vor.u32 %v8598_v53, %v5801_v56 }
  0x27   : > { %977 = vmatpush.bf16.msra.mxu1 %v5832_v19  ;;  %v6004_v59 = vor.u32 %v8648_v50, %v6001_v51  ;;  %v8630_v60 = vld [vmem:[%s13147_s4 + $0x354] sm:$0xf]  ;;  %v5929_v61 = vld [vmem:[%s13147_s4 + $0x358] sm:$0xf0]  ;;  %v8596_v0 = vld [vmem:[%s13147_s4 + $0x244] sm:$0xf]  ;;  %v5868_v6 = vor.u32 %v8614_v57, %v5865_v58 }
  0x28   : > { %990 = vmatpush.bf16.msra.mxu2 %v5896_v20  ;;  %v8646_v62 = vld [vmem:[%s13147_s4 + $0x3d4] sm:$0xf]  ;;  %v5993_v63 = vld [vmem:[%s13147_s4 + $0x3d8] sm:$0xf0]  ;;  %v5793_v1 = vld [vmem:[%s13147_s4 + $0x248] sm:$0xf0]  ;;  %v5932_v7 = vor.u32 %v8630_v60, %v5929_v61 }
  0x29   : > { %1003 = vmatpush.bf16.msra.mxu3 %v5960_v24  ;;  %v8612_v3 = vld [vmem:[%s13147_s4 + $0x2c4] sm:$0xf]  ;;  %v5857_v4 = vld [vmem:[%s13147_s4 + $0x2c8] sm:$0xf0]  ;;  %v9133_v10 = vmov 0.0   ;;  %v5996_v11 = vor.u32 %v8646_v62, %v5993_v63  ;;  %s13162_s10 = smov (!%p368_p3, %s5678_s10), 1  ;;  %v5796_v15 = vor.u32 %v8596_v0, %v5793_v1 }
  0x2a   : > { %965 = vmatpush.bf16.msra.mxu0 %v5760_v31  ;;  %v8628_v5 = vld [vmem:[%s13147_s4 + $0x344] sm:$0xf]  ;;  %v5921_v8 = vld [vmem:[%s13147_s4 + $0x348] sm:$0xf0]  ;;  %404 = vst [vmem:[#allocation2 + $0x18] sm:$0xfe] %v9133_v10  ;;  %v5860_v19 = vor.u32 %v8612_v3, %v5857_v4 }
  0x2b   : > { %978 = vmatpush.bf16.msra.mxu1 %v5824_v35  ;;  %v8644_v9 = vld [vmem:[%s13147_s4 + $0x3c4] sm:$0xf]  ;;  %v5985_v12 = vld [vmem:[%s13147_s4 + $0x3c8] sm:$0xf0]  ;;  %405 = vst [vmem:[#allocation2 + $0x38] sm:$0x1] %v9133_v10  ;;  %v5924_v20 = vor.u32 %v8628_v5, %v5921_v8 }
  0x2c   : > { %991 = vmatpush.bf16.msra.mxu2 %v5888_v36  ;;  %v8594_v13 = vld [vmem:[%s13147_s4 + $0x234] sm:$0xf]  ;;  %v5785_v14 = vld [vmem:[%s13147_s4 + $0x238] sm:$0xf0]  ;;  %402 = vst [vmem:[#allocation2] sm:$0xfe] %v9133_v10  ;;  %v5988_v24 = vor.u32 %v8644_v9, %v5985_v12 }
  0x2d   : > { %1004 = vmatpush.bf16.msra.mxu3 %v5952_v39  ;;  %v9500_v16 = vld [vmem:[%s13147_s4 + $0x2b4] sm:$0xf]  ;;  %v9505_v17 = vld [vmem:[%s13147_s4 + $0x2b8] sm:$0xf0]  ;;  %s9512_s23 = sshll.u32 %s13162_s10, 4  ;;  %v5788_v34 = vor.u32 %v8594_v13, %v5785_v14 }
  0x2e   : > { %1010 = vmatpush.bf16.msrb.mxu0 %v5820_v40  ;;  %v9510_v18 = vld [vmem:[%s13147_s4 + $0x334] sm:$0xf]  ;;  %403 = vst [vmem:[#allocation2 + $0x20] sm:$0x1] %v9133_v10  ;;  %v5913_v21 = vld [vmem:[%s13147_s4 + $0x338] sm:$0xf0]  ;;  %s372_s12 = scalar_lea.vmem %s13143_s0, %s9512_s23  ;;  %s377_s15 = scalar_lea.vmem %s13144_s1, %s9512_s23 }
  0x2f   : > { %1023 = vmatpush.bf16.msrb.mxu1 %v5884_v41  ;;  %v8642_v22 = vld [vmem:[%s13147_s4 + $0x3b4] sm:$0xf]  ;;  %v5977_v23 = vld [vmem:[%s13147_s4 + $0x3b8] sm:$0xf0]  ;;  %v9535_v25 = vld [vmem:[%s13147_s4 + $0x224] sm:$0xf]  ;;  %s382_s22 = scalar_lea.vmem %s13145_s2, %s9512_s23  ;;  %s387_s26 = scalar_lea.vmem %s13146_s3, %s9512_s23  ;;  %v5916_v43 = vor.u32 %v9510_v18, %v5913_v21 }
  0x30   : > { %1036 = vmatpush.bf16.msrb.mxu2 %v5948_v42  ;;  %v9540_v26 = vld [vmem:[%s13147_s4 + $0x228] sm:$0xf0]  ;;  %v406_v29 = vld [vmem:[%s372_s12] sm:$0xff]  ;;  %v5852_v42 = vor.u32 %v9500_v16, %v9505_v17  ;;  %v5980_v48 = vor.u32 %v8642_v22, %v5977_v23  ;;  %v5769_v56 = vld [vmem:[%s13147_s4 + $0x218] sm:$0xf0]  ;;  %s392_s29 = scalar_lea.vmem %s13152_s9, %s9512_s23 }
  0x31   : > { %1049 = vmatpush.bf16.msrb.mxu3 %v6012_v46  ;;  %v407_v27 = vld [vmem:[%s372_s12 + $0x8] sm:$0xff]  ;;  %v408_v33 = vld [vmem:[%s377_s15] sm:$0xff]  ;;  %v532_v38 = vld [vmem:[#allocation2 + $0x18] sm:$0xfe] }
  0x32   : > { %1011 = vmatpush.bf16.msrb.mxu0 %v5812_v52  ;;  %v409_v28 = vld [vmem:[%s377_s15 + $0x8] sm:$0xff]  ;;  %v8608_v35 = vld [vmem:[%s13147_s4 + $0x2a4] sm:$0xf]  ;;  %v410_v39 = vmax.f32 %v406_v29, %v408_v33  ;;  %v536_v46 = vld [vmem:[#allocation2 + $0x38] sm:$0x1]  ;;  %s9135_s15 = smov 64  }
  0x33   : > { %1024 = vmatpush.bf16.msrb.mxu1 %v5876_v54  ;;  %v411_v30 = vmax.f32 %v407_v27, %v409_v28  ;;  %v413_v31 = vld [vmem:[%s382_s22 + $0x8] sm:$0xff]  ;;  %v412_v40 = vld [vmem:[%s382_s22] sm:$0xff]  ;;  %v540_v52 = vpack.c.bf16 %v536_v46, %v532_v38  ;;  %v5780_v54 = vor.u32 %v9535_v25, %v9540_v26  ;;  %v8606_v62 = vld [vmem:[%s13147_s4 + $0x294] sm:$0xf] }
  0x34   : > { %1037 = vmatpush.bf16.msrb.mxu2 %v5940_v55  ;;  %v415_v32 = vld [vmem:[%s387_s26 + $0x8] sm:$0xff]  ;;  %v414_v41 = vld [vmem:[%s387_s26] sm:$0xff]  ;;  %v8590_v55 = vld [vmem:[%s13147_s4 + $0x214] sm:$0xf] }
  0x35   : > { %1050 = vmatpush.bf16.msrb.mxu3 %v6004_v59  ;;  %v5841_v36 = vld [vmem:[%s13147_s4 + $0x2a8] sm:$0xf0]  ;;  %v417_v37 = vmax.f32 %v413_v31, %v415_v32  ;;  %v8624_v44 = vld [vmem:[%s13147_s4 + $0x324] sm:$0xf]  ;;  %v416_v47 = vmax.f32 %v412_v40, %v414_v41  ;;  %v533_v57 = vld [vmem:[#allocation2 + $0x20] sm:$0x1] }
  0x36   : > { %1012 = vmatpush.bf16.msrb.mxu0 %v5804_v2  ;;  %v5905_v45 = vld [vmem:[%s13147_s4 + $0x328] sm:$0xf0]  ;;  %v8640_v49 = vld [vmem:[%s13147_s4 + $0x3a4] sm:$0xf]  ;;  %v628_v60 = vshrl.u32 %v540_v52, 16  ;;  %v630_v61 = vshll.u32 %v540_v52, 16  ;;  %v5844_v2 = vor.u32 %v8608_v35, %v5841_v36 }
  0x37   : > { %1025 = vmatpush.bf16.msrb.mxu1 %v5868_v6  ;;  %v5969_v50 = vld [vmem:[%s13147_s4 + $0x3a8] sm:$0xf0]  ;;  %v419_v51 = vmax.f32 %v411_v30, %v417_v37  ;;  %v529_v53 = vld [vmem:[#allocation2] sm:$0xfe]  ;;  %v418_v58 = vmax.f32 %v410_v39, %v416_v47  ;;  %v5833_v63 = vld [vmem:[%s13147_s4 + $0x298] sm:$0xf0]  ;;  %v5908_v3 = vor.u32 %v8624_v44, %v5905_v45 }
  0x38   : > { %1038 = vmatpush.bf16.msrb.mxu2 %v5932_v7  ;;  %v8622_v0 = vld [vmem:[%s13147_s4 + $0x314] sm:$0xf]  ;;  %v537_v1 = vpack.c.bf16 %v533_v57, %v529_v53  ;;  %v5897_v4 = vld [vmem:[%s13147_s4 + $0x318] sm:$0xf0]  ;;  %v5972_v7 = vor.u32 %v8640_v49, %v5969_v50  ;;  %v632_v8 = vrot.slane %v630_v61, 1  ;;  %v5836_v18 = vor.u32 %v8606_v62, %v5833_v63 }
  0x39   : > { %1051 = vmatpush.bf16.msrb.mxu3 %v5996_v11  ;;  %v423_v59 = vrot.slane %v419_v51, 7  ;;  %v8638_v5 = vld [vmem:[%s13147_s4 + $0x394] sm:$0xf]  ;;  %v422_v6 = vrot.slane %v418_v58, 7  ;;  %v5961_v12 = vld [vmem:[%s13147_s4 + $0x398] sm:$0xf0] }
  0x3a   : > { %1013 = vmatpush.bf16.msrb.mxu0 %v5796_v15  ;;  %v607_v9 = vshrl.u32 %v537_v1, 16  ;;  %v609_v11 = vshll.u32 %v537_v1, 16  ;;  %v8588_v13 = vld [vmem:[%s13147_s4 + $0x204] sm:$0xf]  ;;  %v9600_v14 = vor.u32 %v632_v8, %v628_v60  ;;  %v5772_v15 = vor.u32 %v8590_v55, %v5769_v56  ;;  %v5761_v17 = vld [vmem:[%s13147_s4 + $0x208] sm:$0xf0] }
  0x3b   : > { %1026 = vmatpush.bf16.msrb.mxu1 %v5860_v19  ;;  %427 = vst [vmem:[#allocation2 + $0x10] sm:$0xfe] %v423_v59  ;;  %v5900_v19 = vor.u32 %v8622_v0, %v5897_v4  ;;  %v5825_v21 = vld [vmem:[%s13147_s4 + $0x288] sm:$0xf0]  ;;  %v5964_v22 = vor.u32 %v8638_v5, %v5961_v12  ;;  %v8636_v26 = vld [vmem:[%s13147_s4 + $0x384] sm:$0xf]  ;;  %v5764_v30 = vor.u32 %v8588_v13, %v5761_v17 }
  0x3c   : > { %1039 = vmatpush.bf16.msrb.mxu2 %v5924_v20  ;;  %429 = vst [vmem:[#allocation2 + $0x30] sm:$0x1] %v423_v59  ;;  %v611_v16 = vrot.slane %v609_v11, 1  ;;  %v8604_v20 = vld [vmem:[%s13147_s4 + $0x284] sm:$0xf]  ;;  %1005 = vmatmul.bf16.vlgmr.msra.gmra.mxu3 %v9600_v14 }
  0x3d   : > { %1052 = vmatpush.bf16.msrb.mxu3 %v5988_v24  ;;  %426 = vst [vmem:[#allocation2 + $0x8] sm:$0xfe] %v422_v6  ;;  %v8620_v24 = vld [vmem:[%s13147_s4 + $0x304] sm:$0xf]  ;;  %v5889_v25 = vld [vmem:[%s13147_s4 + $0x308] sm:$0xf0] }
  0x3e   : > { %1014 = vmatpush.bf16.msrb.mxu0 %v5788_v34  ;;  %428 = vst [vmem:[#allocation2 + $0x28] sm:$0x1] %v422_v6  ;;  %v9611_v23 = vor.u32 %v611_v16, %v607_v9  ;;  %v5953_v27 = vld [vmem:[%s13147_s4 + $0x388] sm:$0xf0]  ;;  %v6071_v28 = vld [vmem:[%s13147_s4 + $0x70] sm:$0xf]  ;;  %v5828_v34 = vor.u32 %v8604_v20, %v5825_v21  ;;  %v5892_v35 = vor.u32 %v8620_v24, %v5889_v25 }
  0x3f   : > { %1027 = vmatpush.bf16.msrb.mxu1 %v5852_v42  ;;  %v8539_v29 = vld [vmem:[%s13147_s4 + $0x74] sm:$0xf0]  ;;  %v6263_v31 = vld [vmem:[%s13147_s4 + $0x1f0] sm:$0xf]  ;;  %v5956_v37 = vor.u32 %v8636_v26, %v5953_v27  ;;  %v6063_v42 = vld [vmem:[%s13147_s4 + $0x60] sm:$0xf] }
  0x40   : > { %1040 = vmatpush.bf16.msrb.mxu2 %v5916_v43  ;;  %v8587_v32 = vld [vmem:[%s13147_s4 + $0x1f4] sm:$0xf0]  ;;  %966 = vmatmul.bf16.vlgmr.msra.gmra.mxu0 %v9611_v23  ;;  %v6072_v38 = vor.u32 %v8539_v29, %v6071_v28  ;;  %v8537_v43 = vld [vmem:[%s13147_s4 + $0x64] sm:$0xf0]  ;;  %v6255_v45 = vld [vmem:[%s13147_s4 + $0x1e0] sm:$0xf] }
  0x41   : > { %1053 = vmatpush.bf16.msrb.mxu3 %v5980_v48  ;;  %v6264_v41 = vor.u32 %v8587_v32, %v6263_v31  ;;  %v8585_v46 = vld [vmem:[%s13147_s4 + $0x1e4] sm:$0xf0]  ;;  %v6199_v50 = vld [vmem:[%s13147_s4 + $0x170] sm:$0xf]  ;;  %v8571_v51 = vld [vmem:[%s13147_s4 + $0x174] sm:$0xf0] }
  0x42   : > { %1015 = vmatpush.bf16.msrb.mxu0 %v5780_v54  ;;  %v531_v33 = vld [vmem:[#allocation2 + $0x10] sm:$0xfe]  ;;  %v8555_v53 = vld [vmem:[%s13147_s4 + $0xf4] sm:$0xf0]  ;;  %v6064_v54 = vor.u32 %v8537_v43, %v6063_v42  ;;  %v6256_v59 = vor.u32 %v8585_v46, %v6255_v45  ;;  %v6200_v61 = vor.u32 %v8571_v51, %v6199_v50  ;;  %v6127_v5 = vld [vmem:[%s13147_s4 + $0xe0] sm:$0xf] }
  0x43   : > { %1028 = vmatpush.bf16.msrb.mxu1 %v5844_v2  ;;  %v535_v36 = vld [vmem:[#allocation2 + $0x30] sm:$0x1]  ;;  %v8535_v60 = vld [vmem:[%s13147_s4 + $0x54] sm:$0xf0]  ;;  %v6191_v2 = vld [vmem:[%s13147_s4 + $0x160] sm:$0xf] }
  0x44   : > { %1041 = vmatpush.bf16.msrb.mxu2 %v5908_v3  ;;  %v539_v39 = vpack.c.bf16 %v535_v36, %v531_v33  ;;  %v530_v40 = vld [vmem:[#allocation2 + $0x8] sm:$0xfe]  ;;  %v6135_v52 = vld [vmem:[%s13147_s4 + $0xf0] sm:$0xf]  ;;  %v8583_v63 = vld [vmem:[%s13147_s4 + $0x1d4] sm:$0xf0] }
  0x45   : > { %1054 = vmatpush.bf16.msrb.mxu3 %v5972_v7  ;;  %v534_v44 = vld [vmem:[#allocation2 + $0x28] sm:$0x1]  ;;  %v6055_v55 = vld [vmem:[%s13147_s4 + $0x50] sm:$0xf]  ;;  %v6136_v4 = vor.u32 %v8555_v53, %v6135_v52  ;;  %v6047_v11 = vld [vmem:[%s13147_s4 + $0x40] sm:$0xf] }
  0x46   : > { %1016 = vmatpush.bf16.msrb.mxu0 %v5772_v15  ;;  %v621_v47 = vshrl.u32 %v539_v39, 16  ;;  %v623_v48 = vshll.u32 %v539_v39, 16  ;;  %v538_v49 = vpack.c.bf16 %v534_v44, %v530_v40  ;;  %v6247_v62 = vld [vmem:[%s13147_s4 + $0x1d0] sm:$0xf]  ;;  %v8569_v3 = vld [vmem:[%s13147_s4 + $0x164] sm:$0xf0]  ;;  %v6056_v6 = vor.u32 %v8535_v60, %v6055_v55 }
  0x47   : > { %1029 = vmatpush.bf16.msrb.mxu1 %v5836_v18  ;;  %v8553_v8 = vld [vmem:[%s13147_s4 + $0xe4] sm:$0xf0]  ;;  %v6248_v9 = vor.u32 %v8583_v63, %v6247_v62  ;;  %v6192_v13 = vor.u32 %v8569_v3, %v6191_v2  ;;  %v6239_v15 = vld [vmem:[%s13147_s4 + $0x1c0] sm:$0xf]  ;;  %v6183_v17 = vld [vmem:[%s13147_s4 + $0x150] sm:$0xf] }
  0x48   : > { %1042 = vmatpush.bf16.msrb.mxu2 %v5900_v19  ;;  %v625_v56 = vrot.slane %v623_v48, 1  ;;  %v614_v57 = vshrl.u32 %v538_v49, 16  ;;  %v616_v58 = vshll.u32 %v538_v49, 16  ;;  %v8533_v12 = vld [vmem:[%s13147_s4 + $0x44] sm:$0xf0]  ;;  %v6128_v19 = vor.u32 %v8553_v8, %v6127_v5 }
  0x49   : > { %1055 = vmatpush.bf16.msrb.mxu3 %v5964_v22  ;;  %v8581_v16 = vld [vmem:[%s13147_s4 + $0x1c4] sm:$0xf0]  ;;  %v8567_v18 = vld [vmem:[%s13147_s4 + $0x154] sm:$0xf0]  ;;  %v6119_v20 = vld [vmem:[%s13147_s4 + $0xd0] sm:$0xf]  ;;  %v6048_v21 = vor.u32 %v8533_v12, %v6047_v11 }
  0x4a   : > { %1017 = vmatpush.bf16.msrb.mxu0 %v5764_v30  ;;  %v9675_v0 = vor.u32 %v625_v56, %v621_v47  ;;  %v618_v1 = vrot.slane %v616_v58, 1  ;;  %v8551_v22 = vld [vmem:[%s13147_s4 + $0xd4] sm:$0xf0]  ;;  %v6240_v24 = vor.u32 %v8581_v16, %v6239_v15  ;;  %v6039_v25 = vld [vmem:[%s13147_s4 + $0x30] sm:$0xf]  ;;  %v6184_v27 = vor.u32 %v8567_v18, %v6183_v17 }
  0x4b   : > { %1030 = vmatpush.bf16.msrb.mxu1 %v5828_v34  ;;  %v8531_v26 = vld [vmem:[%s13147_s4 + $0x34] sm:$0xf0]  ;;  %v6231_v28 = vld [vmem:[%s13147_s4 + $0x1b0] sm:$0xf]  ;;  %v6175_v30 = vld [vmem:[%s13147_s4 + $0x140] sm:$0xf]  ;;  %v6120_v32 = vor.u32 %v8551_v22, %v6119_v20 }
  0x4c   : > { %1043 = vmatpush.bf16.msrb.mxu2 %v5892_v35  ;;  %v9687_v7 = vor.u32 %v618_v1, %v614_v57  ;;  %v8579_v29 = vld [vmem:[%s13147_s4 + $0x1b4] sm:$0xf0]  ;;  %v8565_v31 = vld [vmem:[%s13147_s4 + $0x144] sm:$0xf0]  ;;  %v6111_v33 = vld [vmem:[%s13147_s4 + $0xc0] sm:$0xf]  ;;  %v6040_v34 = vor.u32 %v8531_v26, %v6039_v25  ;;  %v393_v35 = vlaneseq }
  0x4d   : > { %1056 = vmatpush.bf16.msrb.mxu3 %v5956_v37  ;;  %992 = vmatmul.bf16.vlgmr.msra.gmra.mxu2 %v9675_v0  ;;  %v6232_v36 = vor.u32 %v8579_v29, %v6231_v28  ;;  %v6031_v37 = vld [vmem:[%s13147_s4 + $0x20] sm:$0xf]  ;;  %v6176_v39 = vor.u32 %v8565_v31, %v6175_v30  ;;  %v8547_v42 = vld [vmem:[%s13147_s4 + $0xb4] sm:$0xf0]  ;;  %v6167_v43 = vld [vmem:[%s13147_s4 + $0x130] sm:$0xf] }
  0x4e   : > { %1382 = vmatpush.bf16.msra.mxu0 %v6072_v38  ;;  %979 = vmatmul.bf16.vlgmr.msra.gmra.mxu1 %v9687_v7  ;;  %v8529_v38 = vld [vmem:[%s13147_s4 + $0x24] sm:$0xf0]  ;;  %v6223_v40 = vld [vmem:[%s13147_s4 + $0x1a0] sm:$0xf]  ;;  %v8563_v44 = vld [vmem:[%s13147_s4 + $0x134] sm:$0xf0] }
  0x4f   : > { %1395 = vmatpush.bf16.msra.mxu1 %v6136_v4  ;;  %v6032_v46 = vor.u32 %v8529_v38, %v6031_v37  ;;  %v6023_v47 = vld [vmem:[%s13147_s4 + $0x10] sm:$0xf]  ;;  %v8527_v48 = vld [vmem:[%s13147_s4 + $0x14] sm:$0xf0]  ;;  %vm395_vm0 = vcmp.lt.s32.totalorder %v393_v35, 512  ;;  %v6168_v51 = vor.u32 %v8563_v44, %v6167_v43 }
  0x50   : > { %1408 = vmatpush.bf16.msra.mxu2 %v6200_v61  ;;  %1057 = vmatmul.bf16.vlgmr.msrb.gmra.mxu3 %v9600_v14  ;;  %v8549_v14 = vld [vmem:[%s13147_s4 + $0xc4] sm:$0xf0]  ;;  %v6215_v50 = vld [vmem:[%s13147_s4 + $0x190] sm:$0xf]  ;;  %v8575_v52 = vld [vmem:[%s13147_s4 + $0x194] sm:$0xf0] }
  0x51   : > { %1421 = vmatpush.bf16.msra.mxu3 %v6264_v41  ;;  %1018 = vmatmul.bf16.vlgmr.msrb.gmra.mxu0 %v9611_v23  ;;  %v8577_v41 = vld [vmem:[%s13147_s4 + $0x1a4] sm:$0xf0]  ;;  %v6103_v23 = vld [vmem:[%s13147_s4 + $0xb0] sm:$0xf]  ;;  %v6112_v45 = vor.u32 %v8549_v14, %v6111_v33  ;;  %v6159_v53 = vld [vmem:[%s13147_s4 + $0x120] sm:$0xf] }
  0x52   : > { %1383 = vmatpush.bf16.msra.mxu0 %v6064_v54  ;;  %v6224_v49 = vor.u32 %v8577_v41, %v6223_v40  ;;  %397 = vst.msk [vmem:[#allocation2] ss:$8 sm:$0xf] %vm395_vm0, %v9133_v10  ;;  %v8561_v54 = vld [vmem:[%s13147_s4 + $0x124] sm:$0xf0]  ;;  %v6104_v55 = vor.u32 %v8547_v42, %v6103_v23 }
  0x53   : > { %1396 = vmatpush.bf16.msra.mxu1 %v6128_v19  ;;  %400 = vst.msk [vmem:[#allocation2 + $0x21] ss:$8 sm:$0xf] %vm395_vm0, %v9133_v10  ;;  %v6095_v56 = vld [vmem:[%s13147_s4 + $0xa0] sm:$0xf]  ;;  %v6024_v10 = vor.u32 %v8527_v48, %v6023_v47  ;;  %v6160_v63 = vor.u32 %v8561_v54, %v6159_v53 }
  0x54   : > { %1409 = vmatpush.bf16.msra.mxu2 %v6192_v13  ;;  %v8545_v57 = vld [vmem:[%s13147_s4 + $0xa4] sm:$0xf0]  ;;  %v6151_v58 = vld [vmem:[%s13147_s4 + $0x110] sm:$0xf]  ;;  %v6015_v60 = vld [vmem:[%s13147_s4] sm:$0xf] }
  0x55   : > { %1422 = vmatpush.bf16.msra.mxu3 %v6256_v59  ;;  %v6216_v59 = vor.u32 %v8575_v52, %v6215_v50  ;;  %v8525_v61 = vld [vmem:[%s13147_s4 + $0x4] sm:$0xf0]  ;;  %v6207_v62 = vld [vmem:[%s13147_s4 + $0x180] sm:$0xf]  ;;  %v8538_v1 = vld [vmem:[%s13147_s4 + $0x74] sm:$0xf] }
  0x56   : > { %1384 = vmatpush.bf16.msra.mxu0 %v6056_v6  ;;  %v6073_v2 = vld [vmem:[%s13147_s4 + $0x78] sm:$0xf0]  ;;  %v8559_v3 = vld [vmem:[%s13147_s4 + $0x114] sm:$0xf0]  ;;  %v8586_v4 = vld [vmem:[%s13147_s4 + $0x1f4] sm:$0xf]  ;;  %v6096_v6 = vor.u32 %v8545_v57, %v6095_v56  ;;  %v6016_v8 = vor.u32 %v8525_v61, %v6015_v60 }
  0x57   : > { %1397 = vmatpush.bf16.msra.mxu1 %v6120_v32  ;;  %v6265_v5 = vld [vmem:[%s13147_s4 + $0x1f8] sm:$0xf0]  ;;  %v8543_v11 = vld [vmem:[%s13147_s4 + $0x94] sm:$0xf0]  ;;  %v6076_v13 = vor.u32 %v8538_v1, %v6073_v2  ;;  %v6152_v16 = vor.u32 %v8559_v3, %v6151_v58  ;;  %v6143_v17 = vld [vmem:[%s13147_s4 + $0x100] sm:$0xf] }
  0x58   : > { %1410 = vmatpush.bf16.msra.mxu2 %v6184_v27  ;;  %v6268_v18 = vor.u32 %v8586_v4, %v6265_v5  ;;  %v8536_v19 = vld [vmem:[%s13147_s4 + $0x64] sm:$0xf]  ;;  %v6065_v20 = vld [vmem:[%s13147_s4 + $0x68] sm:$0xf0]  ;;  %v8570_v27 = vld [vmem:[%s13147_s4 + $0x174] sm:$0xf] }
  0x59   : > { %1423 = vmatpush.bf16.msra.mxu3 %v6248_v9  ;;  %v457_v9 = vld [vmem:[#allocation2] sm:$0xff]  ;;  %v460_v15 = vld [vmem:[#allocation2 + $0x18] sm:$0xff]  ;;  %v6257_v25 = vld [vmem:[%s13147_s4 + $0x1e8] sm:$0xf0]  ;;  %v6068_v33 = vor.u32 %v8536_v19, %v6065_v20 }
  0x5a   : > { %1385 = vmatpush.bf16.msra.mxu0 %v6048_v21  ;;  %v8557_v21 = vld [vmem:[%s13147_s4 + $0x104] sm:$0xf0]  ;;  %v9844_v22 = vpack.c.bf16 %v457_v9, %v457_v9  ;;  %v6201_v28 = vld [vmem:[%s13147_s4 + $0x178] sm:$0xf0]  ;;  %v9858_v29 = vpack.c.bf16 %v460_v15, %v460_v15  ;;  %v6079_v30 = vld [vmem:[%s13147_s4 + $0x80] sm:$0xf] }
  0x5b   : > { %1398 = vmatpush.bf16.msra.mxu1 %v6112_v45  ;;  %v8541_v31 = vld [vmem:[%s13147_s4 + $0x84] sm:$0xf0]  ;;  %v8554_v32 = vld [vmem:[%s13147_s4 + $0xf4] sm:$0xf]  ;;  %v6137_v14 = vld [vmem:[%s13147_s4 + $0xf8] sm:$0xf0] }
  0x5c   : > { %1411 = vmatpush.bf16.msra.mxu2 %v6176_v39  ;;  %v8534_v38 = vld [vmem:[%s13147_s4 + $0x54] sm:$0xf]  ;;  %v6204_v39 = vor.u32 %v8570_v27, %v6201_v28  ;;  %v6057_v40 = vld [vmem:[%s13147_s4 + $0x58] sm:$0xf0]  ;;  %v6080_v42 = vor.u32 %v8541_v31, %v6079_v30  ;;  %v458_v43 = vld [vmem:[#allocation2 + $0x8] sm:$0xff] }
  0x5d   : > { %1424 = vmatpush.bf16.msra.mxu3 %v6240_v24  ;;  %1044 = vmatmul.bf16.vlgmr.msrb.gmra.mxu2 %v9675_v0  ;;  %v8573_v0 = vld [vmem:[%s13147_s4 + $0x184] sm:$0xf0]  ;;  %v8584_v24 = vld [vmem:[%s13147_s4 + $0x1e4] sm:$0xf]  ;;  %v8582_v41 = vld [vmem:[%s13147_s4 + $0x1d4] sm:$0xf]  ;;  %v6060_v50 = vor.u32 %v8534_v38, %v6057_v40  ;;  %v9903_v53 = vpack.c.bf16 %v458_v43, %v458_v43 }
  0x5e   : > { %1386 = vmatpush.bf16.msra.mxu0 %v6040_v34  ;;  %1031 = vmatmul.bf16.vlgmr.msrb.gmra.mxu1 %v9687_v7  ;;  %v6087_v7 = vld [vmem:[%s13147_s4 + $0x90] sm:$0xf]  ;;  %v6208_v12 = vor.u32 %v8573_v0, %v6207_v62  ;;  %v6144_v34 = vor.u32 %v8557_v21, %v6143_v17  ;;  %v6260_v37 = vor.u32 %v8584_v24, %v6257_v25  ;;  %v6249_v23 = vld [vmem:[%s13147_s4 + $0x1d8] sm:$0xf0]  ;;  %v8568_v44 = vld [vmem:[%s13147_s4 + $0x164] sm:$0xf] }
  0x5f   : > { %1399 = vmatpush.bf16.msra.mxu1 %v6104_v55  ;;  %v6088_v26 = vor.u32 %v8543_v11, %v6087_v7  ;;  %v6193_v45 = vld [vmem:[%s13147_s4 + $0x168] sm:$0xf0]  ;;  %v8552_v48 = vld [vmem:[%s13147_s4 + $0xe4] sm:$0xf]  ;;  %v6185_v58 = vld [vmem:[%s13147_s4 + $0x158] sm:$0xf0] }
  0x60   : > { %1412 = vmatpush.bf16.msra.mxu2 %v6168_v51  ;;  %v6252_v51 = vor.u32 %v8582_v41, %v6249_v23  ;;  %v8532_v52 = vld [vmem:[%s13147_s4 + $0x44] sm:$0xf]  ;;  %v6196_v54 = vor.u32 %v8568_v44, %v6193_v45  ;;  %v6049_v55 = vld [vmem:[%s13147_s4 + $0x48] sm:$0xf0]  ;;  %v8550_v60 = vld [vmem:[%s13147_s4 + $0xd4] sm:$0xf] }
  0x61   : > { %1425 = vmatpush.bf16.msra.mxu3 %v6232_v36  ;;  %v459_v36 = vld [vmem:[#allocation2 + $0x10] sm:$0xff]  ;;  %v8580_v56 = vld [vmem:[%s13147_s4 + $0x1c4] sm:$0xf]  ;;  %v6241_v57 = vld [vmem:[%s13147_s4 + $0x1c8] sm:$0xf0]  ;;  %v6052_v62 = vor.u32 %v8532_v52, %v6049_v55 }
  0x62   : > { %1387 = vmatpush.bf16.msra.mxu0 %v6032_v46  ;;  %v6140_v46 = vor.u32 %v8554_v32, %v6137_v14  ;;  %v9892_v47 = vpack.c.bf16 %v459_v36, %v459_v36  ;;  %v6121_v61 = vld [vmem:[%s13147_s4 + $0xd8] sm:$0xf0]  ;;  %v8530_v0 = vld [vmem:[%s13147_s4 + $0x34] sm:$0xf]  ;;  %v8564_v5 = vld [vmem:[%s13147_s4 + $0x144] sm:$0xf] }
  0x63   : > { %1400 = vmatpush.bf16.msra.mxu1 %v6096_v6  ;;  %v6041_v2 = vld [vmem:[%s13147_s4 + $0x38] sm:$0xf0]  ;;  %v8578_v3 = vld [vmem:[%s13147_s4 + $0x1b4] sm:$0xf]  ;;  %v6177_v6 = vld [vmem:[%s13147_s4 + $0x148] sm:$0xf0] }
  0x64   : > { %1413 = vmatpush.bf16.msra.mxu2 %v6160_v63  ;;  %v6244_v63 = vor.u32 %v8580_v56, %v6241_v57  ;;  %v6233_v4 = vld [vmem:[%s13147_s4 + $0x1b8] sm:$0xf0]  ;;  %v8548_v9 = vld [vmem:[%s13147_s4 + $0xc4] sm:$0xf]  ;;  %v6113_v7 = vld [vmem:[%s13147_s4 + $0xc8] sm:$0xf0]  ;;  %v6044_v11 = vor.u32 %v8530_v0, %v6041_v2  ;;  %v6180_v15 = vor.u32 %v8564_v5, %v6177_v6 }
  0x65   : > { %1426 = vmatpush.bf16.msra.mxu3 %v6224_v49  ;;  %v6129_v49 = vld [vmem:[%s13147_s4 + $0xe8] sm:$0xf0]  ;;  %v8576_v17 = vld [vmem:[%s13147_s4 + $0x1a4] sm:$0xf]  ;;  %v8562_v19 = vld [vmem:[%s13147_s4 + $0x134] sm:$0xf]  ;;  %v6116_v21 = vor.u32 %v8548_v9, %v6113_v7 }
  0x66   : > { %1388 = vmatpush.bf16.msra.mxu0 %v6024_v10  ;;  %v8566_v10 = vld [vmem:[%s13147_s4 + $0x154] sm:$0xf]  ;;  %v6169_v20 = vld [vmem:[%s13147_s4 + $0x138] sm:$0xf0]  ;;  %v6161_v14 = vld [vmem:[%s13147_s4 + $0x128] sm:$0xf0] }
  0x67   : > { %1401 = vmatpush.bf16.msra.mxu1 %v6088_v26  ;;  %v6188_v1 = vor.u32 %v8566_v10, %v6185_v58  ;;  %v8546_v24 = vld [vmem:[%s13147_s4 + $0xb4] sm:$0xf]  ;;  %v6105_v25 = vld [vmem:[%s13147_s4 + $0xb8] sm:$0xf0]  ;;  %v6172_v30 = vor.u32 %v8562_v19, %v6169_v20  ;;  %v6097_v38 = vld [vmem:[%s13147_s4 + $0xa8] sm:$0xf0] }
  0x68   : > { %1414 = vmatpush.bf16.msra.mxu2 %v6152_v16  ;;  %v6033_v16 = vld [vmem:[%s13147_s4 + $0x28] sm:$0xf0]  ;;  %v8526_v28 = vld [vmem:[%s13147_s4 + $0x14] sm:$0xf]  ;;  %v6025_v31 = vld [vmem:[%s13147_s4 + $0x18] sm:$0xf0]  ;;  %v6108_v36 = vor.u32 %v8546_v24, %v6105_v25 }
  0x69   : > { %1427 = vmatpush.bf16.msra.mxu3 %v6216_v59  ;;  %v6132_v59 = vor.u32 %v8552_v48, %v6129_v49  ;;  %v8574_v32 = vld [vmem:[%s13147_s4 + $0x194] sm:$0xf]  ;;  %v8524_v23 = vld [vmem:[%s13147_s4 + $0x4] sm:$0xf]  ;;  %v6017_v43 = vld [vmem:[%s13147_s4 + $0x8] sm:$0xf0] }
  0x6a   : > { %1389 = vmatpush.bf16.msra.mxu0 %v6016_v8  ;;  %v6124_v8 = vor.u32 %v8550_v60, %v6121_v61  ;;  %v8558_v40 = vld [vmem:[%s13147_s4 + $0x114] sm:$0xf]  ;;  %v8572_v44 = vld [vmem:[%s13147_s4 + $0x184] sm:$0xf]  ;;  %v6209_v45 = vld [vmem:[%s13147_s4 + $0x188] sm:$0xf0]  ;;  %v6020_v56 = vor.u32 %v8524_v23, %v6017_v43 }
  0x6b   : > { %1402 = vmatpush.bf16.msra.mxu1 %v6080_v42  ;;  %v6391_v48 = vld [vmem:[%s13147_s4 + $0x470] sm:$0xf]  ;;  %v8667_v49 = vld [vmem:[%s13147_s4 + $0x474] sm:$0xf0]  ;;  %v6089_v55 = vld [vmem:[%s13147_s4 + $0x98] sm:$0xf0]  ;;  %v6212_v57 = vor.u32 %v8572_v44, %v6209_v45 }
  0x6c   : > { %1415 = vmatpush.bf16.msra.mxu2 %v6144_v34  ;;  %v8560_v34 = vld [vmem:[%s13147_s4 + $0x124] sm:$0xf]  ;;  %v8715_v52 = vld [vmem:[%s13147_s4 + $0x5f4] sm:$0xf0]  ;;  %v6392_v60 = vor.u32 %v8667_v49, %v6391_v48  ;;  %v6519_v61 = vld [vmem:[%s13147_s4 + $0x570] sm:$0xf] }
  0x6d   : > { %1428 = vmatpush.bf16.msra.mxu3 %v6208_v12  ;;  %1390 = vmatmul.bf16.vlgmr.msra.gmra.mxu0 %v9844_v22  ;;  %v6236_v12 = vor.u32 %v8578_v3, %v6233_v4  ;;  %v6164_v42 = vor.u32 %v8560_v34, %v6161_v14  ;;  %v8556_v58 = vld [vmem:[%s13147_s4 + $0x104] sm:$0xf]  ;;  %v8665_v0 = vld [vmem:[%s13147_s4 + $0x464] sm:$0xf0]  ;;  %v8699_v2 = vld [vmem:[%s13147_s4 + $0x574] sm:$0xf0] }
  0x6e   : > { %1434 = vmatpush.bf16.msrb.mxu0 %v6076_v13  ;;  %1403 = vmatmul.bf16.vlgmr.msra.gmra.mxu1 %v9903_v53  ;;  %v8528_v13 = vld [vmem:[%s13147_s4 + $0x24] sm:$0xf]  ;;  %v6575_v3 = vld [vmem:[%s13147_s4 + $0x5e0] sm:$0xf]  ;;  %v8713_v4 = vld [vmem:[%s13147_s4 + $0x5e4] sm:$0xf0] }
  0x6f   : > { %1447 = vmatpush.bf16.msrb.mxu1 %v6140_v46  ;;  %1416 = vmatmul.bf16.vlgmr.msra.gmra.mxu2 %v9892_v47  ;;  %v6036_v26 = vor.u32 %v8528_v13, %v6033_v16  ;;  %v6153_v46 = vld [vmem:[%s13147_s4 + $0x118] sm:$0xf0]  ;;  %v8540_v5 = vld [vmem:[%s13147_s4 + $0x84] sm:$0xf]  ;;  %v6081_v6 = vld [vmem:[%s13147_s4 + $0x88] sm:$0xf0]  ;;  %v6576_v13 = vor.u32 %v8713_v4, %v6575_v3 }
  0x70   : > { %1429 = vmatmul.bf16.vlgmr.msra.gmra.mxu3 %v9858_v29  ;;  %1460 = vmatpush.bf16.msrb.mxu2 %v6204_v39  ;;  %v6028_v39 = vor.u32 %v8526_v28, %v6025_v31  ;;  %v6156_v10 = vor.u32 %v8558_v40, %v6153_v46  ;;  %v6455_v9 = vld [vmem:[%s13147_s4 + $0x4f0] sm:$0xf]  ;;  %v8683_v7 = vld [vmem:[%s13147_s4 + $0x4f4] sm:$0xf0]  ;;  %v8697_v19 = vld [vmem:[%s13147_s4 + $0x564] sm:$0xf0] }
  0x71   : > { %1473 = vmatpush.bf16.msrb.mxu3 %v6268_v18  ;;  %v6225_v18 = vld [vmem:[%s13147_s4 + $0x1a8] sm:$0xf0]  ;;  %v8663_v16 = vld [vmem:[%s13147_s4 + $0x454] sm:$0xf0]  ;;  %v6456_v20 = vor.u32 %v8683_v7, %v6455_v9  ;;  %v8681_v25 = vld [vmem:[%s13147_s4 + $0x4e4] sm:$0xf0] }
  0x72   : > { %1435 = vmatpush.bf16.msrb.mxu0 %v6068_v33  ;;  %v6228_v27 = vor.u32 %v8576_v17, %v6225_v18  ;;  %v6217_v33 = vld [vmem:[%s13147_s4 + $0x198] sm:$0xf0]  ;;  %v6084_v17 = vor.u32 %v8540_v5, %v6081_v6  ;;  %v6511_v18 = vld [vmem:[%s13147_s4 + $0x560] sm:$0xf]  ;;  %v8711_v24 = vld [vmem:[%s13147_s4 + $0x5d4] sm:$0xf0] }
  0x73   : > { %1448 = vmatpush.bf16.msrb.mxu1 %v6132_v59  ;;  %v6220_v41 = vor.u32 %v8574_v32, %v6217_v33  ;;  %v6145_v59 = vld [vmem:[%s13147_s4 + $0x108] sm:$0xf0]  ;;  %v8661_v28 = vld [vmem:[%s13147_s4 + $0x444] sm:$0xf0]  ;;  %v8695_v31 = vld [vmem:[%s13147_s4 + $0x554] sm:$0xf0] }
  0x74   : > { %1461 = vmatpush.bf16.msrb.mxu2 %v6196_v54  ;;  %v8542_v54 = vld [vmem:[%s13147_s4 + $0x94] sm:$0xf]  ;;  %v6559_v34 = vld [vmem:[%s13147_s4 + $0x5c0] sm:$0xf]  ;;  %v8709_v14 = vld [vmem:[%s13147_s4 + $0x5c4] sm:$0xf0] }
  0x75   : > { %1474 = vmatpush.bf16.msrb.mxu3 %v6260_v37  ;;  %v8544_v37 = vld [vmem:[%s13147_s4 + $0xa4] sm:$0xf]  ;;  %v8659_v40 = vld [vmem:[%s13147_s4 + $0x434] sm:$0xf0]  ;;  %v8693_v23 = vld [vmem:[%s13147_s4 + $0x544] sm:$0xf0] }
  0x76   : > { %1436 = vmatpush.bf16.msrb.mxu0 %v6060_v50  ;;  %v6100_v50 = vor.u32 %v8544_v37, %v6097_v38  ;;  %v8679_v37 = vld [vmem:[%s13147_s4 + $0x4d4] sm:$0xf0]  ;;  %v6551_v43 = vld [vmem:[%s13147_s4 + $0x5b0] sm:$0xf]  ;;  %v6431_v45 = vld [vmem:[%s13147_s4 + $0x4c0] sm:$0xf] }
  0x77   : > { %1449 = vmatpush.bf16.msrb.mxu1 %v6124_v8  ;;  %v6148_v8 = vor.u32 %v8556_v58, %v6145_v59  ;;  %v8707_v44 = vld [vmem:[%s13147_s4 + $0x5b4] sm:$0xf0]  ;;  %v8677_v46 = vld [vmem:[%s13147_s4 + $0x4c4] sm:$0xf0]  ;;  %v6423_v58 = vld [vmem:[%s13147_s4 + $0x4b0] sm:$0xf] }
  0x78   : > { %1462 = vmatpush.bf16.msrb.mxu2 %v6188_v1  ;;  %v6092_v1 = vor.u32 %v8542_v54, %v6089_v55  ;;  %v8691_v54 = vld [vmem:[%s13147_s4 + $0x534] sm:$0xf0]  ;;  %v6552_v55 = vor.u32 %v8707_v44, %v6551_v43  ;;  %v8673_v5 = vld [vmem:[%s13147_s4 + $0x4a4] sm:$0xf0]  ;;  %v6535_v6 = vld [vmem:[%s13147_s4 + $0x590] sm:$0xf] }
  0x79   : > { %1475 = vmatpush.bf16.msrb.mxu3 %v6252_v51  ;;  %v6583_v51 = vld [vmem:[%s13147_s4 + $0x5f0] sm:$0xf]  ;;  %v8675_v59 = vld [vmem:[%s13147_s4 + $0x4b4] sm:$0xf0] }
  0x7a   : > { %1437 = vmatpush.bf16.msrb.mxu0 %v6052_v62  ;;  %v6584_v62 = vor.u32 %v8715_v52, %v6583_v51  ;;  %v8657_v51 = vld [vmem:[%s13147_s4 + $0x424] sm:$0xf0]  ;;  %v6487_v52 = vld [vmem:[%s13147_s4 + $0x530] sm:$0xf]  ;;  %v6424_v4 = vor.u32 %v8675_v59, %v6423_v58  ;;  %v8696_v59 = vld [vmem:[%s13147_s4 + $0x564] sm:$0xf] }
  0x7b   : > { %1450 = vmatpush.bf16.msrb.mxu1 %v6116_v21  ;;  %v6567_v21 = vld [vmem:[%s13147_s4 + $0x5d0] sm:$0xf] }
  0x7c   : > { %1463 = vmatpush.bf16.msrb.mxu2 %v6180_v15  ;;  %v6375_v15 = vld [vmem:[%s13147_s4 + $0x450] sm:$0xf]  ;;  %v6568_v32 = vor.u32 %v8711_v24, %v6567_v21  ;;  %v6393_v24 = vld [vmem:[%s13147_s4 + $0x478] sm:$0xf0] }
  0x7d   : > { %1476 = vmatpush.bf16.msrb.mxu3 %v6244_v63  ;;  %v6383_v63 = vld [vmem:[%s13147_s4 + $0x460] sm:$0xf]  ;;  %v6471_v7 = vld [vmem:[%s13147_s4 + $0x510] sm:$0xf] }
  0x7e   : > { %1438 = vmatpush.bf16.msrb.mxu0 %v6044_v11  ;;  %v6384_v11 = vor.u32 %v8665_v0, %v6383_v63  ;;  %v8655_v63 = vld [vmem:[%s13147_s4 + $0x414] sm:$0xf0]  ;;  %v6415_v0 = vld [vmem:[%s13147_s4 + $0x4a0] sm:$0xf] }
  0x7f   : > { %1451 = vmatpush.bf16.msrb.mxu1 %v6108_v36  ;;  %v6439_v36 = vld [vmem:[%s13147_s4 + $0x4d0] sm:$0xf] }
  0x80   : > { %1464 = vmatpush.bf16.msrb.mxu2 %v6172_v30  ;;  %v6503_v30 = vld [vmem:[%s13147_s4 + $0x550] sm:$0xf] }
  0x81   : > { %1477 = vmatpush.bf16.msrb.mxu3 %v6236_v12  ;;  %v6520_v12 = vor.u32 %v8699_v2, %v6519_v61  ;;  %v6488_v61 = vor.u32 %v8691_v54, %v6487_v52  ;;  %v8689_v2 = vld [vmem:[%s13147_s4 + $0x524] sm:$0xf0] }
  0x82   : > { %1439 = vmatpush.bf16.msrb.mxu0 %v6036_v26  ;;  %v6376_v26 = vor.u32 %v8663_v16, %v6375_v15  ;;  %v8666_v16 = vld [vmem:[%s13147_s4 + $0x474] sm:$0xf] }
  0x83   : > { %1452 = vmatpush.bf16.msrb.mxu1 %v6100_v50  ;;  %v6351_v50 = vld [vmem:[%s13147_s4 + $0x420] sm:$0xf] }
  0x84   : > { %1465 = vmatpush.bf16.msrb.mxu2 %v6164_v42  ;;  %v6440_v42 = vor.u32 %v8679_v37, %v6439_v36  ;;  %v6463_v36 = vld [vmem:[%s13147_s4 + $0x500] sm:$0xf]  ;;  %v8685_v37 = vld [vmem:[%s13147_s4 + $0x504] sm:$0xf0] }
  0x85   : > { %1478 = vmatpush.bf16.msrb.mxu3 %v6228_v27  ;;  %v6367_v27 = vld [vmem:[%s13147_s4 + $0x440] sm:$0xf]  ;;  %v6464_v54 = vor.u32 %v8685_v37, %v6463_v36 }
  0x86   : > { %1440 = vmatpush.bf16.msrb.mxu0 %v6028_v39  ;;  %v6368_v38 = vor.u32 %v8661_v28, %v6367_v27  ;;  %v6359_v39 = vld [vmem:[%s13147_s4 + $0x430] sm:$0xf]  ;;  %v8701_v27 = vld [vmem:[%s13147_s4 + $0x584] sm:$0xf0]  ;;  %v8714_v28 = vld [vmem:[%s13147_s4 + $0x5f4] sm:$0xf] }
  0x87   : > { %1453 = vmatpush.bf16.msrb.mxu1 %v6092_v1  ;;  %v6360_v48 = vor.u32 %v8659_v40, %v6359_v39  ;;  %v6479_v1 = vld [vmem:[%s13147_s4 + $0x520] sm:$0xf]  ;;  %v8669_v40 = vld [vmem:[%s13147_s4 + $0x484] sm:$0xf0] }
  0x88   : > { %1466 = vmatpush.bf16.msrb.mxu2 %v6156_v10  ;;  %v8705_v10 = vld [vmem:[%s13147_s4 + $0x5a4] sm:$0xf0]  ;;  %v6480_v15 = vor.u32 %v8689_v2, %v6479_v1  ;;  %v6399_v39 = vld [vmem:[%s13147_s4 + $0x480] sm:$0xf]  ;;  %v8662_v1 = vld [vmem:[%s13147_s4 + $0x454] sm:$0xf] }
  0x89   : > { %1479 = vmatpush.bf16.msrb.mxu3 %v6220_v41  ;;  %v6495_v41 = vld [vmem:[%s13147_s4 + $0x540] sm:$0xf] }
  0x8a   : > { %1441 = vmatpush.bf16.msrb.mxu0 %v6020_v56  ;;  %v6496_v49 = vor.u32 %v8693_v23, %v6495_v41  ;;  %v6432_v56 = vor.u32 %v8677_v46, %v6431_v45  ;;  %v8698_v23 = vld [vmem:[%s13147_s4 + $0x574] sm:$0xf]  ;;  %v6385_v46 = vld [vmem:[%s13147_s4 + $0x468] sm:$0xf0] }
  0x8b   : > { %1454 = vmatpush.bf16.msrb.mxu1 %v6084_v17  ;;  %v1486_v17 = vld [vmem:[#allocation2] sm:$0xfc] }
  0x8c   : > { %1467 = vmatpush.bf16.msrb.mxu2 %v6148_v8  ;;  %v8703_v8 = vld [vmem:[%s13147_s4 + $0x594] sm:$0xf0] }
  0x8d   : > { %1480 = vmatpush.bf16.msrb.mxu3 %v6212_v57  ;;  %1442 = vmatmul.bf16.vlgmr.msrb.gmra.mxu0 %v9844_v22  ;;  %v6447_v22 = vld [vmem:[%s13147_s4 + $0x4e0] sm:$0xf]  ;;  %v6536_v21 = vor.u32 %v8703_v8, %v6535_v6  ;;  %v8680_v6 = vld [vmem:[%s13147_s4 + $0x4e4] sm:$0xf]  ;;  %v6449_v8 = vld [vmem:[%s13147_s4 + $0x4e8] sm:$0xf0] }
  0x8e   : > { %1895 = vmatpush.bf16.msra.mxu0 %v6392_v60  ;;  %v6448_v33 = vor.u32 %v8681_v25, %v6447_v22  ;;  %1455 = vmatmul.bf16.vlgmr.msrb.gmra.mxu1 %v9903_v53  ;;  %v6560_v53 = vor.u32 %v8709_v14, %v6559_v34  ;;  %v6543_v57 = vld [vmem:[%s13147_s4 + $0x5a0] sm:$0xf]  ;;  %v6352_v60 = vor.u32 %v8657_v51, %v6351_v50  ;;  %v1489_v22 = vld [vmem:[#allocation2 + $0x18] sm:$0xfc]  ;;  %v1493_v25 = vld [vmem:[#allocation2 + $0x38] sm:$0x3] }
  0x8f   : > { %1908 = vmatpush.bf16.msra.mxu1 %v6456_v20  ;;  %1468 = vmatmul.bf16.vlgmr.msrb.gmra.mxu2 %v9892_v47  ;;  %v6504_v47 = vor.u32 %v8695_v31, %v6503_v30  ;;  %v6544_v3 = vor.u32 %v8705_v10, %v6543_v57  ;;  %v8671_v20 = vld [vmem:[%s13147_s4 + $0x494] sm:$0xf0]  ;;  %v6585_v31 = vld [vmem:[%s13147_s4 + $0x5f8] sm:$0xf0]  ;;  %v8712_v50 = vld [vmem:[%s13147_s4 + $0x5e4] sm:$0xf] }
  0x90   : > { %1481 = vmatmul.bf16.vlgmr.msrb.gmra.mxu3 %v9858_v29  ;;  %1921 = vmatpush.bf16.msra.mxu2 %v6520_v12  ;;  %v6512_v29 = vor.u32 %v8697_v19, %v6511_v18  ;;  %v6335_v12 = vld [vmem:[%s13147_s4 + $0x400] sm:$0xf]  ;;  %v6407_v19 = vld [vmem:[%s13147_s4 + $0x490] sm:$0xf]  ;;  %v6588_v44 = vor.u32 %v8714_v28, %v6585_v31  ;;  %v6577_v51 = vld [vmem:[%s13147_s4 + $0x5e8] sm:$0xf0] }
  0x91   : > { %1934 = vmatpush.bf16.msra.mxu3 %v6584_v62  ;;  %v6343_v62 = vld [vmem:[%s13147_s4 + $0x410] sm:$0xf]  ;;  %v1490_v18 = vld [vmem:[#allocation2 + $0x20] sm:$0x3]  ;;  %v6408_v43 = vor.u32 %v8671_v20, %v6407_v19  ;;  %v8708_v19 = vld [vmem:[%s13147_s4 + $0x5c4] sm:$0xf] }
  0x92   : > { %1896 = vmatpush.bf16.msra.mxu0 %v6384_v11  ;;  %v6344_v9 = vor.u32 %v8655_v63, %v6343_v62  ;;  %v8687_v11 = vld [vmem:[%s13147_s4 + $0x514] sm:$0xf0]  ;;  %v1494_v34 = vpack.c.bf16 %v1490_v18, %v1486_v17  ;;  %v6513_v63 = vld [vmem:[%s13147_s4 + $0x568] sm:$0xf0]  ;;  %v6452_v17 = vor.u32 %v8680_v6, %v6449_v8  ;;  %v8658_v28 = vld [vmem:[%s13147_s4 + $0x434] sm:$0xf] }
  0x93   : > { %1909 = vmatpush.bf16.msra.mxu1 %v6448_v33  ;;  %v1492_v33 = vld [vmem:[#allocation2 + $0x30] sm:$0x3]  ;;  %v6472_v14 = vor.u32 %v8687_v11, %v6471_v7  ;;  %v6369_v18 = vld [vmem:[%s13147_s4 + $0x448] sm:$0xf0]  ;;  %v6361_v31 = vld [vmem:[%s13147_s4 + $0x438] sm:$0xf0] }
  0x94   : > { %1922 = vmatpush.bf16.msra.mxu2 %v6512_v29  ;;  %v6527_v29 = vld [vmem:[%s13147_s4 + $0x580] sm:$0xf]  ;;  %v10262_v52 = vrot.slane %v1494_v34, 1  ;;  %v6561_v20 = vld [vmem:[%s13147_s4 + $0x5c8] sm:$0xf0]  ;;  %v6364_v37 = vor.u32 %v8658_v28, %v6361_v31 }
  0x95   : > { %1935 = vmatpush.bf16.msra.mxu3 %v6576_v13  ;;  %v8653_v13 = vld [vmem:[%s13147_s4 + $0x404] sm:$0xf0]  ;;  %v6528_v41 = vor.u32 %v8701_v27, %v6527_v29  ;;  %v6497_v29 = vld [vmem:[%s13147_s4 + $0x548] sm:$0xf0]  ;;  %v6564_v27 = vor.u32 %v8708_v19, %v6561_v20  ;;  %v8676_v34 = vld [vmem:[%s13147_s4 + $0x4c4] sm:$0xf] }
  0x96   : > { %1897 = vmatpush.bf16.msra.mxu0 %v6376_v26  ;;  %v6416_v26 = vor.u32 %v8673_v5, %v6415_v0  ;;  %v6336_v30 = vor.u32 %v8653_v13, %v6335_v12  ;;  %v6580_v0 = vor.u32 %v8712_v50, %v6577_v51  ;;  %v6569_v5 = vld [vmem:[%s13147_s4 + $0x5d8] sm:$0xf0]  ;;  %v8694_v12 = vld [vmem:[%s13147_s4 + $0x554] sm:$0xf]  ;;  %v6529_v6 = vld [vmem:[%s13147_s4 + $0x588] sm:$0xf0] }
  0x97   : > { %1910 = vmatpush.bf16.msra.mxu1 %v6440_v42  ;;  %v8664_v42 = vld [vmem:[%s13147_s4 + $0x464] sm:$0xf]  ;;  %v6505_v13 = vld [vmem:[%s13147_s4 + $0x558] sm:$0xf0]  ;;  %v8654_v51 = vld [vmem:[%s13147_s4 + $0x414] sm:$0xf] }
  0x98   : > { %1923 = vmatpush.bf16.msra.mxu2 %v6504_v47  ;;  %v1497_v47 = vpack.c.bf16 %v1493_v25, %v1489_v22  ;;  %v6388_v58 = vor.u32 %v8664_v42, %v6385_v46  ;;  %v6508_v22 = vor.u32 %v8694_v12, %v6505_v13  ;;  %v6545_v42 = vld [vmem:[%s13147_s4 + $0x5a8] sm:$0xf0]  ;;  %v8670_v8 = vld [vmem:[%s13147_s4 + $0x494] sm:$0xf]  ;;  %v8684_v13 = vld [vmem:[%s13147_s4 + $0x504] sm:$0xf] }
  0x99   : > { %1936 = vmatpush.bf16.msra.mxu3 %v6568_v32  ;;  %v1488_v32 = vld [vmem:[#allocation2 + $0x10] sm:$0xfc]  ;;  %v6401_v19 = vld [vmem:[%s13147_s4 + $0x488] sm:$0xf0] }
  0x9a   : > { %1898 = vmatpush.bf16.msra.mxu0 %v6368_v38  ;;  %v6396_v38 = vor.u32 %v8666_v16, %v6393_v24  ;;  %v1496_v45 = vpack.c.bf16 %v1492_v33, %v1488_v32  ;;  %v10270_v57 = vrot.slane %v1497_v47, 1  ;;  %v8660_v16 = vld [vmem:[%s13147_s4 + $0x444] sm:$0xf]  ;;  %v6441_v24 = vld [vmem:[%s13147_s4 + $0x4d8] sm:$0xf0] }
  0x9b   : > { %1911 = vmatpush.bf16.msra.mxu1 %v6432_v56  ;;  %v6457_v56 = vld [vmem:[%s13147_s4 + $0x4f8] sm:$0xf0]  ;;  %v6372_v25 = vor.u32 %v8660_v16, %v6369_v18  ;;  %v8706_v32 = vld [vmem:[%s13147_s4 + $0x5b4] sm:$0xf]  ;;  %v8668_v18 = vld [vmem:[%s13147_s4 + $0x484] sm:$0xf] }
  0x9c   : > { %1924 = vmatpush.bf16.msra.mxu2 %v6496_v49  ;;  %v1491_v49 = vld [vmem:[#allocation2 + $0x28] sm:$0x3]  ;;  %v10275_v62 = vrot.slane %v1496_v45, 1  ;;  %v6553_v33 = vld [vmem:[%s13147_s4 + $0x5b8] sm:$0xf0] }
  0x9d   : > { %1937 = vmatpush.bf16.msra.mxu3 %v6560_v53  ;;  %v6521_v53 = vld [vmem:[%s13147_s4 + $0x578] sm:$0xf0] }
  0x9e   : > { %1899 = vmatpush.bf16.msra.mxu0 %v6360_v48  ;;  %v1487_v48 = vld [vmem:[#allocation2 + $0x8] sm:$0xfc]  ;;  %v6524_v10 = vor.u32 %v8698_v23, %v6521_v53  ;;  %v6489_v47 = vld [vmem:[%s13147_s4 + $0x538] sm:$0xf0]  ;;  %v8704_v53 = vld [vmem:[%s13147_s4 + $0x5a4] sm:$0xf] }
  0x9f   : > { %1912 = vmatpush.bf16.msra.mxu1 %v6424_v4  ;;  %v8710_v4 = vld [vmem:[%s13147_s4 + $0x5d4] sm:$0xf]  ;;  %v6353_v23 = vld [vmem:[%s13147_s4 + $0x428] sm:$0xf0]  ;;  %v6548_v50 = vor.u32 %v8704_v53, %v6545_v42 }
  0xa0   : > { %1925 = vmatpush.bf16.msra.mxu2 %v6488_v61  ;;  %v6400_v61 = vor.u32 %v8669_v40, %v6399_v39  ;;  %v6556_v39 = vor.u32 %v8706_v32, %v6553_v33  ;;  %v8656_v40 = vld [vmem:[%s13147_s4 + $0x424] sm:$0xf] }
  0xa1   : > { %1938 = vmatpush.bf16.msra.mxu3 %v6552_v55  ;;  %v8682_v55 = vld [vmem:[%s13147_s4 + $0x4f4] sm:$0xf]  ;;  %v6356_v46 = vor.u32 %v8656_v40, %v6353_v23 }
  0xa2   : > { %1900 = vmatpush.bf16.msra.mxu0 %v6352_v60  ;;  %v1495_v60 = vpack.c.bf16 %v1491_v49, %v1487_v48  ;;  %v6460_v2 = vor.u32 %v8682_v55, %v6457_v56  ;;  %v8688_v48 = vld [vmem:[%s13147_s4 + $0x524] sm:$0xf]  ;;  %v6481_v49 = vld [vmem:[%s13147_s4 + $0x528] sm:$0xf0]  ;;  %v6345_v55 = vld [vmem:[%s13147_s4 + $0x418] sm:$0xf0] }
  0xa3   : > { %1913 = vmatpush.bf16.msra.mxu1 %v6416_v26  ;;  %v8692_v26 = vld [vmem:[%s13147_s4 + $0x544] sm:$0xf]  ;;  %v8702_v56 = vld [vmem:[%s13147_s4 + $0x594] sm:$0xf] }
  0xa4   : > { %1926 = vmatpush.bf16.msra.mxu2 %v6480_v15  ;;  %v10300_v7 = vrot.slane %v1495_v60, 1  ;;  %v6572_v15 = vor.u32 %v8710_v4, %v6569_v5  ;;  %v6500_v36 = vor.u32 %v8692_v26, %v6497_v29  ;;  %v6484_v60 = vor.u32 %v8688_v48, %v6481_v49  ;;  %v6337_v4 = vld [vmem:[%s13147_s4 + $0x408] sm:$0xf0]  ;;  %v8700_v5 = vld [vmem:[%s13147_s4 + $0x584] sm:$0xf] }
  0xa5   : > { %1939 = vmatpush.bf16.msra.mxu3 %v6544_v3  ;;  %v6377_v3 = vld [vmem:[%s13147_s4 + $0x458] sm:$0xf0]  ;;  %v6532_v16 = vor.u32 %v8700_v5, %v6529_v6 }
  0xa6   : > { %1901 = vmatpush.bf16.msra.mxu0 %v6344_v9  ;;  %v6516_v9 = vor.u32 %v8696_v59, %v6513_v63  ;;  %v6380_v11 = vor.u32 %v8662_v1, %v6377_v3  ;;  %v6417_v59 = vld [vmem:[%s13147_s4 + $0x4a8] sm:$0xf0]  ;;  %v8686_v63 = vld [vmem:[%s13147_s4 + $0x514] sm:$0xf] }
  0xa7   : > { %1914 = vmatpush.bf16.msra.mxu1 %v6408_v43  ;;  %v8674_v43 = vld [vmem:[%s13147_s4 + $0x4b4] sm:$0xf] }
  0xa8   : > { %1927 = vmatpush.bf16.msra.mxu2 %v6472_v14  ;;  %v6433_v14 = vld [vmem:[%s13147_s4 + $0x4c8] sm:$0xf0] }
  0xa9   : > { %1940 = vmatpush.bf16.msra.mxu3 %v6536_v21  ;;  %v8678_v21 = vld [vmem:[%s13147_s4 + $0x4d4] sm:$0xf] }
  0xaa   : > { %1902 = vmatpush.bf16.msra.mxu0 %v6336_v30  ;;  %v6444_v30 = vor.u32 %v8678_v21, %v6441_v24  ;;  %v6404_v21 = vor.u32 %v8668_v18, %v6401_v19 }
  0xab   : > { %1915 = vmatpush.bf16.msra.mxu1 %v6400_v61  ;;  %v6348_v61 = vor.u32 %v8654_v51, %v6345_v55 }
  0xac   : > { %1928 = vmatpush.bf16.msra.mxu2 %v6464_v54 }
  0xad   : > { %1941 = vmatpush.bf16.msra.mxu3 %v6528_v41  ;;  %1903 = vmatmul.bf16.vlgmr.msra.gmra.mxu0 %v10262_v52  ;;  %v6436_v41 = vor.u32 %v8676_v34, %v6433_v14 }
  0xae   : > { %1947 = vmatpush.bf16.msrb.mxu0 %v6396_v38  ;;  %1916 = vmatmul.bf16.vlgmr.msra.gmra.mxu1 %v10300_v7  ;;  %v8690_v38 = vld [vmem:[%s13147_s4 + $0x534] sm:$0xf] }
  0xaf   : > { %1960 = vmatpush.bf16.msrb.mxu1 %v6460_v2  ;;  %1929 = vmatmul.bf16.vlgmr.msra.gmra.mxu2 %v10275_v62  ;;  %v6492_v45 = vor.u32 %v8690_v38, %v6489_v47  ;;  %v8652_v2 = vld [vmem:[%s13147_s4 + $0x404] sm:$0xf] }
  0xb0   : > { %1942 = vmatmul.bf16.vlgmr.msra.gmra.mxu3 %v10270_v57  ;;  %1973 = vmatpush.bf16.msrb.mxu2 %v6524_v10  ;;  %v6537_v10 = vld [vmem:[%s13147_s4 + $0x598] sm:$0xf0]  ;;  %v6340_v12 = vor.u32 %v8652_v2, %v6337_v4 }
  0xb1   : > { %1986 = vmatpush.bf16.msrb.mxu3 %v6588_v44  ;;  %v6425_v44 = vld [vmem:[%s13147_s4 + $0x4b8] sm:$0xf0]  ;;  %v6540_v1 = vor.u32 %v8702_v56, %v6537_v10 }
  0xb2   : > { %1948 = vmatpush.bf16.msrb.mxu0 %v6388_v58  ;;  %v6428_v54 = vor.u32 %v8674_v43, %v6425_v44  ;;  %v8672_v58 = vld [vmem:[%s13147_s4 + $0x4a4] sm:$0xf] }
  0xb3   : > { %1961 = vmatpush.bf16.msrb.mxu1 %v6452_v17  ;;  %v6420_v3 = vor.u32 %v8672_v58, %v6417_v59 }
  0xb4   : > { %1974 = vmatpush.bf16.msrb.mxu2 %v6516_v9  ;;  %v6409_v9 = vld [vmem:[%s13147_s4 + $0x498] sm:$0xf0] }
  0xb5   : > { %1987 = vmatpush.bf16.msrb.mxu3 %v6580_v0  ;;  %v6473_v0 = vld [vmem:[%s13147_s4 + $0x518] sm:$0xf0]  ;;  %v6412_v17 = vor.u32 %v8670_v8, %v6409_v9  ;;  %v2001_v9 = vld [vmem:[%s13148_s5] sm:$0x3] }
  0xb6   : > { %1949 = vmatpush.bf16.msrb.mxu0 %v6380_v11  ;;  %v6476_v11 = vor.u32 %v8686_v63, %v6473_v0 }
  0xb7   : > { %1962 = vmatpush.bf16.msrb.mxu1 %v6444_v30 }
  0xb8   : > { %1975 = vmatpush.bf16.msrb.mxu2 %v6508_v22 }
  0xb9   : > { %1988 = vmatpush.bf16.msrb.mxu3 %v6572_v15  ;;  %v6465_v15 = vld [vmem:[%s13147_s4 + $0x508] sm:$0xf0] }
  0xba   : > { %1950 = vmatpush.bf16.msrb.mxu0 %v6372_v25  ;;  %v6468_v20 = vor.u32 %v8684_v13, %v6465_v15  ;;  %v2003_v13 = vperm.slane %v2001_v9, 0 }
  0xbb   : > { %1963 = vmatpush.bf16.msrb.mxu1 %v6436_v41 }
  0xbc   : > { %1976 = vmatpush.bf16.msrb.mxu2 %v6500_v36 }
  0xbd   : > { %1989 = vmatpush.bf16.msrb.mxu3 %v6564_v27  ;;  %v967_v24 = vpop.f32.mrf.mxu0 }
  0xbe   : > { %1951 = vmatpush.bf16.msrb.mxu0 %v6364_v37 }
  0xbf   : > { %1964 = vmatpush.bf16.msrb.mxu1 %v6428_v54  ;;  %v1006_v22 = vpop.f32.mrf.mxu3 }
  0xc0   : > { %1977 = vmatpush.bf16.msrb.mxu2 %v6492_v45 }
  0xc1   : > { %1990 = vmatpush.bf16.msrb.mxu3 %v6556_v39 }
  0xc2   : > { %1952 = vmatpush.bf16.msrb.mxu0 %v6356_v46 }
  0xc3   : > { %1965 = vmatpush.bf16.msrb.mxu1 %v6420_v3 }
  0xc4   : > { %1978 = vmatpush.bf16.msrb.mxu2 %v6484_v60 }
  0xc5   : > { %1991 = vmatpush.bf16.msrb.mxu3 %v6548_v50  ;;  %v969_v25 = vpop.f32.mrf.mxu0 }
  0xc6   : > { %1953 = vmatpush.bf16.msrb.mxu0 %v6348_v61 }
  0xc7   : > { %1966 = vmatpush.bf16.msrb.mxu1 %v6412_v17  ;;  %v1008_v29 = vpop.f32.mrf.mxu3 }
  0xc8   : > { %1979 = vmatpush.bf16.msrb.mxu2 %v6476_v11 }
  0xc9   : > { %1992 = vmatpush.bf16.msrb.mxu3 %v6540_v1 }
  0xca   : > { %1954 = vmatpush.bf16.msrb.mxu0 %v6340_v12 }
  0xcb   : > { %1967 = vmatpush.bf16.msrb.mxu1 %v6404_v21  ;;  %v980_v26 = vpop.f32.mrf.mxu1 }
  0xcc   : > { %1980 = vmatpush.bf16.msrb.mxu2 %v6468_v20  ;;  %v981_v27 = vadd.f32 %v980_v26, %v967_v24 }
  0xcd   : > { %1993 = vmatpush.bf16.msrb.mxu3 %v6532_v16  ;;  %1955 = vmatmul.bf16.vlgmr.msrb.gmra.mxu0 %v10262_v52 }
  0xce   : > { %1968 = vmatmul.bf16.vlgmr.msrb.gmra.mxu1 %v10300_v7  ;;  %v1019_v31 = vpop.f32.mrf.mxu0 }
  0xcf   : > { %1981 = vmatmul.bf16.vlgmr.msrb.gmra.mxu2 %v10275_v62 }
  0xd0   : > { %1994 = vmatmul.bf16.vlgmr.msrb.gmra.mxu3 %v10270_v57  ;;  %v993_v28 = vpop.f32.mrf.mxu2 }
  0xd1   : > { %v994_v30 = vadd.f32 %v993_v28, %v981_v27 }
  0xd3   : > { %v1007_v32 = vadd.f32 %v1006_v22, %v994_v30  ;;  %v982_v33 = vpop.f32.mrf.mxu1  ;;  %v1058_v34 = vpop.f32.mrf.mxu3 }
  0xd6   : > { %v1021_v14 = vpop.f32.mrf.mxu0 }
  0xd8   : > { %v995_v52 = vpop.f32.mrf.mxu2 }
  0xd9   : > { %v2004_v52 = vperm.slane %v2001_v9, 1 }
  0xdb   : > { %v1032_v36 = vpop.f32.mrf.mxu1  ;;  %v1060_v37 = vpop.f32.mrf.mxu3 }
  0xdc   : > { %v1033_v57 = vadd.f32 %v1032_v36, %v1019_v31 }
  0xe0   : > { %v1045_v38 = vpop.f32.mrf.mxu2 }
  0xe1   : > { %v1046_v62 = vadd.f32 %v1045_v38, %v1033_v57 }
  0xe3   : > { %v1059_v47 = vadd.f32 %v1058_v34, %v1046_v62  ;;  %v1034_v39 = vpop.f32.mrf.mxu1 }
  0xe8   : > { %v1047_v41 = vpop.f32.mrf.mxu2 }
  0xea   : > { %v1391_v7 = vpop.f32.mrf.mxu0 }
  0xeb   : > { %v1392_v40 = vadd.f32 %v1391_v7, %v1007_v32  ;;  %v1404_v53 = vpop.f32.mrf.mxu1 }
  0xed   : > { %v1405_v43 = vadd.f32 %v1404_v53, %v1392_v40  ;;  %v10450_v53 = vand.u32 127, %v393_v35 }
  0xef   : > { %vm2025_vm1 = vcmp.lt.s32.totalorder %v10450_v53, 32  ;;  %vm2034_vm2 = vcmp.lt.s32.totalorder %v10450_v53, 64 }
  0xf2   : > { %v1393_v42 = vpop.f32.mrf.mxu0  ;;  %v1417_v44 = vpop.f32.mrf.mxu2 }
  0xf3   : > { %v1430_v23 = vpop.f32.mrf.mxu3  ;;  %v1418_v45 = vadd.f32 %v1417_v44, %v1405_v43  ;;  %v1406_v49 = vpop.f32.mrf.mxu1 }
  0xf5   : > { %v1431_v46 = vadd.f32 %v1430_v23, %v1418_v45 }
  0xfa   : > { %v1419_v50 = vpop.f32.mrf.mxu2 }
  0xfb   : > { %v1432_v48 = vpop.f32.mrf.mxu3 }
 0x10a   : > { %v1443_v51 = vpop.f32.mrf.mxu0 }
 0x10b   : > { %v1444_v54 = vadd.f32 %v1443_v51, %v1059_v47  ;;  %v1456_v55 = vpop.f32.mrf.mxu1 }
 0x10d   : > { %v1457_v58 = vadd.f32 %v1456_v55, %v1444_v54 }
 0x112   : > { %v1445_v10 = vpop.f32.mrf.mxu0  ;;  %v1469_v59 = vpop.f32.mrf.mxu2 }
 0x113   : > { %v1482_v56 = vpop.f32.mrf.mxu3  ;;  %v1470_v60 = vadd.f32 %v1469_v59, %v1457_v58  ;;  %v1458_v63 = vpop.f32.mrf.mxu1  ;;  %v437_v10 = vand.u32 31, %v10450_v53 }
 0x115   : > { %v1483_v61 = vadd.f32 %v1482_v56, %v1470_v60  ;;  %v432_v56 = vadd.s32 128, %v10450_v53  ;;  %v10468_v60 = vand.u32 1, %v437_v10  ;;  %v8843_v10 = vld [vmem:[%s13147_s4 + $0x9f4] sm:$0xf0] }
 0x117   : > { %v444_v58 = vand.u32 31, %v432_v56  ;;  %vm2068_vm3 = vcmp.lt.s32.totalorder %v10468_v60, 1  ;;  %v6727_v56 = vld [vmem:[%s13147_s4 + $0x810] sm:$0xf] }
 0x11a   : > { %v1471_v1 = vpop.f32.mrf.mxu2 }
 0x11b   : > { %v1484_v0 = vpop.f32.mrf.mxu3 }
 0x12a   : > { %v1904_v2 = vpop.f32.mrf.mxu0 }
 0x12b   : > { %v1917_v3 = vpop.f32.mrf.mxu1 }
 0x12c   : > { %v1918_v4 = vadd.f32 %v1917_v3, %v1904_v2 }
 0x132   : > { %v1906_v6 = vpop.f32.mrf.mxu0  ;;  %v1930_v8 = vpop.f32.mrf.mxu2 }
 0x133   : > { %v1943_v5 = vpop.f32.mrf.mxu3  ;;  %v1931_v11 = vadd.f32 %v1930_v8, %v1918_v4  ;;  %v1919_v15 = vpop.f32.mrf.mxu1 }
 0x135   : > { %v1944_v12 = vadd.f32 %v1943_v5, %v1931_v11 }
 0x137   : > { %v1999_v16 = vadd.f32 %v1944_v12, %v1431_v46 }
 0x139   : > { %v10443_v18 = vadd.f32 %v2003_v13, %v1999_v16 }
 0x13a   : > { %v1932_v19 = vpop.f32.mrf.mxu2 }
 0x13b   : > { %v1945_v17 = vpop.f32.mrf.mxu3  ;;  %v2009_v20 = vrot.slane %v10443_v18, 4 }
 0x13d   : > { %v2010_v21 = vadd.f32 %v2009_v20, %v10443_v18 }
 0x13f   : > { %v2011_v24 = vrot.slane %v2010_v21, 2 }
 0x141   : > { %v2012_v22 = vadd.f32 %v2011_v24, %v2010_v21 }
 0x143   : > { %v2013_v25 = vrot.slane %v2012_v22, 1 }
 0x145   : > { %v2014_v26 = vadd.f32 %v2013_v25, %v2012_v22 }
 0x147   : > { %2021 = vrot.lane.b32.xlu0 %v2014_v26, %s9134_s14 }
 0x14a   : > { %v1956_v29 = vpop.f32.mrf.mxu0 }
 0x14b   : > { %v1969_v27 = vpop.f32.mrf.mxu1 }
 0x14c   : > { %v1970_v28 = vadd.f32 %v1969_v27, %v1956_v29 }
 0x152   : > { %v1958_v31 = vpop.f32.mrf.mxu0  ;;  %v1982_v32 = vpop.f32.mrf.mxu2 }
 0x153   : > { %v1995_v30 = vpop.f32.mrf.mxu3  ;;  %v1983_v33 = vadd.f32 %v1982_v32, %v1970_v28  ;;  %v1971_v14 = vpop.f32.mrf.mxu1 }
 0x154   : > { %v6767_v14 = vld [vmem:[%s13147_s4 + $0x860] sm:$0xf] }
 0x155   : > { %v1996_v34 = vadd.f32 %v1995_v30, %v1983_v33 }
 0x157   : > { %v2000_v36 = vadd.f32 %v1996_v34, %v1483_v61  ;;  %v10470_v61 = vand.u32 1, %v444_v58  ;;  %v6775_v34 = vld [vmem:[%s13147_s4 + $0x870] sm:$0xf]  ;;  %v8783_v58 = vld [vmem:[%s13147_s4 + $0x814] sm:$0xf0] }
 0x159   : > { %v2008_v37 = vadd.f32 %v2004_v52, %v2000_v36  ;;  %vm2069_vm4 = vcmp.lt.s32.totalorder %v10470_v61, 1  ;;  %v8795_v52 = vld [vmem:[%s13147_s4 + $0x874] sm:$0xf0] }
 0x15a   : > { %v1984_v38 = vpop.f32.mrf.mxu2  ;;  %v6776_v36 = vor.u32 %v8795_v52, %v6775_v34  ;;  %v8825_v34 = vld [vmem:[%s13147_s4 + $0x964] sm:$0xf0] }
 0x15b   : > { %v1997_v57 = vpop.f32.mrf.mxu3  ;;  %v2015_v62 = vrot.slane %v2008_v37, 4  ;;  %v6759_v38 = vld [vmem:[%s13147_s4 + $0x850] sm:$0xf] }
 0x15c   : > { %v8793_v57 = vld [vmem:[%s13147_s4 + $0x864] sm:$0xf0]  ;;  %2687 = vmatpush.bf16.msra.mxu0 %v6776_v36 }
 0x15d   : > { %v2016_v47 = vadd.f32 %v2015_v62, %v2008_v37  ;;  %v8791_v62 = vld [vmem:[%s13147_s4 + $0x854] sm:$0xf0]  ;;  %v8837_v36 = vld [vmem:[%s13147_s4 + $0x9c4] sm:$0xf0] }
 0x15f   : > { %v2017_v39 = vrot.slane %v2016_v47, 2 }
 0x161   : > { %v2018_v7 = vadd.f32 %v2017_v39, %v2016_v47  ;;  %v6760_v47 = vor.u32 %v8791_v62, %v6759_v38  ;;  %v6751_v39 = vld [vmem:[%s13147_s4 + $0x840] sm:$0xf]  ;;  %v6753_v38 = vld [vmem:[%s13147_s4 + $0x848] sm:$0xf0] }
 0x163   : > { %v2019_v40 = vrot.slane %v2018_v7, 1 }
 0x165   : > { %v2020_v41 = vadd.f32 %v2019_v40, %v2018_v7  ;;  %v8789_v7 = vld [vmem:[%s13147_s4 + $0x844] sm:$0xf0] }
 0x166   : > { %v6752_v40 = vor.u32 %v8789_v7, %v6751_v39  ;;  %v8807_v39 = vld [vmem:[%s13147_s4 + $0x8d4] sm:$0xf0]  ;;  %v6887_v7 = vld [vmem:[%s13147_s4 + $0x950] sm:$0xf] }
 0x167   : > { %2023 = vrot.lane.b32.xlu0 %v2020_v41, %s9134_s14 }
 0x1b9   : > { %v2022_v23 = vpop.permute.xlu0 %2021 }
 0x1d9   : > { %v2024_v42 = vpop.permute.xlu0 %2023 }
 0x1da   : > { %v2027_v43 = vsel %vm2025_vm1, %v2024_v42, %v2022_v23  ;;  %v2026_v45 = vsel %vm2025_vm1, %v2022_v23, %v2024_v42 }
 0x1db   : > { %v2028_v44 = vadd.f32 %v2027_v43, %v2014_v26  ;;  %v2029_v46 = vadd.f32 %v2026_v45, %v2020_v41 }
 0x1dd   : > { %2030 = vrot.lane.b32.xlu1 %v2028_v44, %s9135_s15 }
 0x1e5   : > { %2032 = vrot.lane.b32.xlu1 %v2029_v46, %s9135_s15 }
 0x24f   : > { %v2031_v48 = vpop.permute.xlu1 %2030 }
 0x257   : > { %v2033_v35 = vpop.permute.xlu1 %2032 }
 0x258   : > { %v2035_v49 = vsel %vm2034_vm2, %v2031_v48, %v2033_v35  ;;  %v2036_v50 = vsel %vm2034_vm2, %v2033_v35, %v2031_v48  ;;  %v6743_v48 = vld [vmem:[%s13147_s4 + $0x830] sm:$0xf]  ;;  %v8787_v35 = vld [vmem:[%s13147_s4 + $0x834] sm:$0xf0] }
 0x259   : > { %v2037_v51 = vadd.f32 %v2036_v50, %v2028_v44  ;;  %v2038_v54 = vadd.f32 %v2035_v49, %v2029_v46  ;;  %v6735_v49 = vld [vmem:[%s13147_s4 + $0x820] sm:$0xf]  ;;  %v6744_v50 = vor.u32 %v8787_v35, %v6743_v48  ;;  %v6745_v48 = vld [vmem:[%s13147_s4 + $0x838] sm:$0xf0] }
 0x25b   : > { %v2039_v55 = vadd.f32 %v2038_v54, %v2037_v51  ;;  %v8785_v51 = vld [vmem:[%s13147_s4 + $0x824] sm:$0xf0]  ;;  %v6967_v54 = vld [vmem:[%s13147_s4 + $0x9f0] sm:$0xf] }
 0x25d   : > { %2040 = vrot.lane.b32.xlu2 %v2039_v55, %s9136_s16 }
 0x265   : > { %2042 = vrot.lane.b32.xlu2 %v2039_v55, %s9137_s17 }
 0x2b7   : > { %v2041_v59 = vpop.permute.xlu2 %2040 }
 0x2bf   : > { %v2043_v63 = vpop.permute.xlu2 %2042 }
 0x2c0   : > { %v2070_v0 = vsel %vm2068_vm3, %v2041_v59, %v2043_v63  ;;  %v2071_v1 = vsel %vm2069_vm4, %v2041_v59, %v2043_v63  ;;  %v6968_v59 = vor.u32 %v8843_v10, %v6967_v54  ;;  %v6959_v63 = vld [vmem:[%s13147_s4 + $0x9e0] sm:$0xf] }
 0x2c1   : > { %v2072_v2 = vadd.f32 %v2070_v0, %v2039_v55  ;;  %v2073_v3 = vadd.f32 %v2071_v1, %v2039_v55  ;;  %v6736_v55 = vor.u32 %v8785_v51, %v6735_v49  ;;  %v8841_v0 = vld [vmem:[%s13147_s4 + $0x9e4] sm:$0xf0]  ;;  %v6839_v1 = vld [vmem:[%s13147_s4 + $0x8f0] sm:$0xf]  ;;  %v6815_v49 = vld [vmem:[%s13147_s4 + $0x8c0] sm:$0xf] }
 0x2c2   : > { %2726 = vmatpush.bf16.msra.mxu3 %v6968_v59  ;;  %v6879_v51 = vld [vmem:[%s13147_s4 + $0x940] sm:$0xf] }
 0x2c3   : > { %v2074_v4 = vmul.f32 0.0078125, %v2072_v2  ;;  %v2075_v5 = vmul.f32 0.0078125, %v2073_v3  ;;  %v8811_v2 = vld [vmem:[%s13147_s4 + $0x8f4] sm:$0xf0]  ;;  %v6960_v3 = vor.u32 %v8841_v0, %v6959_v63  ;;  %v6927_v10 = vld [vmem:[%s13147_s4 + $0x9a0] sm:$0xf] }
 0x2c4   : > { %v8784_v63 = vld [vmem:[%s13147_s4 + $0x824] sm:$0xf]  ;;  %v6737_v0 = vld [vmem:[%s13147_s4 + $0x828] sm:$0xf0] }
 0x2c5   : > { %v2076_v6 = vperm.slane %v2074_v4, 0  ;;  %v2077_v8 = vperm.slane %v2075_v5, 0  ;;  %v6840_v4 = vor.u32 %v8811_v2, %v6839_v1  ;;  %v6903_v5 = vld [vmem:[%s13147_s4 + $0x970] sm:$0xf]  ;;  %v6740_v1 = vor.u32 %v8784_v63, %v6737_v0  ;;  %v8810_v63 = vld [vmem:[%s13147_s4 + $0x8f4] sm:$0xf] }
 0x2c6   : > { %2727 = vmatpush.bf16.msra.mxu3 %v6960_v3  ;;  %v6807_v2 = vld [vmem:[%s13147_s4 + $0x8b0] sm:$0xf]  ;;  %v8803_v3 = vld [vmem:[%s13147_s4 + $0x8b4] sm:$0xf0]  ;;  %v6841_v0 = vld [vmem:[%s13147_s4 + $0x8f8] sm:$0xf0] }
 0x2c7   : > { %v10479_v9 = vsub.f32 %v10443_v18, %v2076_v6  ;;  %v10481_v11 = vsub.f32 %v2008_v37, %v2077_v8  ;;  %v6768_v37 = vor.u32 %v8793_v57, %v6767_v14  ;;  %v8827_v6 = vld [vmem:[%s13147_s4 + $0x974] sm:$0xf0]  ;;  %v6728_v8 = vor.u32 %v8783_v58, %v6727_v56  ;;  %2700 = vmatpush.bf16.msra.mxu1 %v6840_v4  ;;  %v6943_v14 = vld [vmem:[%s13147_s4 + $0x9c0] sm:$0xf]  ;;  %v8833_v58 = vld [vmem:[%s13147_s4 + $0x9a4] sm:$0xf0] }
 0x2c8   : > { %v6944_v57 = vor.u32 %v8837_v36, %v6943_v14  ;;  %v6928_v59 = vor.u32 %v8833_v58, %v6927_v10  ;;  %v6871_v4 = vld [vmem:[%s13147_s4 + $0x930] sm:$0xf]  ;;  %v6969_v36 = vld [vmem:[%s13147_s4 + $0x9f8] sm:$0xf0]  ;;  %v8729_v10 = vld [vmem:[%s13147_s4 + $0x664] sm:$0xf0] }
 0x2c9   : > { %v2080_v12 = vmul.f32 %v10479_v9, %v10479_v9  ;;  %v2081_v13 = vmul.f32 %v10481_v11, %v10481_v11  ;;  %2688 = vmatpush.bf16.msra.mxu0 %v6768_v37  ;;  %v8788_v37 = vld [vmem:[%s13147_s4 + $0x844] sm:$0xf] }
 0x2ca   : > { %v6756_v62 = vor.u32 %v8788_v37, %v6753_v38  ;;  %v6791_v38 = vld [vmem:[%s13147_s4 + $0x890] sm:$0xf] }
 0x2cb   : > { %v2082_v15 = vrot.slane %v2080_v12, 4  ;;  %v2088_v16 = vrot.slane %v2081_v13, 4 }
 0x2cd   : > { %v2089_v17 = vadd.f32 %v2088_v16, %v2081_v13  ;;  %v2083_v19 = vadd.f32 %v2082_v15, %v2080_v12  ;;  %2689 = vmatpush.bf16.msra.mxu0 %v6760_v47  ;;  %v6904_v12 = vor.u32 %v8827_v6, %v6903_v5  ;;  %v6951_v13 = vld [vmem:[%s13147_s4 + $0x9d0] sm:$0xf]  ;;  %v8839_v15 = vld [vmem:[%s13147_s4 + $0x9d4] sm:$0xf0]  ;;  %v6719_v16 = vld [vmem:[%s13147_s4 + $0x800] sm:$0xf]  ;;  %v6808_v5 = vor.u32 %v8803_v3, %v6807_v2 }
 0x2ce   : > { %v6823_v47 = vld [vmem:[%s13147_s4 + $0x8d0] sm:$0xf]  ;;  %v8819_v6 = vld [vmem:[%s13147_s4 + $0x934] sm:$0xf0] }
 0x2cf   : > { %v2090_v20 = vrot.slane %v2089_v17, 2  ;;  %v2084_v21 = vrot.slane %v2083_v19, 2  ;;  %2713 = vmatpush.bf16.msra.mxu2 %v6904_v12  ;;  %v6919_v12 = vld [vmem:[%s13147_s4 + $0x990] sm:$0xf] }
 0x2d1   : > { %v2091_v24 = vadd.f32 %v2090_v20, %v2089_v17  ;;  %v2085_v22 = vadd.f32 %v2084_v21, %v2083_v19  ;;  %2690 = vmatpush.bf16.msra.mxu0 %v6752_v40  ;;  %v8781_v17 = vld [vmem:[%s13147_s4 + $0x804] sm:$0xf0]  ;;  %v8794_v19 = vld [vmem:[%s13147_s4 + $0x874] sm:$0xf]  ;;  %v6777_v20 = vld [vmem:[%s13147_s4 + $0x878] sm:$0xf0]  ;;  %v6952_v21 = vor.u32 %v8839_v15, %v6951_v13  ;;  %v6824_v40 = vor.u32 %v8807_v39, %v6823_v47 }
 0x2d2   : > { %v8831_v13 = vld [vmem:[%s13147_s4 + $0x994] sm:$0xf0]  ;;  %v2258_v15 = vld [vmem:[#allocation2] sm:$0xfe]  ;;  %v6855_v39 = vld [vmem:[%s13147_s4 + $0x910] sm:$0xf] }
 0x2d3   : > { %v2092_v25 = vrot.slane %v2091_v24, 1  ;;  %v2086_v26 = vrot.slane %v2085_v22, 1  ;;  %2728 = vmatpush.bf16.msra.mxu3 %v6952_v21  ;;  %v8799_v47 = vld [vmem:[%s13147_s4 + $0x894] sm:$0xf0] }
 0x2d5   : > { %v2093_v18 = vadd.f32 %v2092_v25, %v2091_v24  ;;  %v2087_v29 = vadd.f32 %v2086_v26, %v2085_v22  ;;  %2691 = vmatpush.bf16.msra.mxu0 %v6744_v50  ;;  %v6720_v24 = vor.u32 %v8781_v17, %v6719_v16  ;;  %v6780_v22 = vor.u32 %v8794_v19, %v6777_v20  ;;  %v8792_v25 = vld [vmem:[%s13147_s4 + $0x864] sm:$0xf]  ;;  %v6769_v26 = vld [vmem:[%s13147_s4 + $0x868] sm:$0xf0]  ;;  %v8805_v50 = vld [vmem:[%s13147_s4 + $0x8c4] sm:$0xf0] }
 0x2d6   : > { %v6816_v54 = vor.u32 %v8805_v50, %v6815_v49  ;;  %v6920_v16 = vor.u32 %v8831_v13, %v6919_v12  ;;  %v8782_v17 = vld [vmem:[%s13147_s4 + $0x814] sm:$0xf]  ;;  %v6729_v19 = vld [vmem:[%s13147_s4 + $0x818] sm:$0xf0]  ;;  %v2262_v20 = vld [vmem:[#allocation2 + $0x20] sm:$0x1] }
 0x2d7   : > { %2096 = vrot.lane.b32.xlu1 %v2093_v18, %s9134_s14  ;;  %2094 = vrot.lane.b32.xlu0 %v2087_v29, %s9134_s14  ;;  %v6732_v21 = vor.u32 %v8782_v17, %v6729_v19  ;;  %v6783_v49 = vld [vmem:[%s13147_s4 + $0x880] sm:$0xf]  ;;  %v8797_v50 = vld [vmem:[%s13147_s4 + $0x884] sm:$0xf0] }
 0x2d8   : > { %2729 = vmatpush.bf16.msra.mxu3 %v6944_v57  ;;  %v7015_v17 = vld [vmem:[%s13147_s4 + $0x650] sm:$0xf]  ;;  %v8727_v19 = vld [vmem:[%s13147_s4 + $0x654] sm:$0xf0] }
 0x2d9   : > { %2692 = vmatpush.bf16.msra.mxu0 %v6736_v55  ;;  %v8821_v55 = vld [vmem:[%s13147_s4 + $0x944] sm:$0xf0] }
 0x2da   : > { %v6880_v56 = vor.u32 %v8821_v55, %v6879_v51  ;;  %v6847_v51 = vld [vmem:[%s13147_s4 + $0x900] sm:$0xf]  ;;  %v8813_v55 = vld [vmem:[%s13147_s4 + $0x904] sm:$0xf0] }
 0x2db   : > { %v6848_v58 = vor.u32 %v8813_v55, %v6847_v51  ;;  %v8832_v51 = vld [vmem:[%s13147_s4 + $0x9a4] sm:$0xf] }
 0x2dd   : > { %2693 = vmatpush.bf16.msra.mxu0 %v6728_v8  ;;  %v6872_v8 = vor.u32 %v8819_v6, %v6871_v4  ;;  %v6844_v4 = vor.u32 %v8810_v63, %v6841_v0  ;;  %v8838_v6 = vld [vmem:[%s13147_s4 + $0x9d4] sm:$0xf]  ;;  %v6809_v63 = vld [vmem:[%s13147_s4 + $0x8b8] sm:$0xf0] }
 0x2de   : > { %v8818_v0 = vld [vmem:[%s13147_s4 + $0x934] sm:$0xf] }
 0x2e1   : > { %2694 = vmatpush.bf16.msra.mxu0 %v6720_v24  ;;  %v6799_v24 = vld [vmem:[%s13147_s4 + $0x8a0] sm:$0xf] }
 0x2e5   : > { %2739 = vmatpush.bf16.msrb.mxu0 %v6780_v22  ;;  %v8801_v22 = vld [vmem:[%s13147_s4 + $0x8a4] sm:$0xf0] }
 0x349   : > { %v2097_v27 = vpop.permute.xlu1 %2096  ;;  %v2095_v28 = vpop.permute.xlu0 %2094 }
 0x34a   : > { %v2098_v30 = vsel %vm2025_vm1, %v2095_v28, %v2097_v27  ;;  %v2099_v31 = vsel %vm2025_vm1, %v2097_v27, %v2095_v28  ;;  %v6761_v27 = vld [vmem:[%s13147_s4 + $0x858] sm:$0xf0] }
 0x34b   : > { %v2100_v32 = vadd.f32 %v2099_v31, %v2087_v29  ;;  %v2101_v33 = vadd.f32 %v2098_v30, %v2093_v18  ;;  %v6772_v18 = vor.u32 %v8792_v25, %v6769_v26  ;;  %v8790_v29 = vld [vmem:[%s13147_s4 + $0x854] sm:$0xf]  ;;  %v6831_v30 = vld [vmem:[%s13147_s4 + $0x8e0] sm:$0xf]  ;;  %v8809_v31 = vld [vmem:[%s13147_s4 + $0x8e4] sm:$0xf0]  ;;  %v2266_v26 = vpack.c.bf16 %v2262_v20, %v2258_v15 }
 0x34c   : > { %v6764_v28 = vor.u32 %v8790_v29, %v6761_v27  ;;  %v6863_v25 = vld [vmem:[%s13147_s4 + $0x920] sm:$0xf]  ;;  %v8817_v29 = vld [vmem:[%s13147_s4 + $0x924] sm:$0xf0] }
 0x34d   : > { %2102 = vrot.lane.b32.xlu2 %v2100_v32, %s9135_s15  ;;  %2104 = vrot.lane.b32.xlu0 %v2101_v33, %s9135_s15  ;;  %v6864_v27 = vor.u32 %v8817_v29, %v6863_v25  ;;  %v2336_v57 = vshrl.u32 %v2266_v26, 16  ;;  %v6833_v25 = vld [vmem:[%s13147_s4 + $0x8e8] sm:$0xf0] }
 0x34e   : > { %2740 = vmatpush.bf16.msrb.mxu0 %v6772_v18  ;;  %v6800_v18 = vor.u32 %v8801_v22, %v6799_v24  ;;  %v7016_v24 = vor.u32 %v8727_v19, %v7015_v17  ;;  %v8808_v22 = vld [vmem:[%s13147_s4 + $0x8e4] sm:$0xf] }
 0x352   : > { %2741 = vmatpush.bf16.msrb.mxu0 %v6764_v28  ;;  %v6911_v28 = vld [vmem:[%s13147_s4 + $0x980] sm:$0xf] }
 0x356   : > { %2742 = vmatpush.bf16.msrb.mxu0 %v6756_v62 }
 0x3a7   : > { %v2103_v41 = vpop.permute.xlu2 %2102 }
 0x3bf   : > { %v2105_v23 = vpop.permute.xlu0 %2104 }
 0x3c0   : > { %v2106_v42 = vsel %vm2034_vm2, %v2103_v41, %v2105_v23  ;;  %v2107_v43 = vsel %vm2034_vm2, %v2105_v23, %v2103_v41  ;;  %v8823_v41 = vld [vmem:[%s13147_s4 + $0x954] sm:$0xf0] }
 0x3c1   : > { %v2108_v44 = vadd.f32 %v2107_v43, %v2100_v32  ;;  %v2109_v45 = vadd.f32 %v2106_v42, %v2101_v33  ;;  %v6895_v32 = vld [vmem:[%s13147_s4 + $0x960] sm:$0xf]  ;;  %v6832_v33 = vor.u32 %v8809_v31, %v6831_v30  ;;  %v6888_v23 = vor.u32 %v8823_v41, %v6887_v7  ;;  %v6935_v42 = vld [vmem:[%s13147_s4 + $0x9b0] sm:$0xf]  ;;  %v8835_v43 = vld [vmem:[%s13147_s4 + $0x9b4] sm:$0xf0] }
 0x3c2   : > { %v6896_v52 = vor.u32 %v8825_v34, %v6895_v32  ;;  %v8829_v30 = vld [vmem:[%s13147_s4 + $0x984] sm:$0xf0]  ;;  %v2338_v31 = vshll.u32 %v2266_v26, 16  ;;  %v6721_v34 = vld [vmem:[%s13147_s4 + $0x808] sm:$0xf0]  ;;  %v6792_v41 = vor.u32 %v8799_v47, %v6791_v38 }
 0x3c3   : > { %v10523_v46 = vadd.f32 %v2109_v45, %v2108_v44  ;;  %2701 = vmatpush.bf16.msra.mxu1 %v6832_v33  ;;  %v6936_v44 = vor.u32 %v8835_v43, %v6935_v42  ;;  %v8786_v45 = vld [vmem:[%s13147_s4 + $0x834] sm:$0xf]  ;;  %v6912_v32 = vor.u32 %v8829_v30, %v6911_v28  ;;  %v8780_v33 = vld [vmem:[%s13147_s4 + $0x804] sm:$0xf]  ;;  %v8815_v7 = vld [vmem:[%s13147_s4 + $0x914] sm:$0xf0] }
 0x3c4   : > { %2714 = vmatpush.bf16.msra.mxu2 %v6896_v52  ;;  %v6748_v35 = vor.u32 %v8786_v45, %v6745_v48  ;;  %v8842_v52 = vld [vmem:[%s13147_s4 + $0x9f4] sm:$0xf]  ;;  %v6724_v14 = vor.u32 %v8780_v33, %v6721_v34  ;;  %v2340_v37 = vrot.slane %v2338_v31, 1  ;;  %v7031_v42 = vld [vmem:[%s13147_s4 + $0x670] sm:$0xf] }
 0x3c5   : > { %2113 = vrot.lane.b32.xlu2 %v10523_v46, %s9137_s17  ;;  %2111 = vrot.lane.b32.xlu1 %v10523_v46, %s9136_s16  ;;  %v6972_v62 = vor.u32 %v8842_v52, %v6969_v36  ;;  %v8731_v43 = vld [vmem:[%s13147_s4 + $0x674] sm:$0xf0]  ;;  %v8840_v45 = vld [vmem:[%s13147_s4 + $0x9e4] sm:$0xf] }
 0x3c6   : > { %2730 = vmatpush.bf16.msra.mxu3 %v6936_v44  ;;  %2743 = vmatpush.bf16.msrb.mxu0 %v6748_v35  ;;  %v7032_v44 = vor.u32 %v8731_v43, %v7031_v42  ;;  %v6961_v48 = vld [vmem:[%s13147_s4 + $0x9e8] sm:$0xf0]  ;;  %v8824_v26 = vld [vmem:[%s13147_s4 + $0x964] sm:$0xf]  ;;  %v7007_v33 = vld [vmem:[%s13147_s4 + $0x640] sm:$0xf] }
 0x3c7   : > { %2702 = vmatpush.bf16.msra.mxu1 %v6824_v40  ;;  %v10739_v40 = vor.u32 %v2340_v37, %v2336_v57  ;;  %v6964_v35 = vor.u32 %v8840_v45, %v6961_v48  ;;  %v8836_v30 = vld [vmem:[%s13147_s4 + $0x9c4] sm:$0xf]  ;;  %v6945_v31 = vld [vmem:[%s13147_s4 + $0x9c8] sm:$0xf0]  ;;  %v8725_v34 = vld [vmem:[%s13147_s4 + $0x644] sm:$0xf0] }
 0x3c8   : > { %2715 = vmatpush.bf16.msra.mxu2 %v6888_v23  ;;  %v6856_v23 = vor.u32 %v8815_v7, %v6855_v39  ;;  %v7008_v36 = vor.u32 %v8725_v34, %v7007_v33  ;;  %v8806_v57 = vld [vmem:[%s13147_s4 + $0x8d4] sm:$0xf]  ;;  %v6825_v37 = vld [vmem:[%s13147_s4 + $0x8d8] sm:$0xf0]  ;;  %v6999_v42 = vld [vmem:[%s13147_s4 + $0x630] sm:$0xf] }
 0x3c9   : > { %2695 = vmatmul.bf16.vlgmr.msra.gmra.mxu0 %v10739_v40  ;;  %v8822_v38 = vld [vmem:[%s13147_s4 + $0x954] sm:$0xf]  ;;  %v6828_v47 = vor.u32 %v8806_v57, %v6825_v37  ;;  %v6937_v7 = vld [vmem:[%s13147_s4 + $0x9b8] sm:$0xf0]  ;;  %v8723_v43 = vld [vmem:[%s13147_s4 + $0x634] sm:$0xf0] }
 0x3ca   : > { %2731 = vmatpush.bf16.msra.mxu3 %v6928_v59  ;;  %2744 = vmatpush.bf16.msrb.mxu0 %v6740_v1  ;;  %v8826_v1 = vld [vmem:[%s13147_s4 + $0x974] sm:$0xf]  ;;  %v8804_v45 = vld [vmem:[%s13147_s4 + $0x8c4] sm:$0xf]  ;;  %v6817_v48 = vld [vmem:[%s13147_s4 + $0x8c8] sm:$0xf0] }
 0x3cb   : > { %2703 = vmatpush.bf16.msra.mxu1 %v6816_v54  ;;  %v6784_v54 = vor.u32 %v8797_v50, %v6783_v49  ;;  %v8834_v39 = vld [vmem:[%s13147_s4 + $0x9b4] sm:$0xf]  ;;  %v6820_v49 = vor.u32 %v8804_v45, %v6817_v48  ;;  %v6881_v50 = vld [vmem:[%s13147_s4 + $0x948] sm:$0xf0]  ;;  %v8717_v34 = vld [vmem:[%s13147_s4 + $0x604] sm:$0xf0] }
 0x3cc   : > { %2716 = vmatpush.bf16.msra.mxu2 %v6880_v56  ;;  %v7023_v56 = vld [vmem:[%s13147_s4 + $0x660] sm:$0xf]  ;;  %v6857_v45 = vld [vmem:[%s13147_s4 + $0x918] sm:$0xf0] }
 0x3cd   : > { %v7024_v59 = vor.u32 %v8729_v10, %v7023_v56  ;;  %v6991_v10 = vld [vmem:[%s13147_s4 + $0x620] sm:$0xf] }
 0x3ce   : > { %2732 = vmatpush.bf16.msra.mxu3 %v6920_v16  ;;  %2745 = vmatpush.bf16.msrb.mxu0 %v6732_v21  ;;  %v2155_v48 = vld [vmem:[%s13150_s7] sm:$0x3] }
 0x3cf   : > { %2704 = vmatpush.bf16.msra.mxu1 %v6808_v5  ;;  %v6905_v5 = vld [vmem:[%s13147_s4 + $0x978] sm:$0xf0] }
 0x3d0   : > { %2717 = vmatpush.bf16.msra.mxu2 %v6872_v8  ;;  %v6953_v8 = vld [vmem:[%s13147_s4 + $0x9d8] sm:$0xf0]  ;;  %v6908_v15 = vor.u32 %v8826_v1, %v6905_v5 }
 0x3d1   : > { %v6956_v16 = vor.u32 %v8838_v6, %v6953_v8  ;;  %v6873_v1 = vld [vmem:[%s13147_s4 + $0x938] sm:$0xf0] }
 0x3d2   : > { %2733 = vmatpush.bf16.msra.mxu3 %v6912_v32  ;;  %2746 = vmatpush.bf16.msrb.mxu0 %v6724_v14  ;;  %v6948_v32 = vor.u32 %v8836_v30, %v6945_v31  ;;  %v6921_v5 = vld [vmem:[%s13147_s4 + $0x998] sm:$0xf0] }
 0x3d3   : > { %2705 = vmatpush.bf16.msra.mxu1 %v6800_v18  ;;  %v6836_v18 = vor.u32 %v8808_v22, %v6833_v25  ;;  %v8828_v25 = vld [vmem:[%s13147_s4 + $0x984] sm:$0xf] }
 0x3d4   : > { %2718 = vmatpush.bf16.msra.mxu2 %v6864_v27 }
 0x3d6   : > { %2778 = vmatpush.bf16.msrb.mxu3 %v6972_v62  ;;  %3111 = vmatpush.bf16.msra.mxu0 %v7032_v44  ;;  %v6889_v62 = vld [vmem:[%s13147_s4 + $0x958] sm:$0xf0]  ;;  %v7000_v44 = vor.u32 %v8723_v43, %v6999_v42 }
 0x3d7   : > { %2706 = vmatpush.bf16.msra.mxu1 %v6792_v41  ;;  %v6892_v41 = vor.u32 %v8822_v38, %v6889_v62  ;;  %v8779_v38 = vld [vmem:[%s13147_s4 + $0x7f4] sm:$0xf0]  ;;  %v8798_v62 = vld [vmem:[%s13147_s4 + $0x894] sm:$0xf] }
 0x3d8   : > { %2719 = vmatpush.bf16.msra.mxu2 %v6856_v23  ;;  %v6940_v23 = vor.u32 %v8834_v39, %v6937_v7 }
 0x3d9   : > { %2747 = vmatmul.bf16.vlgmr.msrb.gmra.mxu0 %v10739_v40 }
 0x3da   : > { %2779 = vmatpush.bf16.msrb.mxu3 %v6964_v35  ;;  %3112 = vmatpush.bf16.msra.mxu0 %v7024_v59  ;;  %v8820_v35 = vld [vmem:[%s13147_s4 + $0x944] sm:$0xf]  ;;  %v8802_v59 = vld [vmem:[%s13147_s4 + $0x8b4] sm:$0xf] }
 0x3db   : > { %2707 = vmatpush.bf16.msra.mxu1 %v6784_v54  ;;  %v6929_v54 = vld [vmem:[%s13147_s4 + $0x9a8] sm:$0xf0]  ;;  %v6884_v55 = vor.u32 %v8820_v35, %v6881_v50  ;;  %v6812_v40 = vor.u32 %v8802_v59, %v6809_v63  ;;  %v8777_v59 = vld [vmem:[%s13147_s4 + $0x7e4] sm:$0xf0]  ;;  %v8796_v63 = vld [vmem:[%s13147_s4 + $0x884] sm:$0xf] }
 0x3dc   : > { %2720 = vmatpush.bf16.msra.mxu2 %v6848_v58  ;;  %v6932_v56 = vor.u32 %v8832_v51, %v6929_v54  ;;  %v8721_v58 = vld [vmem:[%s13147_s4 + $0x624] sm:$0xf0]  ;;  %v8730_v51 = vld [vmem:[%s13147_s4 + $0x674] sm:$0xf]  ;;  %v7033_v54 = vld [vmem:[%s13147_s4 + $0x678] sm:$0xf0] }
 0x3de   : > { %2780 = vmatpush.bf16.msrb.mxu3 %v6956_v16  ;;  %3113 = vmatpush.bf16.msra.mxu0 %v7016_v24  ;;  %v8800_v16 = vld [vmem:[%s13147_s4 + $0x8a4] sm:$0xf]  ;;  %v6865_v24 = vld [vmem:[%s13147_s4 + $0x928] sm:$0xf0] }
 0x3df   : > { %2752 = vmatpush.bf16.msrb.mxu1 %v6844_v4  ;;  %v8830_v4 = vld [vmem:[%s13147_s4 + $0x994] sm:$0xf] }
 0x3e0   : > { %2765 = vmatpush.bf16.msrb.mxu2 %v6908_v15  ;;  %v8719_v15 = vld [vmem:[%s13147_s4 + $0x614] sm:$0xf0]  ;;  %v6924_v19 = vor.u32 %v8830_v4, %v6921_v5  ;;  %v6785_v4 = vld [vmem:[%s13147_s4 + $0x888] sm:$0xf0]  ;;  %v8812_v5 = vld [vmem:[%s13147_s4 + $0x904] sm:$0xf] }
 0x3e2   : > { %2781 = vmatpush.bf16.msrb.mxu3 %v6948_v32  ;;  %3114 = vmatpush.bf16.msra.mxu0 %v7008_v36  ;;  %v7223_v36 = vld [vmem:[%s13147_s4 + $0x7f0] sm:$0xf] }
 0x3e3   : > { %2753 = vmatpush.bf16.msrb.mxu1 %v6836_v18 }
 0x3e6   : > { %2782 = vmatpush.bf16.msrb.mxu3 %v6940_v23  ;;  %3115 = vmatpush.bf16.msra.mxu0 %v7000_v44  ;;  %v6793_v23 = vld [vmem:[%s13147_s4 + $0x898] sm:$0xf0] }
 0x3e7   : > { %2754 = vmatpush.bf16.msrb.mxu1 %v6828_v47  ;;  %v10953_v47 = vld [vmem:[%s13149_s6] sm:$0x3]  ;;  %v6796_v50 = vor.u32 %v8798_v62, %v6793_v23  ;;  %v8724_v62 = vld [vmem:[%s13147_s4 + $0x644] sm:$0xf] }
 0x3ea   : > { %2783 = vmatpush.bf16.msrb.mxu3 %v6932_v56  ;;  %v7224_v56 = vor.u32 %v8779_v38, %v7223_v36 }
 0x3eb   : > { %2755 = vmatpush.bf16.msrb.mxu1 %v6820_v49 }
 0x3ee   : > { %2784 = vmatpush.bf16.msrb.mxu3 %v6924_v19 }
 0x3ef   : > { %2756 = vmatpush.bf16.msrb.mxu1 %v6812_v40  ;;  %v2149_v40 = vperm.slane %v10953_v47, 0 }
 0x41f   : > { %v2114_v2 = vpop.permute.xlu2 %2113 }
 0x437   : > { %v2112_v3 = vpop.permute.xlu1 %2111 }
 0x438   : > { %v2115_v12 = vsel %vm2068_vm3, %v2112_v3, %v2114_v2  ;;  %v2116_v13 = vsel %vm2069_vm4, %v2112_v3, %v2114_v2  ;;  %v6992_v3 = vor.u32 %v8721_v58, %v6991_v10  ;;  %v7215_v58 = vld [vmem:[%s13147_s4 + $0x7e0] sm:$0xf] }
 0x439   : > { %v2117_v20 = vadd.f32 %v2115_v12, %v10523_v46  ;;  %v2118_v21 = vadd.f32 %v2116_v13, %v10523_v46  ;;  %v6897_v46 = vld [vmem:[%s13147_s4 + $0x968] sm:$0xf0]  ;;  %v6876_v12 = vor.u32 %v8818_v0, %v6873_v1  ;;  %v6983_v13 = vld [vmem:[%s13147_s4 + $0x610] sm:$0xf] }
 0x43a   : > { %v6900_v28 = vor.u32 %v8824_v26, %v6897_v46  ;;  %v6913_v26 = vld [vmem:[%s13147_s4 + $0x988] sm:$0xf0]  ;;  %3116 = vmatpush.bf16.msra.mxu0 %v6992_v3  ;;  %v6984_v46 = vor.u32 %v8719_v15, %v6983_v13  ;;  %v7036_v3 = vor.u32 %v8730_v51, %v7033_v54  ;;  %v8728_v13 = vld [vmem:[%s13147_s4 + $0x664] sm:$0xf]  ;;  %v7183_v54 = vld [vmem:[%s13147_s4 + $0x7a0] sm:$0xf] }
 0x43b   : > { %v2119_v29 = vmul.f32 0.0078125, %v2117_v20  ;;  %v2120_v27 = vmul.f32 0.0078125, %v2118_v21  ;;  %v6801_v20 = vld [vmem:[%s13147_s4 + $0x8a8] sm:$0xf0]  ;;  %v8816_v21 = vld [vmem:[%s13147_s4 + $0x924] sm:$0xf]  ;;  %v6916_v37 = vor.u32 %v8828_v25, %v6913_v26 }
 0x43c   : > { %2766 = vmatpush.bf16.msrb.mxu2 %v6900_v28  ;;  %v6975_v28 = vld [vmem:[%s13147_s4 + $0x600] sm:$0xf]  ;;  %v6804_v31 = vor.u32 %v8800_v16, %v6801_v20  ;;  %v6868_v32 = vor.u32 %v8816_v21, %v6865_v24  ;;  %v7025_v15 = vld [vmem:[%s13147_s4 + $0x668] sm:$0xf0]  ;;  %v2150_v16 = vperm.slane %v10953_v47, 1  ;;  %v2157_v20 = vperm.slane %v2155_v48, 0 }
 0x43d   : > { %v10826_v52 = vadd.f32 1e-05, %v2119_v29  ;;  %v10828_v14 = vadd.f32 1e-05, %v2120_v27  ;;  %v2261_v29 = vld [vmem:[#allocation2 + $0x18] sm:$0xfe]  ;;  %v6976_v44 = vor.u32 %v8717_v34, %v6975_v28  ;;  %2785 = vmatpush.bf16.msrb.mxu3 %v6916_v37  ;;  %v7216_v24 = vor.u32 %v8777_v59, %v7215_v58 }
 0x43e   : > { %v2265_v27 = vld [vmem:[#allocation2 + $0x38] sm:$0x1]  ;;  %3117 = vmatpush.bf16.msra.mxu0 %v6984_v46  ;;  %2757 = vmatpush.bf16.msrb.mxu1 %v6804_v31  ;;  %v2158_v25 = vperm.slane %v2155_v48, 1  ;;  %v7207_v46 = vld [vmem:[%s13147_s4 + $0x7d0] sm:$0xf] }
 0x43f   : > { %9113 = vrsqrt.f32 %v10826_v52  ;;  %v2269_v33 = vpack.c.bf16 %v2265_v27, %v2261_v29  ;;  %vm2129_vm7 = vweird.f32 %v10826_v52  ;;  %vm2139_vm9 = vweird.f32 %v10828_v14  ;;  %v8775_v29 = vld [vmem:[%s13147_s4 + $0x7d4] sm:$0xf0]  ;;  %v8773_v37 = vld [vmem:[%s13147_s4 + $0x7c4] sm:$0xf0]  ;;  %v7009_v47 = vld [vmem:[%s13147_s4 + $0x648] sm:$0xf0] }
 0x440   : > { %9115 = vrsqrt.f32 %v10828_v14  ;;  %2767 = vmatpush.bf16.msrb.mxu2 %v6892_v41  ;;  %v8771_v48 = vld [vmem:[%s13147_s4 + $0x7b4] sm:$0xf0] }
 0x441   : > { %v2357_v7 = vshrl.u32 %v2269_v33, 16  ;;  %v2359_v41 = vshll.u32 %v2269_v33, 16  ;;  %v7208_v33 = vor.u32 %v8775_v29, %v7207_v46  ;;  %v8778_v46 = vld [vmem:[%s13147_s4 + $0x7f4] sm:$0xf]  ;;  %v7225_v29 = vld [vmem:[%s13147_s4 + $0x7f8] sm:$0xf0] }
 0x442   : > { %3118 = vmatpush.bf16.msra.mxu0 %v6976_v44  ;;  %2758 = vmatpush.bf16.msrb.mxu1 %v6796_v50 }
 0x443   : > { %v2361_v49 = vrot.slane %v2359_v41, 1 }
 0x444   : > { %2768 = vmatpush.bf16.msrb.mxu2 %v6884_v55 }
 0x445   : > { %v10893_v2 = vpop.eup %9113  ;;  %v11001_v1 = vor.u32 %v2361_v49, %v2357_v7  ;;  %v2185_v7 = vld [vmem:[#allocation2] sm:$0xff]  ;;  %v7001_v49 = vld [vmem:[%s13147_s4 + $0x638] sm:$0xf0] }
 0x446   : > { %v10901_v6 = vpop.eup %9115  ;;  %v2124_v8 = vmul.f32 %v10893_v2, %v10826_v52  ;;  %vm2130_vm5 = vweird.f32 %v10893_v2  ;;  %v8814_v52 = vld [vmem:[%s13147_s4 + $0x914] sm:$0xf]  ;;  %3163 = vmatpush.bf16.msrb.mxu0 %v7036_v3  ;;  %v11053_v42 = vpack.c.bf16 %v2185_v7, %v2185_v7 }
 0x447   : > { %v2134_v17 = vmul.f32 %v10901_v6, %v10828_v14  ;;  %vm2140_vm6 = vweird.f32 %v10901_v6  ;;  %vm10961_vm8 = vmor %vm2129_vm7, %vm2130_vm5  ;;  %v6860_v10 = vor.u32 %v8814_v52, %v6857_v45  ;;  %2734 = vmatmul.bf16.vlgmr.msra.gmra.mxu3 %v11001_v1  ;;  %v7012_v52 = vor.u32 %v8724_v62, %v7009_v47  ;;  %v7191_v45 = vld [vmem:[%s13147_s4 + $0x7b0] sm:$0xf]  ;;  %v8722_v14 = vld [vmem:[%s13147_s4 + $0x634] sm:$0xf] }
 0x448   : > { %v2125_v22 = vmul.f32 %v10893_v2, %v2124_v8  ;;  %2769 = vmatpush.bf16.msrb.mxu2 %v6876_v12  ;;  %vm10978_vm10 = vmor %vm2139_vm9, %vm2140_vm6  ;;  %v6849_v8 = vld [vmem:[%s13147_s4 + $0x908] sm:$0xf0]  ;;  %3150 = vmatpush.bf16.msra.mxu3 %v7224_v56  ;;  %v7192_v50 = vor.u32 %v8771_v48, %v7191_v45  ;;  %v7004_v51 = vor.u32 %v8722_v14, %v7001_v49  ;;  %v8720_v56 = vld [vmem:[%s13147_s4 + $0x624] sm:$0xf] }
 0x449   : > { %v2135_v18 = vmul.f32 %v10901_v6, %v2134_v17  ;;  %v2165_v17 = vld [vmem:[%s13151_s8] sm:$0x3]  ;;  %3119 = vmatmul.bf16.vlgmr.msra.gmra.mxu0 %v11053_v42  ;;  %v8761_v62 = vld [vmem:[%s13147_s4 + $0x764] sm:$0xf0]  ;;  %v8776_v47 = vld [vmem:[%s13147_s4 + $0x7e4] sm:$0xf] }
 0x44a   : > { %v2126_v30 = vmul.f32 0.5, %v2125_v22  ;;  %v6852_v22 = vor.u32 %v8812_v5, %v6849_v8  ;;  %v2167_v27 = vperm.slane %v2165_v17, 0  ;;  %v8774_v48 = vld [vmem:[%s13147_s4 + $0x7d4] sm:$0xf]  ;;  %v2188_v14 = vld [vmem:[#allocation2 + $0x18] sm:$0xff] }
 0x44b   : > { %v2136_v57 = vmul.f32 0.5, %v2135_v18  ;;  %v7028_v18 = vor.u32 %v8728_v13, %v7025_v15  ;;  %v7095_v13 = vld [vmem:[%s13147_s4 + $0x6f0] sm:$0xf]  ;;  %v11163_v49 = vpack.c.bf16 %v2188_v14, %v2188_v14 }
 0x44c   : > { %v2127_v39 = vsub.f32 1.5, %v2126_v30  ;;  %2770 = vmatpush.bf16.msrb.mxu2 %v6868_v32  ;;  %v2168_v30 = vperm.slane %v2165_v17, 1  ;;  %3151 = vmatpush.bf16.msra.mxu3 %v7216_v24  ;;  %v8765_v17 = vld [vmem:[%s13147_s4 + $0x784] sm:$0xf0] }
 0x44d   : > { %v2137_v43 = vsub.f32 1.5, %v2136_v57  ;;  %3164 = vmatpush.bf16.msrb.mxu0 %v7028_v18  ;;  %v7199_v57 = vld [vmem:[%s13147_s4 + $0x7c0] sm:$0xf] }
 0x44e   : > { %v2128_v35 = vmul.f32 %v10893_v2, %v2127_v39  ;;  %v7200_v23 = vor.u32 %v8773_v37, %v7199_v57  ;;  %v7151_v57 = vld [vmem:[%s13147_s4 + $0x760] sm:$0xf]  ;;  %v7228_v37 = vor.u32 %v8778_v46, %v7225_v29  ;;  %v8751_v29 = vld [vmem:[%s13147_s4 + $0x714] sm:$0xf0] }
 0x44f   : > { %v2138_v55 = vmul.f32 %v10901_v6, %v2137_v43 }
 0x450   : > { %v2132_v0 = vsel %vm10961_vm8, %v10893_v2, %v2128_v35  ;;  %2771 = vmatpush.bf16.msrb.mxu2 %v6860_v10  ;;  %3152 = vmatpush.bf16.msra.mxu3 %v7208_v33  ;;  %v6993_v10 = vld [vmem:[%s13147_s4 + $0x628] sm:$0xf0] }
 0x451   : > { %v2142_v2 = vsel %vm10978_vm10, %v10901_v6, %v2138_v55  ;;  %v2143_v12 = vperm.slane %v2132_v0, 0  ;;  %v6788_v6 = vor.u32 %v8796_v63, %v6785_v4  ;;  %v8769_v55 = vld [vmem:[%s13147_s4 + $0x7a4] sm:$0xf0]  ;;  %v6996_v59 = vor.u32 %v8720_v56, %v6993_v10  ;;  %v7175_v63 = vld [vmem:[%s13147_s4 + $0x790] sm:$0xf] }
 0x452   : > { %v2144_v19 = vperm.slane %v2142_v2, 0  ;;  %v7184_v58 = vor.u32 %v8769_v55, %v7183_v54  ;;  %v8767_v0 = vld [vmem:[%s13147_s4 + $0x794] sm:$0xf0]  ;;  %v8718_v4 = vld [vmem:[%s13147_s4 + $0x614] sm:$0xf] }
 0x453   : > { %v2145_v21 = vmul.f32 %v2143_v12, %v10479_v9  ;;  %v8726_v9 = vld [vmem:[%s13147_s4 + $0x654] sm:$0xf]  ;;  %2759 = vmatpush.bf16.msrb.mxu1 %v6788_v6  ;;  %v8747_v6 = vld [vmem:[%s13147_s4 + $0x6f4] sm:$0xf0]  ;;  %v7071_v54 = vld [vmem:[%s13147_s4 + $0x6c0] sm:$0xf] }
 0x454   : > { %v2146_v26 = vmul.f32 %v2144_v19, %v10481_v11  ;;  %v7017_v11 = vld [vmem:[%s13147_s4 + $0x658] sm:$0xf0]  ;;  %2772 = vmatpush.bf16.msrb.mxu2 %v6852_v22  ;;  %3153 = vmatpush.bf16.msra.mxu3 %v7200_v23  ;;  %v7159_v22 = vld [vmem:[%s13147_s4 + $0x770] sm:$0xf]  ;;  %v7152_v23 = vor.u32 %v8761_v62, %v7151_v57  ;;  %v7135_v55 = vld [vmem:[%s13147_s4 + $0x740] sm:$0xf] }
 0x455   : > { %v2153_v28 = vmul.f32 %v2149_v40, %v2145_v21  ;;  %v7020_v36 = vor.u32 %v8726_v9, %v7017_v11  ;;  %v7176_v40 = vor.u32 %v8767_v0, %v7175_v63  ;;  %v6977_v21 = vld [vmem:[%s13147_s4 + $0x608] sm:$0xf0]  ;;  %v8757_v10 = vld [vmem:[%s13147_s4 + $0x744] sm:$0xf0]  ;;  %v8859_v62 = vld [vmem:[%s13147_s4 + $0xa74] sm:$0xf0] }
 0x456   : > { %v2154_v31 = vmul.f32 %v2150_v16, %v2146_v26  ;;  %v7167_v16 = vld [vmem:[%s13147_s4 + $0x780] sm:$0xf]  ;;  %v7136_v0 = vor.u32 %v8757_v10, %v7135_v55  ;;  %v7153_v10 = vld [vmem:[%s13147_s4 + $0x768] sm:$0xf0] }
 0x457   : > { %v2161_v32 = vadd.f32 %v2157_v20, %v2153_v28  ;;  %3165 = vmatpush.bf16.msrb.mxu0 %v7020_v36  ;;  %2786 = vmatmul.bf16.vlgmr.msrb.gmra.mxu3 %v11001_v1  ;;  %v6985_v1 = vld [vmem:[%s13147_s4 + $0x618] sm:$0xf0]  ;;  %v8716_v20 = vld [vmem:[%s13147_s4 + $0x604] sm:$0xf]  ;;  %v7168_v18 = vor.u32 %v8765_v17, %v7167_v16  ;;  %v8745_v36 = vld [vmem:[%s13147_s4 + $0x6e4] sm:$0xf0] }
 0x458   : > { %v2162_v34 = vadd.f32 %v2158_v25, %v2154_v31  ;;  %3154 = vmatpush.bf16.msra.mxu3 %v7192_v50  ;;  %v6988_v15 = vor.u32 %v8718_v4, %v6985_v1  ;;  %v8763_v25 = vld [vmem:[%s13147_s4 + $0x774] sm:$0xf0]  ;;  %v6980_v9 = vor.u32 %v8716_v20, %v6977_v21  ;;  %v7096_v31 = vor.u32 %v8747_v6, %v7095_v13  ;;  %v7127_v1 = vld [vmem:[%s13147_s4 + $0x730] sm:$0xf]  ;;  %v8737_v16 = vld [vmem:[%s13147_s4 + $0x6a4] sm:$0xf0] }
 0x459   : > { %vm2163_vm11 = vcmp.gt.f32.partialorder %v2161_v32, 0.0  ;;  %v2171_v38 = vmul.f32 %v2167_v27, %v2161_v32  ;;  %v7160_v33 = vor.u32 %v8763_v25, %v7159_v22  ;;  %v8739_v4 = vld [vmem:[%s13147_s4 + $0x6b4] sm:$0xf0]  ;;  %v7119_v17 = vld [vmem:[%s13147_s4 + $0x720] sm:$0xf] }
 0x45a   : > { %vm2164_vm12 = vcmp.gt.f32.partialorder %v2162_v34, 0.0  ;;  %v2172_v39 = vmul.f32 %v2168_v30, %v2162_v34  ;;  %v8753_v6 = vld [vmem:[%s13147_s4 + $0x724] sm:$0xf0]  ;;  %v8768_v20 = vld [vmem:[%s13147_s4 + $0x7a4] sm:$0xf] }
 0x45b   : > { %v2173_v41 = vsel %vm2163_vm11, %v2161_v32, %v2171_v38  ;;  %3166 = vmatpush.bf16.msrb.mxu0 %v7012_v52  ;;  %v8759_v52 = vld [vmem:[%s13147_s4 + $0x754] sm:$0xf0]  ;;  %v7185_v21 = vld [vmem:[%s13147_s4 + $0x7a8] sm:$0xf0]  ;;  %v7120_v22 = vor.u32 %v8753_v6, %v7119_v17  ;;  %v7047_v25 = vld [vmem:[%s13147_s4 + $0x690] sm:$0xf] }
 0x45c   : > { %v2174_v43 = vsel %vm2164_vm12, %v2162_v34, %v2172_v39  ;;  %v2177_v44 = vrot.slane %v2173_v41, 7  ;;  %3155 = vmatpush.bf16.msra.mxu3 %v7184_v58  ;;  %v7087_v34 = vld [vmem:[%s13147_s4 + $0x6e0] sm:$0xf]  ;;  %v7217_v39 = vld [vmem:[%s13147_s4 + $0x7e8] sm:$0xf0]  ;;  %v7188_v46 = vor.u32 %v8768_v20, %v7185_v21 }
 0x45d   : > { %v2178_v35 = vrot.slane %v2174_v43, 7  ;;  %v7088_v7 = vor.u32 %v8745_v36, %v7087_v34  ;;  %v7079_v41 = vld [vmem:[%s13147_s4 + $0x6d0] sm:$0xf]  ;;  %v8743_v43 = vld [vmem:[%s13147_s4 + $0x6d4] sm:$0xf0]  ;;  %v7220_v45 = vor.u32 %v8776_v47, %v7217_v39 }
 0x45e   : > { %2181 = vst [vmem:[#allocation2 + $0x8] sm:$0xfe] %v2177_v44  ;;  %v7080_v50 = vor.u32 %v8743_v43, %v7079_v41  ;;  %v8772_v58 = vld [vmem:[%s13147_s4 + $0x7c4] sm:$0xf]  ;;  %v8746_v34 = vld [vmem:[%s13147_s4 + $0x6f4] sm:$0xf] }
 0x45f   : > { %2182 = vst [vmem:[#allocation2 + $0x10] sm:$0xfe] %v2178_v35  ;;  %3167 = vmatpush.bf16.msrb.mxu0 %v7004_v51  ;;  %v7097_v36 = vld [vmem:[%s13147_s4 + $0x6f8] sm:$0xf0]  ;;  %v8764_v39 = vld [vmem:[%s13147_s4 + $0x784] sm:$0xf] }
 0x460   : > { %2183 = vst [vmem:[#allocation2 + $0x28] sm:$0x1] %v2177_v44  ;;  %3156 = vmatpush.bf16.msra.mxu3 %v7176_v40  ;;  %v7143_v44 = vld [vmem:[%s13147_s4 + $0x750] sm:$0xf]  ;;  %v8770_v40 = vld [vmem:[%s13147_s4 + $0x7b4] sm:$0xf] }
 0x461   : > { %2184 = vst [vmem:[#allocation2 + $0x30] sm:$0x1] %v2178_v35  ;;  %v7209_v35 = vld [vmem:[%s13147_s4 + $0x7d8] sm:$0xf0]  ;;  %v7144_v51 = vor.u32 %v8759_v52, %v7143_v44  ;;  %v7543_v43 = vld [vmem:[%s13147_s4 + $0xbf0] sm:$0xf] }
 0x462   : > { %v7212_v56 = vor.u32 %v8774_v48, %v7209_v35  ;;  %v7161_v47 = vld [vmem:[%s13147_s4 + $0x778] sm:$0xf0]  ;;  %v8907_v44 = vld [vmem:[%s13147_s4 + $0xbf4] sm:$0xf0]  ;;  %v8744_v35 = vld [vmem:[%s13147_s4 + $0x6e4] sm:$0xf] }
 0x463   : > { %3168 = vmatpush.bf16.msrb.mxu0 %v6996_v59  ;;  %v7201_v59 = vld [vmem:[%s13147_s4 + $0x7c8] sm:$0xf0]  ;;  %v7527_v17 = vld [vmem:[%s13147_s4 + $0xbd0] sm:$0xf]  ;;  %v7327_v21 = vld [vmem:[%s13147_s4 + $0xa40] sm:$0xf] }
 0x464   : > { %3157 = vmatpush.bf16.msra.mxu3 %v7168_v18  ;;  %v7111_v18 = vld [vmem:[%s13147_s4 + $0x710] sm:$0xf] }
 0x465   : > { %v2259_v3 = vld [vmem:[#allocation2 + $0x8] sm:$0xfe] }
 0x466   : > { %v2260_v5 = vld [vmem:[#allocation2 + $0x10] sm:$0xfe]  ;;  %v2186_v48 = vld [vmem:[#allocation2 + $0x8] sm:$0xff] }
 0x467   : > { %v2263_v8 = vld [vmem:[#allocation2 + $0x28] sm:$0x1]  ;;  %3169 = vmatpush.bf16.msrb.mxu0 %v6988_v15  ;;  %3158 = vmatmul.bf16.vlgmr.msra.gmra.mxu3 %v11163_v49  ;;  %v7055_v15 = vld [vmem:[%s13147_s4 + $0x6a0] sm:$0xf]  ;;  %v2187_v55 = vld [vmem:[#allocation2 + $0x10] sm:$0xff] }
 0x468   : > { %v2267_v2 = vpack.c.bf16 %v2263_v8, %v2259_v3  ;;  %v2264_v12 = vld [vmem:[#allocation2 + $0x30] sm:$0x1]  ;;  %3202 = vmatpush.bf16.msrb.mxu3 %v7228_v37  ;;  %v8755_v8 = vld [vmem:[%s13147_s4 + $0x734] sm:$0xf0]  ;;  %v8762_v37 = vld [vmem:[%s13147_s4 + $0x774] sm:$0xf] }
 0x469   : > { %v2268_v19 = vpack.c.bf16 %v2264_v12, %v2260_v5  ;;  %v7063_v3 = vld [vmem:[%s13147_s4 + $0x6b0] sm:$0xf]  ;;  %v7204_v5 = vor.u32 %v8772_v58, %v7201_v59  ;;  %v7128_v13 = vor.u32 %v8755_v8, %v7127_v1  ;;  %v7164_v14 = vor.u32 %v8762_v37, %v7161_v47  ;;  %v7535_v59 = vld [vmem:[%s13147_s4 + $0xbe0] sm:$0xf] }
 0x46a   : > { %v2345_v24 = vshll.u32 %v2267_v2, 16  ;;  %v2343_v27 = vshrl.u32 %v2267_v2, 16  ;;  %v7193_v2 = vld [vmem:[%s13147_s4 + $0x7b8] sm:$0xf0]  ;;  %v7064_v12 = vor.u32 %v8739_v4, %v7063_v3  ;;  %v7544_v58 = vor.u32 %v8907_v44, %v7543_v43  ;;  %v7335_v1 = vld [vmem:[%s13147_s4 + $0xa50] sm:$0xf] }
 0x46b   : > { %v2352_v26 = vshll.u32 %v2268_v19, 16  ;;  %v2350_v11 = vshrl.u32 %v2268_v19, 16  ;;  %3170 = vmatpush.bf16.msrb.mxu0 %v6980_v9  ;;  %v7196_v19 = vor.u32 %v8770_v40, %v7193_v2  ;;  %v11305_v3 = vpack.c.bf16 %v2186_v48, %v2186_v48  ;;  %v8742_v40 = vld [vmem:[%s13147_s4 + $0x6d4] sm:$0xf]  ;;  %v7081_v2 = vld [vmem:[%s13147_s4 + $0x6d8] sm:$0xf0] }
 0x46c   : > { %v2347_v28 = vrot.slane %v2345_v24, 1  ;;  %3203 = vmatpush.bf16.msrb.mxu3 %v7220_v45  ;;  %v7056_v24 = vor.u32 %v8737_v16, %v7055_v15  ;;  %v7100_v45 = vor.u32 %v8746_v34, %v7097_v36  ;;  %v7145_v15 = vld [vmem:[%s13147_s4 + $0x758] sm:$0xf0]  ;;  %v7084_v20 = vor.u32 %v8742_v40, %v7081_v2  ;;  %v8754_v34 = vld [vmem:[%s13147_s4 + $0x734] sm:$0xf] }
 0x46d   : > { %v2354_v30 = vrot.slane %v2352_v26, 1  ;;  %v8735_v26 = vld [vmem:[%s13147_s4 + $0x694] sm:$0xf0]  ;;  %v7129_v36 = vld [vmem:[%s13147_s4 + $0x738] sm:$0xf0] }
 0x46e   : > { %v11123_v32 = vor.u32 %v2347_v28, %v2343_v27  ;;  %3171 = vmatmul.bf16.vlgmr.msrb.gmra.mxu0 %v11053_v42  ;;  %v8741_v42 = vld [vmem:[%s13147_s4 + $0x6c4] sm:$0xf0]  ;;  %v8766_v27 = vld [vmem:[%s13147_s4 + $0x794] sm:$0xf]  ;;  %v7177_v28 = vld [vmem:[%s13147_s4 + $0x798] sm:$0xf0]  ;;  %v7048_v9 = vor.u32 %v8735_v26, %v7047_v25 }
 0x46f   : > { %v2355_v38 = vor.u32 %v2354_v30, %v2350_v11  ;;  %v7072_v63 = vor.u32 %v8741_v42, %v7071_v54  ;;  %v7039_v11 = vld [vmem:[%s13147_s4 + $0x680] sm:$0xf]  ;;  %v8733_v30 = vld [vmem:[%s13147_s4 + $0x684] sm:$0xf0]  ;;  %v7180_v57 = vor.u32 %v8766_v27, %v7177_v28  ;;  %v8740_v25 = vld [vmem:[%s13147_s4 + $0x6c4] sm:$0xf] }
 0x470   : > { %2708 = vmatmul.bf16.vlgmr.msra.gmra.mxu1 %v11123_v32  ;;  %3204 = vmatpush.bf16.msrb.mxu3 %v7212_v56  ;;  %v7343_v54 = vld [vmem:[%s13147_s4 + $0xa60] sm:$0xf]  ;;  %v8857_v42 = vld [vmem:[%s13147_s4 + $0xa64] sm:$0xf0]  ;;  %v8760_v56 = vld [vmem:[%s13147_s4 + $0x764] sm:$0xf] }
 0x471   : > { %2721 = vmatmul.bf16.vlgmr.msra.gmra.mxu2 %v2355_v38  ;;  %3124 = vmatpush.bf16.msra.mxu1 %v7096_v31  ;;  %v7103_v31 = vld [vmem:[%s13147_s4 + $0x700] sm:$0xf]  ;;  %v7156_v8 = vor.u32 %v8760_v56, %v7153_v10  ;;  %v7073_v26 = vld [vmem:[%s13147_s4 + $0x6c8] sm:$0xf0]  ;;  %v8901_v27 = vld [vmem:[%s13147_s4 + $0xbc4] sm:$0xf0] }
 0x472   : > { %3137 = vmatpush.bf16.msra.mxu2 %v7160_v33  ;;  %v8749_v33 = vld [vmem:[%s13147_s4 + $0x704] sm:$0xf0]  ;;  %v7511_v37 = vld [vmem:[%s13147_s4 + $0xbb0] sm:$0xf]  ;;  %v7057_v43 = vld [vmem:[%s13147_s4 + $0x6a8] sm:$0xf0] }
 0x473   : > { %v7104_v52 = vor.u32 %v8749_v33, %v7103_v31  ;;  %v7065_v33 = vld [vmem:[%s13147_s4 + $0x6b8] sm:$0xf0]  ;;  %v8752_v44 = vld [vmem:[%s13147_s4 + $0x724] sm:$0xf]  ;;  %v7503_v48 = vld [vmem:[%s13147_s4 + $0xba0] sm:$0xf] }
 0x474   : > { %3205 = vmatpush.bf16.msrb.mxu3 %v7204_v5  ;;  %v11310_v5 = vpack.c.bf16 %v2187_v55, %v2187_v55  ;;  %v8734_v55 = vld [vmem:[%s13147_s4 + $0x694] sm:$0xf]  ;;  %v7049_v56 = vld [vmem:[%s13147_s4 + $0x698] sm:$0xf0]  ;;  %v8748_v2 = vld [vmem:[%s13147_s4 + $0x704] sm:$0xf] }
 0x475   : > { %3125 = vmatpush.bf16.msra.mxu1 %v7088_v7  ;;  %v7169_v7 = vld [vmem:[%s13147_s4 + $0x788] sm:$0xf0]  ;;  %v8750_v10 = vld [vmem:[%s13147_s4 + $0x714] sm:$0xf]  ;;  %v7052_v40 = vor.u32 %v8734_v55, %v7049_v56  ;;  %v7529_v56 = vld [vmem:[%s13147_s4 + $0xbd8] sm:$0xf0] }
 0x476   : > { %3138 = vmatpush.bf16.msra.mxu2 %v7152_v23  ;;  %v7040_v23 = vor.u32 %v8733_v30, %v7039_v11  ;;  %v7319_v11 = vld [vmem:[%s13147_s4 + $0xa30] sm:$0xf]  ;;  %v8851_v30 = vld [vmem:[%s13147_s4 + $0xa34] sm:$0xf0] }
 0x478   : > { %3206 = vmatpush.bf16.msrb.mxu3 %v7196_v19  ;;  %v8903_v19 = vld [vmem:[%s13147_s4 + $0xbd4] sm:$0xf0] }
 0x479   : > { %3126 = vmatpush.bf16.msra.mxu1 %v7080_v50  ;;  %v7089_v50 = vld [vmem:[%s13147_s4 + $0x6e8] sm:$0xf0] }
 0x47a   : > { %3139 = vmatpush.bf16.msra.mxu2 %v7144_v51  ;;  %v7172_v51 = vor.u32 %v8764_v39, %v7169_v7  ;;  %v7092_v4 = vor.u32 %v8744_v35, %v7089_v50  ;;  %v7311_v39 = vld [vmem:[%s13147_s4 + $0xa20] sm:$0xf]  ;;  %v8849_v7 = vld [vmem:[%s13147_s4 + $0xa24] sm:$0xf0] }
 0x47b   : > { %v8897_v35 = vld [vmem:[%s13147_s4 + $0xba4] sm:$0xf0] }
 0x47c   : > { %3207 = vmatpush.bf16.msrb.mxu3 %v7188_v46  ;;  %v7528_v46 = vor.u32 %v8903_v19, %v7527_v17  ;;  %v7415_v17 = vld [vmem:[%s13147_s4 + $0xaf0] sm:$0xf]  ;;  %v8875_v19 = vld [vmem:[%s13147_s4 + $0xaf4] sm:$0xf0] }
 0x47d   : > { %3127 = vmatpush.bf16.msra.mxu1 %v7072_v63  ;;  %v8905_v63 = vld [vmem:[%s13147_s4 + $0xbe4] sm:$0xf0] }
 0x47e   : > { %3140 = vmatpush.bf16.msra.mxu2 %v7136_v0  ;;  %v7344_v0 = vor.u32 %v8857_v42, %v7343_v54  ;;  %v7536_v16 = vor.u32 %v8905_v63, %v7535_v59  ;;  %v8847_v54 = vld [vmem:[%s13147_s4 + $0xa14] sm:$0xf0]  ;;  %v7504_v59 = vor.u32 %v8897_v35, %v7503_v48  ;;  %v8732_v63 = vld [vmem:[%s13147_s4 + $0x684] sm:$0xf]  ;;  %v8854_v35 = vld [vmem:[%s13147_s4 + $0xa54] sm:$0xf] }
 0x47f   : > { %v3222_v48 = vld [vmem:[#allocation2 + $0x38] sm:$0x3] }
 0x480   : > { %2760 = vmatmul.bf16.vlgmr.msrb.gmra.mxu1 %v11123_v32  ;;  %v7112_v32 = vor.u32 %v8751_v29, %v7111_v18  ;;  %3208 = vmatpush.bf16.msrb.mxu3 %v7180_v57  ;;  %v7137_v18 = vld [vmem:[%s13147_s4 + $0x748] sm:$0xf0]  ;;  %v7519_v29 = vld [vmem:[%s13147_s4 + $0xbc0] sm:$0xf] }
 0x481   : > { %2773 = vmatmul.bf16.vlgmr.msrb.gmra.mxu2 %v2355_v38  ;;  %3128 = vmatpush.bf16.msra.mxu1 %v7064_v12  ;;  %v7351_v38 = vld [vmem:[%s13147_s4 + $0xa70] sm:$0xf]  ;;  %v8855_v12 = vld [vmem:[%s13147_s4 + $0xa54] sm:$0xf0]  ;;  %v7520_v57 = vor.u32 %v8901_v27, %v7519_v29  ;;  %v7545_v29 = vld [vmem:[%s13147_s4 + $0xbf8] sm:$0xf0] }
 0x482   : > { %3141 = vmatpush.bf16.msra.mxu2 %v7128_v13  ;;  %v7352_v41 = vor.u32 %v8859_v62, %v7351_v38  ;;  %v8758_v13 = vld [vmem:[%s13147_s4 + $0x754] sm:$0xf]  ;;  %v7336_v6 = vor.u32 %v8855_v12, %v7335_v1  ;;  %v8899_v38 = vld [vmem:[%s13147_s4 + $0xbb4] sm:$0xf0]  ;;  %v7320_v62 = vor.u32 %v8851_v30, %v7319_v11  ;;  %v7295_v12 = vld [vmem:[%s13147_s4 + $0xa00] sm:$0xf] }
 0x483   : > { %v8895_v1 = vld [vmem:[%s13147_s4 + $0xb94] sm:$0xf0]  ;;  %v7407_v11 = vld [vmem:[%s13147_s4 + $0xae0] sm:$0xf] }
 0x484   : > { %3624 = vmatpush.bf16.msra.mxu0 %v7352_v41  ;;  %3209 = vmatpush.bf16.msrb.mxu3 %v7172_v51  ;;  %v7132_v41 = vor.u32 %v8754_v34, %v7129_v36  ;;  %v7303_v51 = vld [vmem:[%s13147_s4 + $0xa10] sm:$0xf]  ;;  %v7345_v34 = vld [vmem:[%s13147_s4 + $0xa68] sm:$0xf0]  ;;  %v7471_v36 = vld [vmem:[%s13147_s4 + $0xb60] sm:$0xf] }
 0x485   : > { %3129 = vmatpush.bf16.msra.mxu1 %v7056_v24  ;;  %v8853_v24 = vld [vmem:[%s13147_s4 + $0xa44] sm:$0xf0] }
 0x486   : > { %3142 = vmatpush.bf16.msra.mxu2 %v7120_v22  ;;  %v7148_v22 = vor.u32 %v8758_v13, %v7145_v15  ;;  %v7328_v28 = vor.u32 %v8853_v24, %v7327_v21  ;;  %v8845_v13 = vld [vmem:[%s13147_s4 + $0xa04] sm:$0xf0]  ;;  %v8858_v21 = vld [vmem:[%s13147_s4 + $0xa74] sm:$0xf]  ;;  %v7353_v24 = vld [vmem:[%s13147_s4 + $0xa78] sm:$0xf0] }
 0x487   : > { %3210 = vmatmul.bf16.vlgmr.msrb.gmra.mxu3 %v11163_v49  ;;  %v8756_v49 = vld [vmem:[%s13147_s4 + $0x744] sm:$0xf]  ;;  %v7356_v27 = vor.u32 %v8858_v21, %v7353_v24  ;;  %v8867_v21 = vld [vmem:[%s13147_s4 + $0xab4] sm:$0xf0]  ;;  %v7447_v24 = vld [vmem:[%s13147_s4 + $0xb30] sm:$0xf] }
 0x488   : > { %3663 = vmatpush.bf16.msra.mxu3 %v7544_v58  ;;  %3625 = vmatpush.bf16.msra.mxu0 %v7344_v0  ;;  %v7140_v31 = vor.u32 %v8756_v49, %v7137_v18  ;;  %v7113_v58 = vld [vmem:[%s13147_s4 + $0x718] sm:$0xf0]  ;;  %v7041_v0 = vld [vmem:[%s13147_s4 + $0x688] sm:$0xf0]  ;;  %v7296_v49 = vor.u32 %v8845_v13, %v7295_v12  ;;  %v8900_v12 = vld [vmem:[%s13147_s4 + $0xbc4] sm:$0xf] }
 0x489   : > { %3130 = vmatpush.bf16.msra.mxu1 %v7048_v9  ;;  %v7076_v9 = vor.u32 %v8740_v25, %v7073_v26  ;;  %v7116_v15 = vor.u32 %v8750_v10, %v7113_v58  ;;  %v7487_v25 = vld [vmem:[%s13147_s4 + $0xb80] sm:$0xf]  ;;  %v8893_v26 = vld [vmem:[%s13147_s4 + $0xb84] sm:$0xf0]  ;;  %v7044_v18 = vor.u32 %v8732_v63, %v7041_v0  ;;  %v7521_v13 = vld [vmem:[%s13147_s4 + $0xbc8] sm:$0xf0] }
 0x48a   : > { %3143 = vmatpush.bf16.msra.mxu2 %v7112_v32  ;;  %v8738_v32 = vld [vmem:[%s13147_s4 + $0x6b4] sm:$0xf]  ;;  %v7391_v0 = vld [vmem:[%s13147_s4 + $0xac0] sm:$0xf] }
 0x48b   : > { %v7068_v47 = vor.u32 %v8738_v32, %v7065_v33  ;;  %v7488_v32 = vor.u32 %v8893_v26, %v7487_v25  ;;  %v8856_v33 = vld [vmem:[%s13147_s4 + $0xa64] sm:$0xf]  ;;  %v7524_v25 = vor.u32 %v8900_v12, %v7521_v13  ;;  %v11578_v26 = vpop.f32.mrf.mxu0  ;;  %v7489_v12 = vld [vmem:[%s13147_s4 + $0xb88] sm:$0xf0] }
 0x48c   : > { %3664 = vmatpush.bf16.msra.mxu3 %v7536_v16  ;;  %3626 = vmatpush.bf16.msra.mxu0 %v7336_v6  ;;  %v7105_v16 = vld [vmem:[%s13147_s4 + $0x708] sm:$0xf0]  ;;  %v7479_v6 = vld [vmem:[%s13147_s4 + $0xb70] sm:$0xf] }
 0x48d   : > { %3131 = vmatpush.bf16.msra.mxu1 %v7040_v23  ;;  %v8736_v23 = vld [vmem:[%s13147_s4 + $0x6a4] sm:$0xf] }
 0x48e   : > { %3144 = vmatpush.bf16.msra.mxu2 %v7104_v52  ;;  %v7121_v52 = vld [vmem:[%s13147_s4 + $0x728] sm:$0xf0]  ;;  %v7060_v50 = vor.u32 %v8736_v23, %v7057_v43  ;;  %v7399_v23 = vld [vmem:[%s13147_s4 + $0xad0] sm:$0xf]  ;;  %v8871_v43 = vld [vmem:[%s13147_s4 + $0xad4] sm:$0xf0] }
 0x48f   : > { %v7124_v42 = vor.u32 %v8752_v44, %v7121_v52  ;;  %v3218_v52 = vld [vmem:[#allocation2 + $0x18] sm:$0xfc]  ;;  %v7400_v58 = vor.u32 %v8871_v43, %v7399_v23 }
 0x490   : > { %3132 = vmatmul.bf16.vlgmr.msra.gmra.mxu1 %v11305_v3  ;;  %3665 = vmatpush.bf16.msra.mxu3 %v7528_v46  ;;  %v8906_v46 = vld [vmem:[%s13147_s4 + $0xbf4] sm:$0xf]  ;;  %v3226_v55 = vpack.c.bf16 %v3222_v48, %v3218_v52  ;;  %v8879_v23 = vld [vmem:[%s13147_s4 + $0xb14] sm:$0xf0] }
 0x491   : > { %3176 = vmatpush.bf16.msrb.mxu1 %v7100_v45  ;;  %3145 = vmatmul.bf16.vlgmr.msra.gmra.mxu2 %v11310_v5  ;;  %v7512_v45 = vor.u32 %v8899_v38, %v7511_v37  ;;  %v7548_v37 = vor.u32 %v8906_v46, %v7545_v29  ;;  %v8904_v38 = vld [vmem:[%s13147_s4 + $0xbe4] sm:$0xf]  ;;  %v8894_v52 = vld [vmem:[%s13147_s4 + $0xb94] sm:$0xf] }
 0x492   : > { %3189 = vmatpush.bf16.msrb.mxu2 %v7164_v14  ;;  %3627 = vmatpush.bf16.msra.mxu0 %v7328_v28  ;;  %v7312_v14 = vor.u32 %v8849_v7, %v7311_v39  ;;  %v7108_v28 = vor.u32 %v8748_v2, %v7105_v16  ;;  %v3215_v39 = vld [vmem:[#allocation2] sm:$0xfc]  ;;  %v3219_v7 = vld [vmem:[#allocation2 + $0x20] sm:$0x3] }
 0x493   : > { %v3223_v44 = vpack.c.bf16 %v3219_v7, %v3215_v39  ;;  %v7367_v39 = vld [vmem:[%s13147_s4 + $0xa90] sm:$0xf]  ;;  %v8863_v7 = vld [vmem:[%s13147_s4 + $0xa94] sm:$0xf0] }
 0x494   : > { %3666 = vmatpush.bf16.msra.mxu3 %v7520_v57  ;;  %v8889_v57 = vld [vmem:[%s13147_s4 + $0xb64] sm:$0xf0] }
 0x495   : > { %3177 = vmatpush.bf16.msrb.mxu1 %v7092_v4  ;;  %v7495_v4 = vld [vmem:[%s13147_s4 + $0xb90] sm:$0xf] }
 0x496   : > { %3190 = vmatpush.bf16.msrb.mxu2 %v7156_v8  ;;  %3628 = vmatpush.bf16.msra.mxu0 %v7320_v62  ;;  %v7304_v8 = vor.u32 %v8847_v54, %v7303_v51  ;;  %v7537_v62 = vld [vmem:[%s13147_s4 + $0xbe8] sm:$0xf0]  ;;  %v8887_v51 = vld [vmem:[%s13147_s4 + $0xb54] sm:$0xf0] }
 0x497   : > { %v7540_v54 = vor.u32 %v8904_v38, %v7537_v62  ;;  %v8846_v38 = vld [vmem:[%s13147_s4 + $0xa14] sm:$0xf]  ;;  %v7305_v62 = vld [vmem:[%s13147_s4 + $0xa18] sm:$0xf0] }
 0x498   : > { %3667 = vmatpush.bf16.msra.mxu3 %v7512_v45  ;;  %v7472_v45 = vor.u32 %v8889_v57, %v7471_v36  ;;  %v7505_v36 = vld [vmem:[%s13147_s4 + $0xba8] sm:$0xf0]  ;;  %v7308_v48 = vor.u32 %v8846_v38, %v7305_v62  ;;  %v8866_v62 = vld [vmem:[%s13147_s4 + $0xab4] sm:$0xf] }
 0x499   : > { %3178 = vmatpush.bf16.msrb.mxu1 %v7084_v20  ;;  %v7496_v20 = vor.u32 %v8895_v1, %v7495_v4  ;;  %v8869_v4 = vld [vmem:[%s13147_s4 + $0xac4] sm:$0xf0]  ;;  %v7329_v1 = vld [vmem:[%s13147_s4 + $0xa48] sm:$0xf0] }
 0x49a   : > { %3191 = vmatpush.bf16.msrb.mxu2 %v7148_v22  ;;  %3629 = vmatpush.bf16.msra.mxu0 %v7312_v14  ;;  %v8891_v22 = vld [vmem:[%s13147_s4 + $0xb74] sm:$0xf0]  ;;  %v7337_v14 = vld [vmem:[%s13147_s4 + $0xa58] sm:$0xf0]  ;;  %v7392_v16 = vor.u32 %v8869_v4, %v7391_v0  ;;  %v8874_v0 = vld [vmem:[%s13147_s4 + $0xaf4] sm:$0xf] }
 0x49b   : > { %v7480_v30 = vor.u32 %v8891_v22, %v7479_v6  ;;  %v7340_v10 = vor.u32 %v8854_v35, %v7337_v14  ;;  %v8883_v22 = vld [vmem:[%s13147_s4 + $0xb34] sm:$0xf0]  ;;  %v7368_v35 = vor.u32 %v8863_v7, %v7367_v39  ;;  %v7359_v14 = vld [vmem:[%s13147_s4 + $0xa80] sm:$0xf]  ;;  %v7417_v4 = vld [vmem:[%s13147_s4 + $0xaf8] sm:$0xf0] }
 0x49c   : > { %3668 = vmatpush.bf16.msra.mxu3 %v7504_v59  ;;  %v11533_v59 = vrot.slane %v3226_v55, 1  ;;  %v7297_v55 = vld [vmem:[%s13147_s4 + $0xa08] sm:$0xf0]  ;;  %v8882_v39 = vld [vmem:[%s13147_s4 + $0xb34] sm:$0xf] }
 0x49d   : > { %3179 = vmatpush.bf16.msrb.mxu1 %v7076_v9  ;;  %v7416_v9 = vor.u32 %v8875_v19, %v7415_v17  ;;  %v8850_v17 = vld [vmem:[%s13147_s4 + $0xa34] sm:$0xf]  ;;  %v7321_v19 = vld [vmem:[%s13147_s4 + $0xa38] sm:$0xf0] }
 0x49e   : > { %3192 = vmatpush.bf16.msrb.mxu2 %v7140_v31  ;;  %3630 = vmatpush.bf16.msra.mxu0 %v7304_v8  ;;  %v8873_v31 = vld [vmem:[%s13147_s4 + $0xae4] sm:$0xf0]  ;;  %v7455_v8 = vld [vmem:[%s13147_s4 + $0xb40] sm:$0xf]  ;;  %v7324_v46 = vor.u32 %v8850_v17, %v7321_v19  ;;  %v7420_v17 = vor.u32 %v8874_v0, %v7417_v4  ;;  %v7449_v7 = vld [vmem:[%s13147_s4 + $0xb38] sm:$0xf0] }
 0x49f   : > { %v8876_v0 = vld [vmem:[%s13147_s4 + $0xb04] sm:$0xf]  ;;  %v7425_v4 = vld [vmem:[%s13147_s4 + $0xb08] sm:$0xf0] }
 0x4a0   : > { %3669 = vmatpush.bf16.msra.mxu3 %v7496_v20  ;;  %v7383_v20 = vld [vmem:[%s13147_s4 + $0xab0] sm:$0xf] }
 0x4a1   : > { %3180 = vmatpush.bf16.msrb.mxu1 %v7068_v47  ;;  %v7348_v47 = vor.u32 %v8856_v33, %v7345_v34  ;;  %v7384_v29 = vor.u32 %v8867_v21, %v7383_v20  ;;  %v8896_v34 = vld [vmem:[%s13147_s4 + $0xba4] sm:$0xf] }
 0x4a2   : > { %3193 = vmatpush.bf16.msrb.mxu2 %v7132_v41  ;;  %3631 = vmatpush.bf16.msra.mxu0 %v7296_v49  ;;  %v7408_v41 = vor.u32 %v8873_v31, %v7407_v11  ;;  %v8898_v49 = vld [vmem:[%s13147_s4 + $0xbb4] sm:$0xf]  ;;  %v7375_v11 = vld [vmem:[%s13147_s4 + $0xaa0] sm:$0xf]  ;;  %v7508_v43 = vor.u32 %v8896_v34, %v7505_v36  ;;  %v8872_v21 = vld [vmem:[%s13147_s4 + $0xae4] sm:$0xf] }
 0x4a3   : > { %v7439_v31 = vld [vmem:[%s13147_s4 + $0xb20] sm:$0xf]  ;;  %v8868_v34 = vld [vmem:[%s13147_s4 + $0xac4] sm:$0xf]  ;;  %v7393_v36 = vld [vmem:[%s13147_s4 + $0xac8] sm:$0xf0] }
 0x4a4   : > { %3670 = vmatpush.bf16.msra.mxu3 %v7488_v32  ;;  %v8881_v32 = vld [vmem:[%s13147_s4 + $0xb24] sm:$0xf0] }
 0x4a5   : > { %3181 = vmatpush.bf16.msrb.mxu1 %v7060_v50  ;;  %v7463_v50 = vld [vmem:[%s13147_s4 + $0xb50] sm:$0xf] }
 0x4a6   : > { %3194 = vmatpush.bf16.msrb.mxu2 %v7124_v42  ;;  %3676 = vmatpush.bf16.msrb.mxu0 %v7356_v27  ;;  %v11523_v42 = vrot.slane %v3223_v44, 1  ;;  %v7464_v63 = vor.u32 %v8887_v51, %v7463_v50  ;;  %v8848_v27 = vld [vmem:[%s13147_s4 + $0xa24] sm:$0xf]  ;;  %v2698_v44 = vpop.f32.mrf.mxu0  ;;  %v3216_v50 = vld [vmem:[#allocation2 + $0x8] sm:$0xfc] }
 0x4a7   : > { %3671 = vmatmul.bf16.vlgmr.msra.gmra.mxu3 %v11533_v59  ;;  %v3220_v51 = vld [vmem:[#allocation2 + $0x28] sm:$0x3]  ;;  %v7377_v44 = vld [vmem:[%s13147_s4 + $0xaa8] sm:$0xf0] }
 0x4a8   : > { %3715 = vmatpush.bf16.msrb.mxu3 %v7548_v37  ;;  %3632 = vmatmul.bf16.vlgmr.msra.gmra.mxu0 %v11523_v42  ;;  %v3224_v19 = vpack.c.bf16 %v3220_v51, %v3216_v50  ;;  %v8862_v50 = vld [vmem:[%s13147_s4 + $0xa94] sm:$0xf]  ;;  %v7369_v51 = vld [vmem:[%s13147_s4 + $0xa98] sm:$0xf0] }
 0x4a9   : > { %3182 = vmatpush.bf16.msrb.mxu1 %v7052_v40  ;;  %v8885_v40 = vld [vmem:[%s13147_s4 + $0xb44] sm:$0xf0] }
 0x4aa   : > { %3195 = vmatpush.bf16.msrb.mxu2 %v7116_v15  ;;  %3677 = vmatpush.bf16.msrb.mxu0 %v7348_v47  ;;  %v7456_v6 = vor.u32 %v8885_v40, %v7455_v8  ;;  %v7440_v47 = vor.u32 %v8881_v32, %v7439_v31  ;;  %v7481_v40 = vld [vmem:[%s13147_s4 + $0xb78] sm:$0xf0] }
 0x4ab   : > { %v7465_v31 = vld [vmem:[%s13147_s4 + $0xb58] sm:$0xf0] }
 0x4ac   : > { %3716 = vmatpush.bf16.msrb.mxu3 %v7540_v54  ;;  %v8844_v54 = vld [vmem:[%s13147_s4 + $0xa04] sm:$0xf] }
 0x4ad   : > { %3183 = vmatpush.bf16.msrb.mxu1 %v7044_v18  ;;  %v7513_v18 = vld [vmem:[%s13147_s4 + $0xbb8] sm:$0xf0]  ;;  %v7300_v13 = vor.u32 %v8844_v54, %v7297_v55  ;;  %v8878_v54 = vld [vmem:[%s13147_s4 + $0xb14] sm:$0xf] }
 0x4ae   : > { %3196 = vmatpush.bf16.msrb.mxu2 %v7108_v28  ;;  %3678 = vmatpush.bf16.msrb.mxu0 %v7340_v10  ;;  %v7313_v28 = vld [vmem:[%s13147_s4 + $0xa28] sm:$0xf0]  ;;  %v7516_v33 = vor.u32 %v8898_v49, %v7513_v18  ;;  %v7423_v10 = vld [vmem:[%s13147_s4 + $0xb00] sm:$0xf]  ;;  %v11682_v18 = vrot.slane %v3224_v19, 1 }
 0x4af   : > { %v7316_v57 = vor.u32 %v8848_v27, %v7313_v28  ;;  %v7473_v49 = vld [vmem:[%s13147_s4 + $0xb68] sm:$0xf0]  ;;  %v7433_v55 = vld [vmem:[%s13147_s4 + $0xb18] sm:$0xf0] }
 0x4b0   : > { %3184 = vmatmul.bf16.vlgmr.msrb.gmra.mxu1 %v11305_v3  ;;  %v8902_v3 = vld [vmem:[%s13147_s4 + $0xbd4] sm:$0xf] }
 0x4b1   : > { %3637 = vmatpush.bf16.msra.mxu1 %v7416_v9  ;;  %3197 = vmatmul.bf16.vlgmr.msrb.gmra.mxu2 %v11310_v5  ;;  %v8852_v5 = vld [vmem:[%s13147_s4 + $0xa44] sm:$0xf]  ;;  %v7532_v2 = vor.u32 %v8902_v3, %v7529_v56  ;;  %v7448_v9 = vor.u32 %v8883_v22, %v7447_v24  ;;  %v8861_v56 = vld [vmem:[%s13147_s4 + $0xa84] sm:$0xf0]  ;;  %v7409_v24 = vld [vmem:[%s13147_s4 + $0xae8] sm:$0xf0] }
 0x4b2   : > { %3650 = vmatpush.bf16.msra.mxu2 %v7480_v30  ;;  %v7332_v15 = vor.u32 %v8852_v5, %v7329_v1  ;;  %v8865_v30 = vld [vmem:[%s13147_s4 + $0xaa4] sm:$0xf0]  ;;  %v3217_v5 = vld [vmem:[#allocation2 + $0x10] sm:$0xfc] }
 0x4b3   : > { %3717 = vmatpush.bf16.msrb.mxu3 %v7532_v2  ;;  %v7376_v37 = vor.u32 %v8865_v30, %v7375_v11  ;;  %v8890_v1 = vld [vmem:[%s13147_s4 + $0xb74] sm:$0xf]  ;;  %v8892_v2 = vld [vmem:[%s13147_s4 + $0xb84] sm:$0xf]  ;;  %v7401_v11 = vld [vmem:[%s13147_s4 + $0xad8] sm:$0xf0] }
 0x4b4   : > { %3679 = vmatpush.bf16.msrb.mxu0 %v7332_v15  ;;  %v7360_v15 = vor.u32 %v8861_v56, %v7359_v14  ;;  %v7492_v22 = vor.u32 %v8892_v2, %v7489_v12  ;;  %v8886_v30 = vld [vmem:[%s13147_s4 + $0xb54] sm:$0xf]  ;;  %v7372_v56 = vor.u32 %v8862_v50, %v7369_v51  ;;  %v7549_v50 = vld [vmem:[%s13148_s5 + $0x2] sm:$0x3] }
 0x4b5   : > { %3638 = vmatpush.bf16.msra.mxu1 %v7408_v41  ;;  %v7431_v41 = vld [vmem:[%s13147_s4 + $0xb10] sm:$0xf] }
 0x4b6   : > { %3651 = vmatpush.bf16.msra.mxu2 %v7472_v45  ;;  %v7497_v45 = vld [vmem:[%s13147_s4 + $0xb98] sm:$0xf0]  ;;  %v7432_v3 = vor.u32 %v8879_v23, %v7431_v41  ;;  %v7452_v23 = vor.u32 %v8882_v39, %v7449_v7 }
 0x4b7   : > { %3718 = vmatpush.bf16.msrb.mxu3 %v7524_v25  ;;  %v7500_v8 = vor.u32 %v8894_v52, %v7497_v45  ;;  %v8888_v25 = vld [vmem:[%s13147_s4 + $0xb64] sm:$0xf] }
 0x4b8   : > { %3680 = vmatpush.bf16.msrb.mxu0 %v7324_v46  ;;  %v7412_v46 = vor.u32 %v8872_v21, %v7409_v24  ;;  %v7476_v28 = vor.u32 %v8888_v25, %v7473_v49  ;;  %v8880_v45 = vld [vmem:[%s13147_s4 + $0xb24] sm:$0xf] }
 0x4b9   : > { %3639 = vmatpush.bf16.msra.mxu1 %v7400_v58  ;;  %v8877_v58 = vld [vmem:[%s13147_s4 + $0xb04] sm:$0xf0] }
 0x4ba   : > { %3652 = vmatpush.bf16.msra.mxu2 %v7464_v63  ;;  %v3221_v63 = vld [vmem:[#allocation2 + $0x30] sm:$0x3] }
 0x4bb   : > { %3719 = vmatpush.bf16.msrb.mxu3 %v7516_v33  ;;  %v3225_v20 = vpack.c.bf16 %v3221_v63, %v3217_v5  ;;  %v7468_v33 = vor.u32 %v8886_v30, %v7465_v31  ;;  %v7361_v5 = vld [vmem:[%s13147_s4 + $0xa88] sm:$0xf0] }
 0x4bc   : > { %3681 = vmatpush.bf16.msrb.mxu0 %v7316_v57  ;;  %v7457_v57 = vld [vmem:[%s13147_s4 + $0xb48] sm:$0xf0] }
 0x4bd   : > { %3640 = vmatpush.bf16.msra.mxu1 %v7392_v16  ;;  %v7424_v16 = vor.u32 %v8877_v58, %v7423_v10  ;;  %v11686_v27 = vrot.slane %v3225_v20, 1  ;;  %v7436_v10 = vor.u32 %v8878_v54, %v7433_v55  ;;  %v8860_v58 = vld [vmem:[%s13147_s4 + $0xa84] sm:$0xf] }
 0x4be   : > { %3653 = vmatpush.bf16.msra.mxu2 %v7456_v6  ;;  %v7484_v6 = vor.u32 %v8890_v1, %v7481_v40  ;;  %v7364_v1 = vor.u32 %v8860_v58, %v7361_v5 }
 0x4bf   : > { %3720 = vmatpush.bf16.msrb.mxu3 %v7508_v43  ;;  %v8864_v43 = vld [vmem:[%s13147_s4 + $0xaa4] sm:$0xf] }
 0x4c0   : > { %3682 = vmatpush.bf16.msrb.mxu0 %v7308_v48  ;;  %v7441_v48 = vld [vmem:[%s13147_s4 + $0xb28] sm:$0xf0] }
 0x4c1   : > { %3641 = vmatpush.bf16.msra.mxu1 %v7384_v29  ;;  %v11684_v29 = vpop.f32.mrf.mxu0  ;;  %v7444_v14 = vor.u32 %v8880_v45, %v7441_v48 }
 0x4c2   : > { %3654 = vmatpush.bf16.msra.mxu2 %v7448_v9  ;;  %v8870_v9 = vld [vmem:[%s13147_s4 + $0xad4] sm:$0xf] }
 0x4c3   : > { %3721 = vmatpush.bf16.msrb.mxu3 %v7500_v8  ;;  %v7404_v32 = vor.u32 %v8870_v9, %v7401_v11  ;;  %v7428_v8 = vor.u32 %v8876_v0, %v7425_v4 }
 0x4c4   : > { %3683 = vmatpush.bf16.msrb.mxu0 %v7300_v13 }
 0x4c5   : > { %3642 = vmatpush.bf16.msra.mxu1 %v7376_v37 }
 0x4c6   : > { %3655 = vmatpush.bf16.msra.mxu2 %v7440_v47  ;;  %v7385_v47 = vld [vmem:[%s13147_s4 + $0xab8] sm:$0xf0] }
 0x4c7   : > { %3722 = vmatpush.bf16.msrb.mxu3 %v7492_v22  ;;  %3684 = vmatmul.bf16.vlgmr.msrb.gmra.mxu0 %v11523_v42  ;;  %v8884_v42 = vld [vmem:[%s13147_s4 + $0xb44] sm:$0xf]  ;;  %v7388_v41 = vor.u32 %v8866_v62, %v7385_v47 }
 0x4c8   : > { %v7460_v38 = vor.u32 %v8884_v42, %v7457_v57 }
 0x4c9   : > { %3643 = vmatpush.bf16.msra.mxu1 %v7368_v35  ;;  %v2750_v37 = vpop.f32.mrf.mxu0  ;;  %v7380_v35 = vor.u32 %v8864_v43, %v7377_v44 }
 0x4ca   : > { %3656 = vmatpush.bf16.msra.mxu2 %v7432_v3  ;;  %3723 = vmatmul.bf16.vlgmr.msrb.gmra.mxu3 %v11533_v59  ;;  %v7396_v59 = vor.u32 %v8868_v34, %v7393_v36  ;;  %v2735_v52 = vpop.f32.mrf.mxu3 }
 0x4cd   : > { %3644 = vmatpush.bf16.msra.mxu1 %v7360_v15 }
 0x4ce   : > { %3657 = vmatpush.bf16.msra.mxu2 %v7424_v16 }
 0x4d0   : > { %3645 = vmatmul.bf16.vlgmr.msra.gmra.mxu1 %v11682_v18 }
 0x4d1   : > { %3689 = vmatpush.bf16.msrb.mxu1 %v7420_v17  ;;  %3658 = vmatmul.bf16.vlgmr.msra.gmra.mxu2 %v11686_v27  ;;  %v3120_v3 = vpop.f32.mrf.mxu0 }
 0x4d2   : > { %3702 = vmatpush.bf16.msrb.mxu2 %v7484_v6  ;;  %v2737_v63 = vpop.f32.mrf.mxu3 }
 0x4d5   : > { %3690 = vmatpush.bf16.msrb.mxu1 %v7412_v46 }
 0x4d6   : > { %3703 = vmatpush.bf16.msrb.mxu2 %v7476_v28 }
 0x4d9   : > { %3691 = vmatpush.bf16.msrb.mxu1 %v7404_v32  ;;  %v3122_v40 = vpop.f32.mrf.mxu0 }
 0x4da   : > { %3704 = vmatpush.bf16.msrb.mxu2 %v7468_v33  ;;  %v2787_v2 = vpop.f32.mrf.mxu3 }
 0x4dd   : > { %3692 = vmatpush.bf16.msrb.mxu1 %v7396_v59 }
 0x4de   : > { %3705 = vmatpush.bf16.msrb.mxu2 %v7460_v38 }
 0x4e1   : > { %3693 = vmatpush.bf16.msrb.mxu1 %v7388_v41 }
 0x4e2   : > { %3706 = vmatpush.bf16.msrb.mxu2 %v7452_v23  ;;  %v2789_v13 = vpop.f32.mrf.mxu3 }
 0x4e5   : > { %3694 = vmatpush.bf16.msrb.mxu1 %v7380_v35 }
 0x4e6   : > { %3707 = vmatpush.bf16.msrb.mxu2 %v7444_v14 }
 0x4e9   : > { %3695 = vmatpush.bf16.msrb.mxu1 %v7372_v56 }
 0x4ea   : > { %3708 = vmatpush.bf16.msrb.mxu2 %v7436_v10  ;;  %v3159_v22 = vpop.f32.mrf.mxu3  ;;  %v3733_v10 = vperm.slane %v7549_v50, 0 }
 0x4eb   : > { %v3172_v16 = vpop.f32.mrf.mxu0 }
 0x4ed   : > { %3696 = vmatpush.bf16.msrb.mxu1 %v7364_v1  ;;  %v2709_v12 = vpop.f32.mrf.mxu1 }
 0x4ee   : > { %3709 = vmatpush.bf16.msrb.mxu2 %v7428_v8  ;;  %v2710_v15 = vadd.f32 %v2709_v12, %v11578_v26 }
 0x4f0   : > { %3697 = vmatmul.bf16.vlgmr.msrb.gmra.mxu1 %v11682_v18 }
 0x4f1   : > { %3710 = vmatmul.bf16.vlgmr.msrb.gmra.mxu2 %v11686_v27 }
 0x4f2   : > { %v3161_v28 = vpop.f32.mrf.mxu3 }
 0x4f3   : > { %v3174_v21 = vpop.f32.mrf.mxu0 }
 0x4f4   : > { %v2722_v17 = vpop.f32.mrf.mxu2 }
 0x4f5   : > { %v2723_v19 = vadd.f32 %v2722_v17, %v2710_v15  ;;  %v2711_v6 = vpop.f32.mrf.mxu1 }
 0x4f7   : > { %v2736_v20 = vadd.f32 %v2735_v52, %v2723_v19 }
 0x4f9   : > { %v3121_v24 = vadd.f32 %v3120_v3, %v2736_v20  ;;  %v3734_v20 = vperm.slane %v7549_v50, 1 }
 0x4fc   : > { %v2724_v25 = vpop.f32.mrf.mxu2 }
 0x4fd   : > { %v2761_v49 = vpop.f32.mrf.mxu1 }
 0x4fe   : > { %v2762_v46 = vadd.f32 %v2761_v49, %v11684_v29 }
 0x504   : > { %v2774_v18 = vpop.f32.mrf.mxu2 }
 0x505   : > { %v2775_v9 = vadd.f32 %v2774_v18, %v2762_v46  ;;  %v2763_v27 = vpop.f32.mrf.mxu1 }
 0x507   : > { %v2788_v11 = vadd.f32 %v2787_v2, %v2775_v9 }
 0x509   : > { %v3173_v30 = vadd.f32 %v3172_v16, %v2788_v11 }
 0x50a   : > { %v3211_v42 = vpop.f32.mrf.mxu3 }
 0x50c   : > { %v2776_v31 = vpop.f32.mrf.mxu2 }
 0x50d   : > { %v3133_v26 = vpop.f32.mrf.mxu1 }
 0x50e   : > { %v3134_v32 = vadd.f32 %v3133_v26, %v3121_v24 }
 0x512   : > { %v3213_v37 = vpop.f32.mrf.mxu3 }
 0x514   : > { %v3146_v33 = vpop.f32.mrf.mxu2 }
 0x515   : > { %v3147_v34 = vadd.f32 %v3146_v33, %v3134_v32  ;;  %v3135_v36 = vpop.f32.mrf.mxu1 }
 0x517   : > { %v3160_v57 = vadd.f32 %v3159_v22, %v3147_v34 }
 0x51c   : > { %v3148_v59 = vpop.f32.mrf.mxu2 }
 0x525   : > { %v3633_v62 = vpop.f32.mrf.mxu0 }
 0x52a   : > { %v3672_v43 = vpop.f32.mrf.mxu3 }
 0x52d   : > { %v3185_v38 = vpop.f32.mrf.mxu1  ;;  %v3635_v23 = vpop.f32.mrf.mxu0 }
 0x52e   : > { %v3186_v47 = vadd.f32 %v3185_v38, %v3173_v30 }
 0x532   : > { %v3674_v52 = vpop.f32.mrf.mxu3 }
 0x534   : > { %v3198_v29 = vpop.f32.mrf.mxu2 }
 0x535   : > { %v3199_v39 = vadd.f32 %v3198_v29, %v3186_v47  ;;  %v3187_v7 = vpop.f32.mrf.mxu1 }
 0x537   : > { %v3212_v41 = vadd.f32 %v3211_v42, %v3199_v39 }
 0x53c   : > { %v3200_v44 = vpop.f32.mrf.mxu2 }
 0x544   : > { %v3685_v48 = vpop.f32.mrf.mxu0 }
 0x54c   : > { %v3687_v3 = vpop.f32.mrf.mxu0 }
 0x54d   : > { %v3646_v45 = vpop.f32.mrf.mxu1  ;;  %v3724_v55 = vpop.f32.mrf.mxu3 }
 0x54e   : > { %v3647_v35 = vadd.f32 %v3646_v45, %v3633_v62 }
 0x554   : > { %v3659_v14 = vpop.f32.mrf.mxu2 }
 0x555   : > { %v3660_v51 = vadd.f32 %v3659_v14, %v3647_v35  ;;  %v3648_v54 = vpop.f32.mrf.mxu1  ;;  %v3726_v4 = vpop.f32.mrf.mxu3 }
 0x557   : > { %v3673_v56 = vadd.f32 %v3672_v43, %v3660_v51 }
 0x559   : > { %v3728_v58 = vadd.f32 %v3673_v56, %v3160_v57 }
 0x55b   : > { %v3737_v5 = vadd.f32 %v3733_v10, %v3728_v58 }
 0x55c   : > { %v3661_v63 = vpop.f32.mrf.mxu2 }
 0x55d   : > { %v3739_v0 = vrot.slane %v3737_v5, 4 }
 0x55f   : > { %v3740_v1 = vadd.f32 %v3739_v0, %v3737_v5 }
 0x561   : > { %v3741_v8 = vrot.slane %v3740_v1, 2 }
 0x563   : > { %v3742_v40 = vadd.f32 %v3741_v8, %v3740_v1 }
 0x565   : > { %v3743_v2 = vrot.slane %v3742_v40, 1 }
 0x567   : > { %v3744_v12 = vadd.f32 %v3743_v2, %v3742_v40 }
 0x569   : > { %3751 = vrot.lane.b32.xlu0 %v3744_v12, %s9134_s14 }
 0x56d   : > { %v3698_v13 = vpop.f32.mrf.mxu1 }
 0x56e   : > { %v3699_v15 = vadd.f32 %v3698_v13, %v3685_v48  ;;  %v7739_v13 = vld [vmem:[%s13147_s4 + $0xe70] sm:$0xf] }
 0x574   : > { %v3711_v16 = vpop.f32.mrf.mxu2 }
 0x575   : > { %v3712_v17 = vadd.f32 %v3711_v16, %v3699_v15  ;;  %v3700_v19 = vpop.f32.mrf.mxu1  ;;  %v8987_v15 = vld [vmem:[%s13147_s4 + $0xe74] sm:$0xf0]  ;;  %v7731_v16 = vld [vmem:[%s13147_s4 + $0xe60] sm:$0xf] }
 0x576   : > { %v8985_v19 = vld [vmem:[%s13147_s4 + $0xe64] sm:$0xf0] }
 0x577   : > { %v3725_v6 = vadd.f32 %v3724_v55, %v3712_v17  ;;  %v7740_v17 = vor.u32 %v8987_v15, %v7739_v13  ;;  %v9017_v13 = vld [vmem:[%s13147_s4 + $0xf64] sm:$0xf0] }
 0x579   : > { %v3729_v21 = vadd.f32 %v3725_v6, %v3212_v41  ;;  %4392 = vmatpush.bf16.msra.mxu0 %v7740_v17  ;;  %v7732_v6 = vor.u32 %v8985_v19, %v7731_v16  ;;  %v7907_v16 = vld [vmem:[%s13147_s4 + $0xfc0] sm:$0xf]  ;;  %v9029_v17 = vld [vmem:[%s13147_s4 + $0xfc4] sm:$0xf0] }
 0x57a   : > { %v7908_v19 = vor.u32 %v9029_v17, %v7907_v16  ;;  %v7933_v17 = vld [vmem:[%s13147_s4 + $0xff8] sm:$0xf0] }
 0x57b   : > { %v3738_v24 = vadd.f32 %v3734_v20, %v3729_v21  ;;  %v7723_v20 = vld [vmem:[%s13147_s4 + $0xe50] sm:$0xf]  ;;  %v8983_v21 = vld [vmem:[%s13147_s4 + $0xe54] sm:$0xf0] }
 0x57c   : > { %v3713_v22 = vpop.f32.mrf.mxu2 }
 0x57d   : > { %v3745_v25 = vrot.slane %v3738_v24, 4  ;;  %4393 = vmatpush.bf16.msra.mxu0 %v7732_v6  ;;  %v7715_v22 = vld [vmem:[%s13147_s4 + $0xe40] sm:$0xf]  ;;  %v8980_v6 = vld [vmem:[%s13147_s4 + $0xe44] sm:$0xf] }
 0x57f   : > { %v3746_v49 = vadd.f32 %v3745_v25, %v3738_v24  ;;  %v8981_v25 = vld [vmem:[%s13147_s4 + $0xe44] sm:$0xf0] }
 0x581   : > { %v3747_v46 = vrot.slane %v3746_v49, 2 }
 0x583   : > { %v3748_v28 = vadd.f32 %v3747_v46, %v3746_v49  ;;  %v7716_v49 = vor.u32 %v8981_v25, %v7715_v22  ;;  %v8999_v22 = vld [vmem:[%s13147_s4 + $0xed4] sm:$0xf0]  ;;  %v7851_v25 = vld [vmem:[%s13147_s4 + $0xf50] sm:$0xf] }
 0x585   : > { %v3749_v18 = vrot.slane %v3748_v28, 1 }
 0x587   : > { %v3750_v9 = vadd.f32 %v3749_v18, %v3748_v28 }
 0x589   : > { %3753 = vrot.lane.b32.xlu1 %v3750_v9, %s9134_s14 }
 0x5db   : > { %v3752_v27 = vpop.permute.xlu0 %3751 }
 0x5fb   : > { %v3754_v11 = vpop.permute.xlu1 %3753 }
 0x5fc   : > { %v3755_v30 = vsel %vm2025_vm1, %v3752_v27, %v3754_v11  ;;  %v3756_v31 = vsel %vm2025_vm1, %v3754_v11, %v3752_v27 }
 0x5fd   : > { %v3757_v26 = vadd.f32 %v3756_v31, %v3744_v12  ;;  %v3758_v32 = vadd.f32 %v3755_v30, %v3750_v9  ;;  %v7707_v31 = vld [vmem:[%s13147_s4 + $0xe30] sm:$0xf] }
 0x5ff   : > { %3759 = vrot.lane.b32.xlu2 %v3757_v26, %s9135_s15  ;;  %3761 = vrot.lane.b32.xlu0 %v3758_v32, %s9135_s15 }
 0x659   : > { %v3760_v33 = vpop.permute.xlu2 %3759 }
 0x671   : > { %v3762_v34 = vpop.permute.xlu0 %3761 }
 0x672   : > { %v3763_v36 = vsel %vm2034_vm2, %v3760_v33, %v3762_v34  ;;  %v3764_v42 = vsel %vm2034_vm2, %v3762_v34, %v3760_v33  ;;  %v8977_v34 = vld [vmem:[%s13147_s4 + $0xe24] sm:$0xf0] }
 0x673   : > { %v3765_v57 = vadd.f32 %v3764_v42, %v3757_v26  ;;  %v3766_v59 = vadd.f32 %v3763_v36, %v3758_v32  ;;  %v8979_v26 = vld [vmem:[%s13147_s4 + $0xe34] sm:$0xf0]  ;;  %v7699_v32 = vld [vmem:[%s13147_s4 + $0xe20] sm:$0xf]  ;;  %v7931_v36 = vld [vmem:[%s13147_s4 + $0xff0] sm:$0xf] }
 0x674   : > { %v7708_v33 = vor.u32 %v8979_v26, %v7707_v31  ;;  %v7700_v42 = vor.u32 %v8977_v34, %v7699_v32  ;;  %v7709_v31 = vld [vmem:[%s13147_s4 + $0xe38] sm:$0xf0]  ;;  %v7779_v32 = vld [vmem:[%s13147_s4 + $0xec0] sm:$0xf] }
 0x675   : > { %v3767_v37 = vadd.f32 %v3766_v59, %v3765_v57  ;;  %v7691_v57 = vld [vmem:[%s13147_s4 + $0xe10] sm:$0xf]  ;;  %v9035_v59 = vld [vmem:[%s13147_s4 + $0xff4] sm:$0xf0]  ;;  %v7843_v34 = vld [vmem:[%s13147_s4 + $0xf40] sm:$0xf] }
 0x677   : > { %3770 = vrot.lane.b32.xlu2 %v3767_v37, %s9137_s17  ;;  %3768 = vrot.lane.b32.xlu1 %v3767_v37, %s9136_s16 }
 0x6d1   : > { %v3771_v38 = vpop.permute.xlu2 %3770 }
 0x6e9   : > { %v3769_v62 = vpop.permute.xlu1 %3768 }
 0x6ea   : > { %v3772_v47 = vsel %vm2068_vm3, %v3769_v62, %v3771_v38  ;;  %v3773_v29 = vsel %vm2069_vm4, %v3769_v62, %v3771_v38  ;;  %v7932_v38 = vor.u32 %v9035_v59, %v7931_v36  ;;  %v7923_v62 = vld [vmem:[%s13147_s4 + $0xfe0] sm:$0xf] }
 0x6eb   : > { %v3774_v39 = vadd.f32 %v3772_v47, %v3767_v37  ;;  %v3775_v7 = vadd.f32 %v3773_v29, %v3767_v37  ;;  %v8975_v37 = vld [vmem:[%s13147_s4 + $0xe14] sm:$0xf0]  ;;  %v9033_v47 = vld [vmem:[%s13147_s4 + $0xfe4] sm:$0xf0]  ;;  %v7803_v29 = vld [vmem:[%s13147_s4 + $0xef0] sm:$0xf] }
 0x6ec   : > { %4431 = vmatpush.bf16.msra.mxu3 %v7932_v38  ;;  %v7891_v59 = vld [vmem:[%s13147_s4 + $0xfa0] sm:$0xf] }
 0x6ed   : > { %v3776_v41 = vmul.f32 0.0078125, %v3774_v39  ;;  %v3777_v23 = vmul.f32 0.0078125, %v3775_v7  ;;  %v9003_v39 = vld [vmem:[%s13147_s4 + $0xef4] sm:$0xf0]  ;;  %v7924_v7 = vor.u32 %v9033_v47, %v7923_v62  ;;  %v8976_v62 = vld [vmem:[%s13147_s4 + $0xe24] sm:$0xf] }
 0x6ee   : > { %v7701_v47 = vld [vmem:[%s13147_s4 + $0xe28] sm:$0xf0] }
 0x6ef   : > { %v3778_v43 = vperm.slane %v3776_v41, 0  ;;  %v3779_v44 = vperm.slane %v3777_v23, 0  ;;  %v7804_v41 = vor.u32 %v9003_v39, %v7803_v29  ;;  %v7867_v23 = vld [vmem:[%s13147_s4 + $0xf70] sm:$0xf]  ;;  %v7704_v29 = vor.u32 %v8976_v62, %v7701_v47 }
 0x6f0   : > { %4432 = vmatpush.bf16.msra.mxu3 %v7924_v7  ;;  %v7771_v39 = vld [vmem:[%s13147_s4 + $0xeb0] sm:$0xf]  ;;  %v8995_v7 = vld [vmem:[%s13147_s4 + $0xeb4] sm:$0xf0] }
 0x6f1   : > { %v11789_v52 = vsub.f32 %v3737_v5, %v3778_v43  ;;  %v11791_v45 = vsub.f32 %v3738_v24, %v3779_v44  ;;  %v7724_v24 = vor.u32 %v8983_v21, %v7723_v20  ;;  %v9019_v43 = vld [vmem:[%s13147_s4 + $0xf74] sm:$0xf0]  ;;  %v7692_v44 = vor.u32 %v8975_v37, %v7691_v57  ;;  %4405 = vmatpush.bf16.msra.mxu1 %v7804_v41  ;;  %v7717_v20 = vld [vmem:[%s13147_s4 + $0xe48] sm:$0xf0]  ;;  %v9025_v37 = vld [vmem:[%s13147_s4 + $0xfa4] sm:$0xf0] }
 0x6f2   : > { %v7720_v21 = vor.u32 %v8980_v6, %v7717_v20  ;;  %v7892_v38 = vor.u32 %v9025_v37, %v7891_v59  ;;  %v7835_v41 = vld [vmem:[%s13147_s4 + $0xf30] sm:$0xf]  ;;  %v8921_v59 = vld [vmem:[%s13147_s4 + $0xc64] sm:$0xf0] }
 0x6f3   : > { %v3782_v48 = vmul.f32 %v11789_v52, %v11789_v52  ;;  %v3783_v35 = vmul.f32 %v11791_v45, %v11791_v45  ;;  %4394 = vmatpush.bf16.msra.mxu0 %v7724_v24  ;;  %v7787_v24 = vld [vmem:[%s13147_s4 + $0xed0] sm:$0xf] }
 0x6f4   : > { %v7755_v20 = vld [vmem:[%s13147_s4 + $0xe90] sm:$0xf] }
 0x6f5   : > { %v3784_v14 = vrot.slane %v3782_v48, 4  ;;  %v3790_v50 = vrot.slane %v3783_v35, 4 }
 0x6f7   : > { %v3791_v51 = vadd.f32 %v3790_v50, %v3783_v35  ;;  %v3785_v54 = vadd.f32 %v3784_v14, %v3782_v48  ;;  %4395 = vmatpush.bf16.msra.mxu0 %v7716_v49  ;;  %v7868_v48 = vor.u32 %v9019_v43, %v7867_v23  ;;  %v7915_v35 = vld [vmem:[%s13147_s4 + $0xfd0] sm:$0xf]  ;;  %v9031_v14 = vld [vmem:[%s13147_s4 + $0xfd4] sm:$0xf0]  ;;  %v7683_v50 = vld [vmem:[%s13147_s4 + $0xe00] sm:$0xf]  ;;  %v7788_v49 = vor.u32 %v8999_v22, %v7787_v24 }
 0x6f8   : > { %v7772_v23 = vor.u32 %v8995_v7, %v7771_v39  ;;  %v9011_v43 = vld [vmem:[%s13147_s4 + $0xf34] sm:$0xf0]  ;;  %v7819_v22 = vld [vmem:[%s13147_s4 + $0xf10] sm:$0xf]  ;;  %v7805_v39 = vld [vmem:[%s13147_s4 + $0xef8] sm:$0xf0] }
 0x6f9   : > { %v3792_v55 = vrot.slane %v3791_v51, 2  ;;  %v3786_v3 = vrot.slane %v3785_v54, 2  ;;  %4418 = vmatpush.bf16.msra.mxu2 %v7868_v48  ;;  %v7883_v48 = vld [vmem:[%s13147_s4 + $0xf90] sm:$0xf]  ;;  %v8991_v24 = vld [vmem:[%s13147_s4 + $0xe94] sm:$0xf0] }
 0x6fa   : > { %v9018_v7 = vld [vmem:[%s13147_s4 + $0xf74] sm:$0xf] }
 0x6fb   : > { %v3793_v56 = vadd.f32 %v3792_v55, %v3791_v51  ;;  %v3787_v10 = vadd.f32 %v3786_v3, %v3785_v54  ;;  %4396 = vmatpush.bf16.msra.mxu0 %v7708_v33  ;;  %v8973_v51 = vld [vmem:[%s13147_s4 + $0xe04] sm:$0xf0]  ;;  %v8986_v54 = vld [vmem:[%s13147_s4 + $0xe74] sm:$0xf]  ;;  %v7741_v55 = vld [vmem:[%s13147_s4 + $0xe78] sm:$0xf0]  ;;  %v7916_v3 = vor.u32 %v9031_v14, %v7915_v35 }
 0x6fc   : > { %v8997_v33 = vld [vmem:[%s13147_s4 + $0xec4] sm:$0xf0]  ;;  %v9023_v35 = vld [vmem:[%s13147_s4 + $0xf94] sm:$0xf0]  ;;  %v3963_v14 = vld [vmem:[#allocation2] sm:$0xfe] }
 0x6fd   : > { %v3794_v58 = vrot.slane %v3793_v56, 1  ;;  %v3788_v63 = vrot.slane %v3787_v10, 1  ;;  %4433 = vmatpush.bf16.msra.mxu3 %v7916_v3  ;;  %v7780_v36 = vor.u32 %v8997_v33, %v7779_v32  ;;  %v7747_v32 = vld [vmem:[%s13147_s4 + $0xe80] sm:$0xf]  ;;  %v8989_v33 = vld [vmem:[%s13147_s4 + $0xe84] sm:$0xf0] }
 0x6ff   : > { %v3795_v5 = vadd.f32 %v3794_v58, %v3793_v56  ;;  %v3789_v0 = vadd.f32 %v3788_v63, %v3787_v10  ;;  %4397 = vmatpush.bf16.msra.mxu0 %v7700_v42  ;;  %v7684_v56 = vor.u32 %v8973_v51, %v7683_v50  ;;  %v7744_v10 = vor.u32 %v8986_v54, %v7741_v55  ;;  %v8984_v58 = vld [vmem:[%s13147_s4 + $0xe64] sm:$0xf]  ;;  %v7733_v63 = vld [vmem:[%s13147_s4 + $0xe68] sm:$0xf0]  ;;  %v9013_v42 = vld [vmem:[%s13147_s4 + $0xf44] sm:$0xf0] }
 0x700   : > { %v7844_v57 = vor.u32 %v9013_v42, %v7843_v34  ;;  %v7884_v50 = vor.u32 %v9023_v35, %v7883_v48  ;;  %v8974_v51 = vld [vmem:[%s13147_s4 + $0xe14] sm:$0xf]  ;;  %v7693_v54 = vld [vmem:[%s13147_s4 + $0xe18] sm:$0xf0]  ;;  %v3967_v55 = vld [vmem:[#allocation2 + $0x20] sm:$0x1] }
 0x701   : > { %3798 = vrot.lane.b32.xlu1 %v3795_v5, %s9134_s14  ;;  %3796 = vrot.lane.b32.xlu0 %v3789_v0, %s9134_s14  ;;  %v7696_v3 = vor.u32 %v8974_v51, %v7693_v54  ;;  %v7811_v34 = vld [vmem:[%s13147_s4 + $0xf00] sm:$0xf]  ;;  %v9005_v42 = vld [vmem:[%s13147_s4 + $0xf04] sm:$0xf0] }
 0x702   : > { %4434 = vmatpush.bf16.msra.mxu3 %v7908_v19  ;;  %v7812_v62 = vor.u32 %v9005_v42, %v7811_v34  ;;  %v9030_v48 = vld [vmem:[%s13147_s4 + $0xfd4] sm:$0xf]  ;;  %v7917_v35 = vld [vmem:[%s13147_s4 + $0xfd8] sm:$0xf0]  ;;  %v7893_v42 = vld [vmem:[%s13147_s4 + $0xfa8] sm:$0xf0] }
 0x703   : > { %4398 = vmatpush.bf16.msra.mxu0 %v7692_v44  ;;  %v7836_v44 = vor.u32 %v9011_v43, %v7835_v41  ;;  %v7920_v54 = vor.u32 %v9030_v48, %v7917_v35 }
 0x707   : > { %4399 = vmatpush.bf16.msra.mxu0 %v7684_v56  ;;  %v7763_v56 = vld [vmem:[%s13147_s4 + $0xea0] sm:$0xf] }
 0x70b   : > { %4444 = vmatpush.bf16.msrb.mxu0 %v7744_v10  ;;  %v8993_v10 = vld [vmem:[%s13147_s4 + $0xea4] sm:$0xf0] }
 0x773   : > { %v3799_v4 = vpop.permute.xlu1 %3798  ;;  %v3797_v1 = vpop.permute.xlu0 %3796 }
 0x774   : > { %v3800_v8 = vsel %vm2025_vm1, %v3797_v1, %v3799_v4  ;;  %v3801_v40 = vsel %vm2025_vm1, %v3799_v4, %v3797_v1  ;;  %v7725_v4 = vld [vmem:[%s13147_s4 + $0xe58] sm:$0xf0] }
 0x775   : > { %v3802_v2 = vadd.f32 %v3801_v40, %v3789_v0  ;;  %v3803_v12 = vadd.f32 %v3800_v8, %v3795_v5  ;;  %v7736_v5 = vor.u32 %v8984_v58, %v7733_v63  ;;  %v8982_v0 = vld [vmem:[%s13147_s4 + $0xe54] sm:$0xf]  ;;  %v7795_v8 = vld [vmem:[%s13147_s4 + $0xee0] sm:$0xf]  ;;  %v9001_v40 = vld [vmem:[%s13147_s4 + $0xee4] sm:$0xf0]  ;;  %v3971_v63 = vpack.c.bf16 %v3967_v55, %v3963_v14 }
 0x776   : > { %v7728_v1 = vor.u32 %v8982_v0, %v7725_v4  ;;  %v7827_v58 = vld [vmem:[%s13147_s4 + $0xf20] sm:$0xf]  ;;  %v9009_v0 = vld [vmem:[%s13147_s4 + $0xf24] sm:$0xf0]  ;;  %v7979_v55 = vld [vmem:[%s13147_s4 + $0xc50] sm:$0xf] }
 0x777   : > { %3804 = vrot.lane.b32.xlu2 %v3802_v2, %s9135_s15  ;;  %3806 = vrot.lane.b32.xlu0 %v3803_v12, %s9135_s15  ;;  %v7828_v4 = vor.u32 %v9009_v0, %v7827_v58  ;;  %v4041_v19 = vshrl.u32 %v3971_v63, 16  ;;  %v9016_v58 = vld [vmem:[%s13147_s4 + $0xf64] sm:$0xf] }
 0x778   : > { %4445 = vmatpush.bf16.msrb.mxu0 %v7736_v5  ;;  %v7764_v5 = vor.u32 %v8993_v10, %v7763_v56  ;;  %v9000_v10 = vld [vmem:[%s13147_s4 + $0xee4] sm:$0xf] }
 0x77c   : > { %4446 = vmatpush.bf16.msrb.mxu0 %v7728_v1  ;;  %v7875_v1 = vld [vmem:[%s13147_s4 + $0xf80] sm:$0xf] }
 0x780   : > { %4447 = vmatpush.bf16.msrb.mxu0 %v7720_v21 }
 0x7d1   : > { %v3805_v46 = vpop.permute.xlu2 %3804 }
 0x7e9   : > { %v3807_v28 = vpop.permute.xlu0 %3806 }
 0x7ea   : > { %v3808_v18 = vsel %vm2034_vm2, %v3805_v46, %v3807_v28  ;;  %v3809_v9 = vsel %vm2034_vm2, %v3807_v28, %v3805_v46  ;;  %v9015_v46 = vld [vmem:[%s13147_s4 + $0xf54] sm:$0xf0] }
 0x7eb   : > { %v3810_v27 = vadd.f32 %v3809_v9, %v3802_v2  ;;  %v3811_v11 = vadd.f32 %v3808_v18, %v3803_v12  ;;  %v7859_v2 = vld [vmem:[%s13147_s4 + $0xf60] sm:$0xf]  ;;  %v7796_v12 = vor.u32 %v9001_v40, %v7795_v8  ;;  %v7852_v28 = vor.u32 %v9015_v46, %v7851_v25  ;;  %v7899_v18 = vld [vmem:[%s13147_s4 + $0xfb0] sm:$0xf]  ;;  %v9027_v9 = vld [vmem:[%s13147_s4 + $0xfb4] sm:$0xf0] }
 0x7ec   : > { %v7860_v15 = vor.u32 %v9017_v13, %v7859_v2  ;;  %v9021_v8 = vld [vmem:[%s13147_s4 + $0xf84] sm:$0xf0]  ;;  %v4043_v40 = vshll.u32 %v3971_v63, 16  ;;  %v7685_v13 = vld [vmem:[%s13147_s4 + $0xe08] sm:$0xf0]  ;;  %v7756_v46 = vor.u32 %v8991_v24, %v7755_v20 }
 0x7ed   : > { %v11833_v30 = vadd.f32 %v3811_v11, %v3810_v27  ;;  %4406 = vmatpush.bf16.msra.mxu1 %v7796_v12  ;;  %v7900_v27 = vor.u32 %v9027_v9, %v7899_v18  ;;  %v8978_v11 = vld [vmem:[%s13147_s4 + $0xe34] sm:$0xf]  ;;  %v7876_v2 = vor.u32 %v9021_v8, %v7875_v1  ;;  %v8972_v12 = vld [vmem:[%s13147_s4 + $0xe04] sm:$0xf]  ;;  %v9007_v25 = vld [vmem:[%s13147_s4 + $0xf14] sm:$0xf0] }
 0x7ee   : > { %4419 = vmatpush.bf16.msra.mxu2 %v7860_v15  ;;  %v7712_v26 = vor.u32 %v8978_v11, %v7709_v31  ;;  %v9034_v15 = vld [vmem:[%s13147_s4 + $0xff4] sm:$0xf]  ;;  %v7688_v16 = vor.u32 %v8972_v12, %v7685_v13  ;;  %v4045_v6 = vrot.slane %v4043_v40, 1  ;;  %v7995_v18 = vld [vmem:[%s13147_s4 + $0xc70] sm:$0xf] }
 0x7ef   : > { %3815 = vrot.lane.b32.xlu2 %v11833_v30, %s9137_s17  ;;  %3813 = vrot.lane.b32.xlu1 %v11833_v30, %s9136_s16  ;;  %v7936_v21 = vor.u32 %v9034_v15, %v7933_v17  ;;  %v8923_v9 = vld [vmem:[%s13147_s4 + $0xc74] sm:$0xf0]  ;;  %v9032_v11 = vld [vmem:[%s13147_s4 + $0xfe4] sm:$0xf] }
 0x7f0   : > { %4435 = vmatpush.bf16.msra.mxu3 %v7900_v27  ;;  %4448 = vmatpush.bf16.msrb.mxu0 %v7712_v26  ;;  %v7996_v27 = vor.u32 %v8923_v9, %v7995_v18  ;;  %v7925_v31 = vld [vmem:[%s13147_s4 + $0xfe8] sm:$0xf0]  ;;  %v9028_v8 = vld [vmem:[%s13147_s4 + $0xfc4] sm:$0xf]  ;;  %v7971_v15 = vld [vmem:[%s13147_s4 + $0xc40] sm:$0xf] }
 0x7f1   : > { %4407 = vmatpush.bf16.msra.mxu1 %v7788_v49  ;;  %v12049_v49 = vor.u32 %v4045_v6, %v4041_v19  ;;  %v7928_v26 = vor.u32 %v9032_v11, %v7925_v31  ;;  %v7909_v40 = vld [vmem:[%s13147_s4 + $0xfc8] sm:$0xf0]  ;;  %v8998_v17 = vld [vmem:[%s13147_s4 + $0xed4] sm:$0xf]  ;;  %v7789_v19 = vld [vmem:[%s13147_s4 + $0xed8] sm:$0xf0] }
 0x7f2   : > { %4420 = vmatpush.bf16.msra.mxu2 %v7852_v28  ;;  %v7820_v28 = vor.u32 %v9007_v25, %v7819_v22  ;;  %v7912_v13 = vor.u32 %v9028_v8, %v7909_v40  ;;  %v9014_v20 = vld [vmem:[%s13147_s4 + $0xf54] sm:$0xf]  ;;  %v7792_v24 = vor.u32 %v8998_v17, %v7789_v19  ;;  %v7963_v18 = vld [vmem:[%s13147_s4 + $0xc30] sm:$0xf]  ;;  %v8915_v9 = vld [vmem:[%s13147_s4 + $0xc34] sm:$0xf0] }
 0x7f3   : > { %4400 = vmatmul.bf16.vlgmr.msra.gmra.mxu0 %v12049_v49  ;;  %v9026_v25 = vld [vmem:[%s13147_s4 + $0xfb4] sm:$0xf]  ;;  %v7964_v11 = vor.u32 %v8915_v9, %v7963_v18  ;;  %v7781_v31 = vld [vmem:[%s13147_s4 + $0xec8] sm:$0xf0]  ;;  %v3970_v8 = vld [vmem:[#allocation2 + $0x38] sm:$0x1] }
 0x7f4   : > { %4436 = vmatpush.bf16.msra.mxu3 %v7892_v38  ;;  %4449 = vmatpush.bf16.msrb.mxu0 %v7704_v29  ;;  %v9002_v29 = vld [vmem:[%s13147_s4 + $0xef4] sm:$0xf]  ;;  %v7939_v40 = vld [vmem:[%s13147_s4 + $0xc00] sm:$0xf]  ;;  %v8909_v19 = vld [vmem:[%s13147_s4 + $0xc04] sm:$0xf0] }
 0x7f5   : > { %4408 = vmatpush.bf16.msra.mxu1 %v7780_v36  ;;  %v7748_v36 = vor.u32 %v8989_v33, %v7747_v32  ;;  %v7808_v43 = vor.u32 %v9002_v29, %v7805_v39  ;;  %v7845_v32 = vld [vmem:[%s13147_s4 + $0xf48] sm:$0xf0]  ;;  %v9010_v29 = vld [vmem:[%s13147_s4 + $0xf34] sm:$0xf]  ;;  %v7837_v39 = vld [vmem:[%s13147_s4 + $0xf38] sm:$0xf0] }
 0x7f6   : > { %4421 = vmatpush.bf16.msra.mxu2 %v7844_v57  ;;  %v7987_v57 = vld [vmem:[%s13147_s4 + $0xc60] sm:$0xf]  ;;  %v7757_v18 = vld [vmem:[%s13147_s4 + $0xe98] sm:$0xf0] }
 0x7f7   : > { %v7988_v47 = vor.u32 %v8921_v59, %v7987_v57  ;;  %v7955_v57 = vld [vmem:[%s13147_s4 + $0xc20] sm:$0xf] }
 0x7f8   : > { %4437 = vmatpush.bf16.msra.mxu3 %v7884_v50  ;;  %4450 = vmatpush.bf16.msrb.mxu0 %v7696_v3  ;;  %v8919_v3 = vld [vmem:[%s13147_s4 + $0xc54] sm:$0xf0]  ;;  %v7551_v9 = vld [vmem:[%s13150_s7 + $0x2] sm:$0x3] }
 0x7f9   : > { %4409 = vmatpush.bf16.msra.mxu1 %v7772_v23  ;;  %v7980_v56 = vor.u32 %v8919_v3, %v7979_v55  ;;  %v7765_v3 = vld [vmem:[%s13147_s4 + $0xea8] sm:$0xf0] }
 0x7fa   : > { %4422 = vmatpush.bf16.msra.mxu2 %v7836_v44  ;;  %v7869_v44 = vld [vmem:[%s13147_s4 + $0xf78] sm:$0xf0] }
 0x7fb   : > { %v7872_v51 = vor.u32 %v9018_v7, %v7869_v44  ;;  %v9022_v7 = vld [vmem:[%s13147_s4 + $0xf94] sm:$0xf]  ;;  %v7885_v44 = vld [vmem:[%s13147_s4 + $0xf98] sm:$0xf0] }
 0x7fc   : > { %4438 = vmatpush.bf16.msra.mxu3 %v7876_v2  ;;  %4451 = vmatpush.bf16.msrb.mxu0 %v7688_v16  ;;  %v8917_v16 = vld [vmem:[%s13147_s4 + $0xc44] sm:$0xf0]  ;;  %v7888_v55 = vor.u32 %v9022_v7, %v7885_v44  ;;  %v8988_v7 = vld [vmem:[%s13147_s4 + $0xe84] sm:$0xf] }
 0x7fd   : > { %4410 = vmatpush.bf16.msra.mxu1 %v7764_v5  ;;  %v7972_v6 = vor.u32 %v8917_v16, %v7971_v15 }
 0x7fe   : > { %4423 = vmatpush.bf16.msra.mxu2 %v7828_v4  ;;  %v7861_v4 = vld [vmem:[%s13147_s4 + $0xf68] sm:$0xf0] }
 0x7ff   : > { %v7864_v1 = vor.u32 %v9016_v58, %v7861_v4  ;;  %v9020_v58 = vld [vmem:[%s13147_s4 + $0xf84] sm:$0xf] }
 0x800   : > { %4483 = vmatpush.bf16.msrb.mxu3 %v7936_v21  ;;  %4816 = vmatpush.bf16.msra.mxu0 %v7996_v27  ;;  %v7853_v21 = vld [vmem:[%s13147_s4 + $0xf58] sm:$0xf0]  ;;  %v8996_v27 = vld [vmem:[%s13147_s4 + $0xec4] sm:$0xf] }
 0x801   : > { %4411 = vmatpush.bf16.msra.mxu1 %v7756_v46  ;;  %v7856_v22 = vor.u32 %v9014_v20, %v7853_v21  ;;  %v7901_v46 = vld [vmem:[%s13147_s4 + $0xfb8] sm:$0xf0]  ;;  %v7784_v33 = vor.u32 %v8996_v27, %v7781_v31  ;;  %v9006_v31 = vld [vmem:[%s13147_s4 + $0xf14] sm:$0xf] }
 0x802   : > { %4424 = vmatpush.bf16.msra.mxu2 %v7820_v28  ;;  %v7904_v28 = vor.u32 %v9026_v25, %v7901_v46  ;;  %v3890_v25 = vld [vmem:[#allocation2] sm:$0xff] }
 0x803   : > { %4452 = vmatmul.bf16.vlgmr.msrb.gmra.mxu0 %v12049_v49  ;;  %v7947_v49 = vld [vmem:[%s13147_s4 + $0xc10] sm:$0xf] }
 0x804   : > { %4484 = vmatpush.bf16.msrb.mxu3 %v7928_v26  ;;  %4817 = vmatpush.bf16.msra.mxu0 %v7988_v47  ;;  %v9012_v26 = vld [vmem:[%s13147_s4 + $0xf44] sm:$0xf] }
 0x805   : > { %4412 = vmatpush.bf16.msra.mxu1 %v7748_v36  ;;  %v7848_v34 = vor.u32 %v9012_v26, %v7845_v32  ;;  %v9024_v36 = vld [vmem:[%s13147_s4 + $0xfa4] sm:$0xf]  ;;  %v7821_v26 = vld [vmem:[%s13147_s4 + $0xf18] sm:$0xf0]  ;;  %v8922_v32 = vld [vmem:[%s13147_s4 + $0xc74] sm:$0xf] }
 0x806   : > { %4425 = vmatpush.bf16.msra.mxu2 %v7812_v62  ;;  %v7896_v59 = vor.u32 %v9024_v36, %v7893_v42  ;;  %v7773_v62 = vld [vmem:[%s13147_s4 + $0xeb8] sm:$0xf0] }
 0x808   : > { %4485 = vmatpush.bf16.msrb.mxu3 %v7920_v54  ;;  %4818 = vmatpush.bf16.msra.mxu0 %v7980_v56  ;;  %v9008_v56 = vld [vmem:[%s13147_s4 + $0xf24] sm:$0xf] }
 0x809   : > { %4457 = vmatpush.bf16.msrb.mxu1 %v7808_v43 }
 0x80a   : > { %4470 = vmatpush.bf16.msrb.mxu2 %v7872_v51  ;;  %v8992_v51 = vld [vmem:[%s13147_s4 + $0xea4] sm:$0xf] }
 0x80b   : > { %v7768_v15 = vor.u32 %v8992_v51, %v7765_v3  ;;  %v7989_v51 = vld [vmem:[%s13147_s4 + $0xc68] sm:$0xf0] }
 0x80c   : > { %4486 = vmatpush.bf16.msrb.mxu3 %v7912_v13  ;;  %4819 = vmatpush.bf16.msra.mxu0 %v7972_v6  ;;  %v8187_v6 = vld [vmem:[%s13147_s4 + $0xdf0] sm:$0xf] }
 0x80e   : > { %4471 = vmatpush.bf16.msrb.mxu2 %v7864_v1 }
 0x810   : > { %4487 = vmatpush.bf16.msrb.mxu3 %v7904_v28  ;;  %4820 = vmatpush.bf16.msra.mxu0 %v7964_v11  ;;  %v7940_v11 = vor.u32 %v8909_v19, %v7939_v40  ;;  %v7981_v40 = vld [vmem:[%s13147_s4 + $0xc58] sm:$0xf0] }
 0x812   : > { %4472 = vmatpush.bf16.msrb.mxu2 %v7856_v22  ;;  %v8990_v22 = vld [vmem:[%s13147_s4 + $0xe94] sm:$0xf] }
 0x813   : > { %v7760_v42 = vor.u32 %v8990_v22, %v7757_v18  ;;  %v7973_v22 = vld [vmem:[%s13147_s4 + $0xc48] sm:$0xf0] }
 0x814   : > { %4488 = vmatpush.bf16.msrb.mxu3 %v7896_v59  ;;  %v8179_v59 = vld [vmem:[%s13147_s4 + $0xde0] sm:$0xf] }
 0x816   : > { %4473 = vmatpush.bf16.msrb.mxu2 %v7848_v34 }
 0x818   : > { %4489 = vmatpush.bf16.msrb.mxu3 %v7888_v55 }
 0x849   : > { %v3816_v37 = vpop.permute.xlu2 %3815 }
 0x861   : > { %v3814_v38 = vpop.permute.xlu1 %3813 }
 0x862   : > { %v3817_v41 = vsel %vm2068_vm3, %v3814_v38, %v3816_v37  ;;  %v3818_v23 = vsel %vm2069_vm4, %v3814_v38, %v3816_v37  ;;  %v8913_v37 = vld [vmem:[%s13147_s4 + $0xc24] sm:$0xf0]  ;;  %v8994_v38 = vld [vmem:[%s13147_s4 + $0xeb4] sm:$0xf] }
 0x863   : > { %v3819_v14 = vadd.f32 %v3817_v41, %v11833_v30  ;;  %v3820_v50 = vadd.f32 %v3818_v23, %v11833_v30  ;;  %v7797_v30 = vld [vmem:[%s13147_s4 + $0xee8] sm:$0xf0]  ;;  %v7956_v43 = vor.u32 %v8913_v37, %v7955_v57  ;;  %v7776_v35 = vor.u32 %v8994_v38, %v7773_v62  ;;  %v7997_v57 = vld [vmem:[%s13147_s4 + $0xc78] sm:$0xf0]  ;;  %v7552_v37 = vld [vmem:[%s13151_s8 + $0x2] sm:$0x3] }
 0x864   : > { %v7800_v0 = vor.u32 %v9000_v10, %v7797_v30  ;;  %v7829_v10 = vld [vmem:[%s13147_s4 + $0xf28] sm:$0xf0] }
 0x865   : > { %v3821_v63 = vmul.f32 0.0078125, %v3819_v14  ;;  %v3822_v5 = vmul.f32 0.0078125, %v3820_v50  ;;  %v7840_v14 = vor.u32 %v9010_v29, %v7837_v39  ;;  %v8911_v50 = vld [vmem:[%s13147_s4 + $0xc14] sm:$0xf0]  ;;  %4821 = vmatpush.bf16.msra.mxu0 %v7956_v43  ;;  %v7832_v16 = vor.u32 %v9008_v56, %v7829_v10  ;;  %v8969_v39 = vld [vmem:[%s13147_s4 + $0xde4] sm:$0xf0] }
 0x866   : > { %4458 = vmatpush.bf16.msrb.mxu1 %v7800_v0  ;;  %v12246_v0 = vld [vmem:[%s13149_s6 + $0x2] sm:$0x3]  ;;  %v7948_v1 = vor.u32 %v8911_v50, %v7947_v49  ;;  %v7824_v29 = vor.u32 %v9006_v31, %v7821_v26  ;;  %v3862_v56 = vperm.slane %v7551_v9, 1  ;;  %v8155_v31 = vld [vmem:[%s13147_s4 + $0xdb0] sm:$0xf] }
 0x867   : > { %v12130_v2 = vadd.f32 1e-05, %v3821_v63  ;;  %v12132_v12 = vadd.f32 1e-05, %v3822_v5  ;;  %v7877_v63 = vld [vmem:[%s13147_s4 + $0xf88] sm:$0xf0]  ;;  %4474 = vmatpush.bf16.msrb.mxu2 %v7840_v14 }
 0x868   : > { %v3966_v5 = vld [vmem:[#allocation2 + $0x18] sm:$0xfe]  ;;  %v7880_v21 = vor.u32 %v9020_v58, %v7877_v63  ;;  %v7813_v14 = vld [vmem:[%s13147_s4 + $0xf08] sm:$0xf0]  ;;  %v3853_v49 = vperm.slane %v12246_v0, 1  ;;  %v3872_v63 = vperm.slane %v7552_v37, 0 }
 0x869   : > { %9117 = vrsqrt.f32 %v12130_v2  ;;  %v3974_v17 = vpack.c.bf16 %v3970_v8, %v3966_v5  ;;  %vm3831_vm14 = vweird.f32 %v12130_v2  ;;  %vm3841_vm5 = vweird.f32 %v12132_v12  ;;  %4822 = vmatpush.bf16.msra.mxu0 %v7948_v1  ;;  %v8963_v26 = vld [vmem:[%s13147_s4 + $0xdb4] sm:$0xf0] }
 0x86a   : > { %9119 = vrsqrt.f32 %v12132_v12  ;;  %4459 = vmatpush.bf16.msrb.mxu1 %v7792_v24  ;;  %v8971_v24 = vld [vmem:[%s13147_s4 + $0xdf4] sm:$0xf0]  ;;  %4490 = vmatpush.bf16.msrb.mxu3 %v7880_v21  ;;  %v3873_v1 = vperm.slane %v7552_v37, 1 }
 0x86b   : > { %v4064_v28 = vshll.u32 %v3974_v17, 16  ;;  %4475 = vmatpush.bf16.msrb.mxu2 %v7832_v16  ;;  %v8188_v62 = vor.u32 %v8971_v24, %v8187_v6  ;;  %v8163_v6 = vld [vmem:[%s13147_s4 + $0xdc0] sm:$0xf]  ;;  %v8916_v24 = vld [vmem:[%s13147_s4 + $0xc44] sm:$0xf] }
 0x86d   : > { %v4066_v36 = vrot.slane %v4064_v28, 1  ;;  %4823 = vmatpush.bf16.msra.mxu0 %v7940_v11  ;;  %v7976_v11 = vor.u32 %v8916_v24, %v7973_v22  ;;  %v8968_v24 = vld [vmem:[%s13147_s4 + $0xde4] sm:$0xf]  ;;  %v8181_v22 = vld [vmem:[%s13147_s4 + $0xde8] sm:$0xf0] }
 0x86e   : > { %4460 = vmatpush.bf16.msrb.mxu1 %v7784_v33  ;;  %v3852_v33 = vperm.slane %v12246_v0, 0 }
 0x86f   : > { %v12196_v47 = vpop.eup %9117  ;;  %4476 = vmatpush.bf16.msrb.mxu2 %v7824_v29  ;;  %v8139_v29 = vld [vmem:[%s13147_s4 + $0xd90] sm:$0xf] }
 0x870   : > { %v12208_v41 = vpop.eup %9119  ;;  %v3826_v23 = vmul.f32 %v12196_v47, %v12130_v2  ;;  %vm3832_vm13 = vweird.f32 %v12196_v47  ;;  %v4062_v2 = vshrl.u32 %v3974_v17, 16 }
 0x871   : > { %v3836_v48 = vmul.f32 %v12208_v41, %v12132_v12  ;;  %vm3842_vm15 = vweird.f32 %v12208_v41  ;;  %vm12268_vm0 = vmor %vm3831_vm14, %vm3832_vm13 }
 0x872   : > { %v3827_v54 = vmul.f32 %v12196_v47, %v3826_v23  ;;  %4461 = vmatpush.bf16.msrb.mxu1 %v7776_v35  ;;  %vm12293_vm6 = vmor %vm3841_vm5, %vm3842_vm15  ;;  %v7749_v23 = vld [vmem:[%s13147_s4 + $0xe88] sm:$0xf0]  ;;  %v12321_v44 = vor.u32 %v4066_v36, %v4062_v2  ;;  %v9004_v35 = vld [vmem:[%s13147_s4 + $0xf04] sm:$0xf]  ;;  %v12363_v2 = vpack.c.bf16 %v3890_v25, %v3890_v25 }
 0x873   : > { %v3837_v30 = vmul.f32 %v12208_v41, %v3836_v48  ;;  %v8000_v48 = vor.u32 %v8922_v32, %v7997_v57  ;;  %v7752_v3 = vor.u32 %v8988_v7, %v7749_v23  ;;  %v7816_v58 = vor.u32 %v9004_v35, %v7813_v14  ;;  %v8914_v32 = vld [vmem:[%s13147_s4 + $0xc34] sm:$0xf]  ;;  %v8147_v36 = vld [vmem:[%s13147_s4 + $0xda0] sm:$0xf]  ;;  %v8912_v57 = vld [vmem:[%s13147_s4 + $0xc24] sm:$0xf] }
 0x874   : > { %v3828_v4 = vmul.f32 0.5, %v3827_v54  ;;  %v3861_v54 = vperm.slane %v7551_v9, 0  ;;  %4439 = vmatmul.bf16.vlgmr.msra.gmra.mxu3 %v12321_v44  ;;  %4824 = vmatmul.bf16.vlgmr.msra.gmra.mxu0 %v12363_v2  ;;  %v8910_v23 = vld [vmem:[%s13147_s4 + $0xc14] sm:$0xf]  ;;  %v8059_v35 = vld [vmem:[%s13147_s4 + $0xcf0] sm:$0xf] }
 0x875   : > { %v3838_v13 = vmul.f32 0.5, %v3837_v30  ;;  %4855 = vmatpush.bf16.msra.mxu3 %v8188_v62  ;;  %v8180_v30 = vor.u32 %v8969_v39, %v8179_v59  ;;  %4868 = vmatpush.bf16.msrb.mxu0 %v8000_v48  ;;  %v7957_v59 = vld [vmem:[%s13147_s4 + $0xc28] sm:$0xf0]  ;;  %v8959_v39 = vld [vmem:[%s13147_s4 + $0xd94] sm:$0xf0] }
 0x876   : > { %v3829_v20 = vsub.f32 1.5, %v3828_v4  ;;  %4462 = vmatpush.bf16.msrb.mxu1 %v7768_v15  ;;  %v8171_v4 = vld [vmem:[%s13147_s4 + $0xdd0] sm:$0xf]  ;;  %4477 = vmatpush.bf16.msrb.mxu2 %v7816_v58  ;;  %v7960_v62 = vor.u32 %v8912_v57, %v7957_v59  ;;  %v8140_v14 = vor.u32 %v8959_v39, %v8139_v29  ;;  %v7941_v58 = vld [vmem:[%s13147_s4 + $0xc08] sm:$0xf0] }
 0x877   : > { %v3839_v46 = vsub.f32 1.5, %v3838_v13  ;;  %v8099_v57 = vld [vmem:[%s13147_s4 + $0xd40] sm:$0xf]  ;;  %v8027_v39 = vld [vmem:[%s13147_s4 + $0xcb0] sm:$0xf] }
 0x878   : > { %v3830_v27 = vmul.f32 %v12196_v47, %v3829_v20  ;;  %v8965_v20 = vld [vmem:[%s13147_s4 + $0xdc4] sm:$0xf0] }
 0x879   : > { %v3840_v34 = vmul.f32 %v12208_v41, %v3839_v46  ;;  %4856 = vmatpush.bf16.msra.mxu3 %v8180_v30  ;;  %v8164_v9 = vor.u32 %v8965_v20, %v8163_v6  ;;  %v8908_v30 = vld [vmem:[%s13147_s4 + $0xc04] sm:$0xf]  ;;  %v8115_v6 = vld [vmem:[%s13147_s4 + $0xd60] sm:$0xf]  ;;  %v8953_v20 = vld [vmem:[%s13147_s4 + $0xd64] sm:$0xf0] }
 0x87a   : > { %v3834_v38 = vsel %vm12268_vm0, %v12196_v47, %v3830_v27  ;;  %4463 = vmatpush.bf16.msrb.mxu1 %v7760_v42  ;;  %v8961_v42 = vld [vmem:[%s13147_s4 + $0xda4] sm:$0xf0] }
 0x87b   : > { %v3844_v43 = vsel %vm12293_vm6, %v12208_v41, %v3840_v34  ;;  %v3845_v47 = vperm.slane %v3834_v38, 0  ;;  %v8920_v41 = vld [vmem:[%s13147_s4 + $0xc64] sm:$0xf]  ;;  %v8156_v34 = vor.u32 %v8963_v26, %v8155_v31  ;;  %v8148_v37 = vor.u32 %v8961_v42, %v8147_v36  ;;  %v3893_v31 = vld [vmem:[#allocation2 + $0x18] sm:$0xff]  ;;  %v8966_v26 = vld [vmem:[%s13147_s4 + $0xdd4] sm:$0xf] }
 0x87c   : > { %v3846_v50 = vperm.slane %v3844_v43, 0  ;;  %v7992_v0 = vor.u32 %v8920_v41, %v7989_v51  ;;  %v7949_v43 = vld [vmem:[%s13147_s4 + $0xc18] sm:$0xf0]  ;;  %v8131_v51 = vld [vmem:[%s13147_s4 + $0xd80] sm:$0xf] }
 0x87d   : > { %v3847_v55 = vmul.f32 %v3845_v47, %v11789_v52  ;;  %v8967_v52 = vld [vmem:[%s13147_s4 + $0xdd4] sm:$0xf0]  ;;  %v7952_v41 = vor.u32 %v8910_v23, %v7949_v43  ;;  %v8035_v36 = vld [vmem:[%s13147_s4 + $0xcc0] sm:$0xf]  ;;  %v8933_v42 = vld [vmem:[%s13147_s4 + $0xcc4] sm:$0xf0] }
 0x87e   : > { %v3848_v10 = vmul.f32 %v3846_v50, %v11791_v45  ;;  %v8918_v45 = vld [vmem:[%s13147_s4 + $0xc54] sm:$0xf]  ;;  %4464 = vmatpush.bf16.msrb.mxu1 %v7752_v3  ;;  %v8172_v16 = vor.u32 %v8967_v52, %v8171_v4  ;;  %4869 = vmatpush.bf16.msrb.mxu0 %v7992_v0  ;;  %v8939_v50 = vld [vmem:[%s13147_s4 + $0xcf4] sm:$0xf0]  ;;  %v8123_v3 = vld [vmem:[%s13147_s4 + $0xd70] sm:$0xf] }
 0x87f   : > { %v3856_v5 = vmul.f32 %v3852_v33, %v3847_v55  ;;  %v7984_v19 = vor.u32 %v8918_v45, %v7981_v40  ;;  %v7965_v33 = vld [vmem:[%s13147_s4 + $0xc38] sm:$0xf0]  ;;  %v8970_v4 = vld [vmem:[%s13147_s4 + $0xdf4] sm:$0xf]  ;;  %v8060_v45 = vor.u32 %v8939_v50, %v8059_v35  ;;  %v8091_v23 = vld [vmem:[%s13147_s4 + $0xd30] sm:$0xf] }
 0x880   : > { %v3857_v8 = vmul.f32 %v3853_v49, %v3848_v10  ;;  %4857 = vmatpush.bf16.msra.mxu3 %v8172_v16  ;;  %v7968_v12 = vor.u32 %v8914_v32, %v7965_v33  ;;  %v8189_v52 = vld [vmem:[%s13147_s4 + $0xdf8] sm:$0xf0]  ;;  %v8937_v16 = vld [vmem:[%s13147_s4 + $0xce4] sm:$0xf0]  ;;  %v12472_v33 = vpack.c.bf16 %v3893_v31, %v3893_v31  ;;  %v8947_v43 = vld [vmem:[%s13147_s4 + $0xd34] sm:$0xf0] }
 0x881   : > { %v3865_v13 = vadd.f32 %v3861_v54, %v3856_v5  ;;  %v8957_v54 = vld [vmem:[%s13147_s4 + $0xd84] sm:$0xf0]  ;;  %v8173_v32 = vld [vmem:[%s13147_s4 + $0xdd8] sm:$0xf0] }
 0x882   : > { %v3866_v15 = vadd.f32 %v3862_v56, %v3857_v8  ;;  %4870 = vmatpush.bf16.msrb.mxu0 %v7984_v19  ;;  %v8955_v56 = vld [vmem:[%s13147_s4 + $0xd74] sm:$0xf0]  ;;  %v8132_v0 = vor.u32 %v8957_v54, %v8131_v51  ;;  %v8176_v59 = vor.u32 %v8966_v26, %v8173_v32  ;;  %v8929_v50 = vld [vmem:[%s13147_s4 + $0xca4] sm:$0xf0]  ;;  %v8936_v26 = vld [vmem:[%s13147_s4 + $0xce4] sm:$0xf] }
 0x883   : > { %vm3867_vm7 = vcmp.gt.f32.partialorder %v3865_v13, 0.0  ;;  %v3876_v17 = vmul.f32 %v3872_v63, %v3865_v13  ;;  %v8945_v51 = vld [vmem:[%s13147_s4 + $0xd24] sm:$0xf0] }
 0x884   : > { %vm3868_vm8 = vcmp.gt.f32.partialorder %v3866_v15, 0.0  ;;  %v3877_v21 = vmul.f32 %v3873_v1, %v3866_v15  ;;  %4858 = vmatpush.bf16.msra.mxu3 %v8164_v9  ;;  %v8107_v9 = vld [vmem:[%s13147_s4 + $0xd50] sm:$0xf] }
 0x885   : > { %v3878_v46 = vsel %vm3867_vm7, %v3865_v13, %v3876_v17  ;;  %4491 = vmatmul.bf16.vlgmr.msrb.gmra.mxu3 %v12321_v44  ;;  %v8124_v13 = vor.u32 %v8955_v56, %v8123_v3  ;;  %v7944_v17 = vor.u32 %v8908_v30, %v7941_v58  ;;  %v8149_v3 = vld [vmem:[%s13147_s4 + $0xda8] sm:$0xf0]  ;;  %v8011_v30 = vld [vmem:[%s13147_s4 + $0xc90] sm:$0xf]  ;;  %v8927_v58 = vld [vmem:[%s13147_s4 + $0xc94] sm:$0xf0] }
 0x886   : > { %v3879_v28 = vsel %vm3868_vm8, %v3866_v15, %v3877_v21  ;;  %v3882_v18 = vrot.slane %v3878_v46, 7  ;;  %4871 = vmatpush.bf16.msrb.mxu0 %v7976_v11  ;;  %v8051_v15 = vld [vmem:[%s13147_s4 + $0xce0] sm:$0xf]  ;;  %v8192_v21 = vor.u32 %v8970_v4, %v8189_v52  ;;  %v8116_v46 = vor.u32 %v8953_v20, %v8115_v6  ;;  %v8958_v4 = vld [vmem:[%s13147_s4 + $0xd94] sm:$0xf] }
 0x887   : > { %v3883_v27 = vrot.slane %v3879_v28, 7  ;;  %v8052_v25 = vor.u32 %v8937_v16, %v8051_v15  ;;  %v8043_v28 = vld [vmem:[%s13147_s4 + $0xcd0] sm:$0xf]  ;;  %v8184_v11 = vor.u32 %v8968_v24, %v8181_v22  ;;  %v8141_v52 = vld [vmem:[%s13147_s4 + $0xd98] sm:$0xf0] }
 0x888   : > { %3888 = vst [vmem:[#allocation2 + $0x28] sm:$0x1] %v3882_v18  ;;  %4859 = vmatpush.bf16.msra.mxu3 %v8156_v34  ;;  %v8941_v15 = vld [vmem:[%s13147_s4 + $0xd04] sm:$0xf0]  ;;  %v8938_v16 = vld [vmem:[%s13147_s4 + $0xcf4] sm:$0xf]  ;;  %v8144_v6 = vor.u32 %v8958_v4, %v8141_v52 }
 0x889   : > { %3889 = vst [vmem:[#allocation2 + $0x30] sm:$0x1] %v3883_v27  ;;  %v8315_v20 = vld [vmem:[%s13147_s4 + $0x1070] sm:$0xf]  ;;  %v8125_v24 = vld [vmem:[%s13147_s4 + $0xd78] sm:$0xf0] }
 0x88a   : > { %3886 = vst [vmem:[#allocation2 + $0x8] sm:$0xfe] %v3882_v18  ;;  %4872 = vmatpush.bf16.msrb.mxu0 %v7968_v12  ;;  %v8935_v18 = vld [vmem:[%s13147_s4 + $0xcd4] sm:$0xf0]  ;;  %v8956_v22 = vld [vmem:[%s13147_s4 + $0xd84] sm:$0xf] }
 0x88b   : > { %3887 = vst [vmem:[#allocation2 + $0x10] sm:$0xfe] %v3883_v27  ;;  %v8951_v27 = vld [vmem:[%s13147_s4 + $0xd54] sm:$0xf0]  ;;  %v8044_v34 = vor.u32 %v8935_v18, %v8043_v28  ;;  %v8507_v18 = vld [vmem:[%s13147_s4 + $0x11f0] sm:$0xf] }
 0x88c   : > { %4860 = vmatpush.bf16.msra.mxu3 %v8148_v37  ;;  %v8108_v12 = vor.u32 %v8951_v27, %v8107_v9  ;;  %v8964_v37 = vld [vmem:[%s13147_s4 + $0xdc4] sm:$0xf]  ;;  %v9099_v9 = vld [vmem:[%s13147_s4 + $0x11f4] sm:$0xf0]  ;;  %v9093_v4 = vld [vmem:[%s13147_s4 + $0x11c4] sm:$0xf0] }
 0x88e   : > { %4873 = vmatpush.bf16.msrb.mxu0 %v7960_v62  ;;  %v8036_v62 = vor.u32 %v8933_v42, %v8035_v36  ;;  %v8307_v36 = vld [vmem:[%s13147_s4 + $0x1060] sm:$0xf]  ;;  %v9049_v42 = vld [vmem:[%s13147_s4 + $0x1064] sm:$0xf0] }
 0x88f   : > { %v3968_v38 = vld [vmem:[#allocation2 + $0x28] sm:$0x1] }
 0x890   : > { %v3969_v7 = vld [vmem:[#allocation2 + $0x30] sm:$0x1]  ;;  %4861 = vmatpush.bf16.msra.mxu3 %v8140_v14  ;;  %v8092_v14 = vor.u32 %v8947_v43, %v8091_v23 }
 0x891   : > { %v3964_v47 = vld [vmem:[#allocation2 + $0x8] sm:$0xfe]  ;;  %v8299_v23 = vld [vmem:[%s13147_s4 + $0x1050] sm:$0xf] }
 0x892   : > { %v3972_v44 = vpack.c.bf16 %v3968_v38, %v3964_v47  ;;  %v3965_v48 = vld [vmem:[#allocation2 + $0x10] sm:$0xfe]  ;;  %4874 = vmatpush.bf16.msrb.mxu0 %v7952_v41  ;;  %v8165_v38 = vld [vmem:[%s13147_s4 + $0xdc8] sm:$0xf0]  ;;  %v8083_v41 = vld [vmem:[%s13147_s4 + $0xd20] sm:$0xf] }
 0x893   : > { %v3973_v49 = vpack.c.bf16 %v3969_v7, %v3965_v48  ;;  %v8931_v7 = vld [vmem:[%s13147_s4 + $0xcb4] sm:$0xf0]  ;;  %v8168_v47 = vor.u32 %v8964_v37, %v8165_v38  ;;  %v8157_v48 = vld [vmem:[%s13147_s4 + $0xdb8] sm:$0xf0]  ;;  %v3891_v31 = vld [vmem:[#allocation2 + $0x8] sm:$0xff]  ;;  %v8508_v37 = vor.u32 %v9099_v9, %v8507_v18 }
 0x894   : > { %v4050_v55 = vshll.u32 %v3972_v44, 16  ;;  %v4048_v63 = vshrl.u32 %v3972_v44, 16  ;;  %4862 = vmatpush.bf16.msra.mxu3 %v8132_v0  ;;  %v8962_v44 = vld [vmem:[%s13147_s4 + $0xdb4] sm:$0xf]  ;;  %v8028_v35 = vor.u32 %v8931_v7, %v8027_v39  ;;  %v8499_v38 = vld [vmem:[%s13147_s4 + $0x11e0] sm:$0xf]  ;;  %v12615_v39 = vpack.c.bf16 %v3891_v31, %v3891_v31 }
 0x895   : > { %v4057_v10 = vshll.u32 %v3973_v49, 16  ;;  %v4055_v1 = vshrl.u32 %v3973_v49, 16  ;;  %v8019_v49 = vld [vmem:[%s13147_s4 + $0xca0] sm:$0xf]  ;;  %v8160_v54 = vor.u32 %v8962_v44, %v8157_v48  ;;  %v8934_v44 = vld [vmem:[%s13147_s4 + $0xcd4] sm:$0xf] }
 0x896   : > { %v4052_v5 = vrot.slane %v4050_v55, 1  ;;  %4875 = vmatpush.bf16.msrb.mxu0 %v7944_v17  ;;  %v8960_v55 = vld [vmem:[%s13147_s4 + $0xda4] sm:$0xf]  ;;  %v8020_v56 = vor.u32 %v8929_v50, %v8019_v49  ;;  %v8061_v17 = vld [vmem:[%s13147_s4 + $0xcf8] sm:$0xf0] }
 0x897   : > { %v4059_v8 = vrot.slane %v4057_v10, 1  ;;  %4863 = vmatmul.bf16.vlgmr.msra.gmra.mxu3 %v12472_v33  ;;  %v8084_v10 = vor.u32 %v8945_v51, %v8083_v41  ;;  %v8152_v0 = vor.u32 %v8960_v55, %v8149_v3  ;;  %v8045_v48 = vld [vmem:[%s13147_s4 + $0xcd8] sm:$0xf0]  ;;  %v8491_v41 = vld [vmem:[%s13147_s4 + $0x11d0] sm:$0xf] }
 0x898   : > { %v12433_v40 = vor.u32 %v4052_v5, %v4048_v63  ;;  %4907 = vmatpush.bf16.msrb.mxu3 %v8192_v21  ;;  %v8075_v63 = vld [vmem:[%s13147_s4 + $0xd10] sm:$0xf]  ;;  %v8943_v5 = vld [vmem:[%s13147_s4 + $0xd14] sm:$0xf0]  ;;  %v8109_v49 = vld [vmem:[%s13147_s4 + $0xd58] sm:$0xf0]  ;;  %v8048_v55 = vor.u32 %v8934_v44, %v8045_v48 }
 0x899   : > { %v4060_v19 = vor.u32 %v4059_v8, %v4055_v1  ;;  %4876 = vmatmul.bf16.vlgmr.msrb.gmra.mxu0 %v12363_v2  ;;  %v8949_v2 = vld [vmem:[%s13147_s4 + $0xd44] sm:$0xf0]  ;;  %v8012_v1 = vor.u32 %v8927_v58, %v8011_v30  ;;  %v8003_v8 = vld [vmem:[%s13147_s4 + $0xc80] sm:$0xf]  ;;  %v9051_v21 = vld [vmem:[%s13147_s4 + $0x1074] sm:$0xf0] }
 0x89a   : > { %4413 = vmatmul.bf16.vlgmr.msra.gmra.mxu1 %v12433_v40  ;;  %v8100_v29 = vor.u32 %v8949_v2, %v8099_v57  ;;  %v3892_v57 = vld [vmem:[#allocation2 + $0x10] sm:$0xff]  ;;  %v8952_v2 = vld [vmem:[%s13147_s4 + $0xd64] sm:$0xf]  ;;  %v9095_v51 = vld [vmem:[%s13147_s4 + $0x11d4] sm:$0xf0] }
 0x89b   : > { %4426 = vmatmul.bf16.vlgmr.msra.gmra.mxu2 %v4060_v19  ;;  %4829 = vmatpush.bf16.msra.mxu1 %v8060_v45  ;;  %v8925_v45 = vld [vmem:[%s13147_s4 + $0xc84] sm:$0xf0]  ;;  %v12620_v43 = vpack.c.bf16 %v3892_v57, %v3892_v57  ;;  %v8291_v3 = vld [vmem:[%s13147_s4 + $0x1040] sm:$0xf]  ;;  %v8932_v30 = vld [vmem:[%s13147_s4 + $0xcc4] sm:$0xf] }
 0x89c   : > { %4842 = vmatpush.bf16.msra.mxu2 %v8124_v13  ;;  %4908 = vmatpush.bf16.msrb.mxu3 %v8184_v11  ;;  %v8076_v13 = vor.u32 %v8943_v5, %v8075_v63  ;;  %v8004_v28 = vor.u32 %v8925_v45, %v8003_v8  ;;  %v8064_v11 = vor.u32 %v8938_v16, %v8061_v17  ;;  %v8037_v58 = vld [vmem:[%s13147_s4 + $0xcc8] sm:$0xf0]  ;;  %v8283_v8 = vld [vmem:[%s13147_s4 + $0x1030] sm:$0xf]  ;;  %v9043_v45 = vld [vmem:[%s13147_s4 + $0x1034] sm:$0xf0] }
 0x89d   : > { %v8101_v63 = vld [vmem:[%s13147_s4 + $0xd48] sm:$0xf0]  ;;  %v8492_v5 = vor.u32 %v9095_v51, %v8491_v41  ;;  %v8946_v16 = vld [vmem:[%s13147_s4 + $0xd34] sm:$0xf]  ;;  %v8093_v17 = vld [vmem:[%s13147_s4 + $0xd38] sm:$0xf0] }
 0x89e   : > { %v8021_v18 = vld [vmem:[%s13147_s4 + $0xca8] sm:$0xf0]  ;;  %v8944_v9 = vld [vmem:[%s13147_s4 + $0xd24] sm:$0xf]  ;;  %v8467_v31 = vld [vmem:[%s13147_s4 + $0x11a0] sm:$0xf] }
 0x89f   : > { %4830 = vmatpush.bf16.msra.mxu1 %v8052_v25  ;;  %v8133_v25 = vld [vmem:[%s13147_s4 + $0xd88] sm:$0xf0]  ;;  %v8926_v57 = vld [vmem:[%s13147_s4 + $0xc94] sm:$0xf]  ;;  %v8940_v48 = vld [vmem:[%s13147_s4 + $0xd04] sm:$0xf] }
 0x8a0   : > { %4843 = vmatpush.bf16.msra.mxu2 %v8116_v46  ;;  %4909 = vmatpush.bf16.msrb.mxu3 %v8176_v59  ;;  %v8316_v46 = vor.u32 %v9051_v21, %v8315_v20  ;;  %v8117_v59 = vld [vmem:[%s13147_s4 + $0xd68] sm:$0xf0]  ;;  %v9091_v20 = vld [vmem:[%s13147_s4 + $0x11b4] sm:$0xf0]  ;;  %v8284_v21 = vor.u32 %v9043_v45, %v8283_v8  ;;  %v8379_v41 = vld [vmem:[%s13147_s4 + $0x10f0] sm:$0xf] }
 0x8a1   : > { %v9067_v51 = vld [vmem:[%s13147_s4 + $0x10f4] sm:$0xf0]  ;;  %v8371_v8 = vld [vmem:[%s13147_s4 + $0x10e0] sm:$0xf] }
 0x8a2   : > { %5329 = vmatpush.bf16.msra.mxu0 %v8316_v46  ;;  %v8096_v46 = vor.u32 %v8946_v16, %v8093_v17  ;;  %v8309_v16 = vld [vmem:[%s13147_s4 + $0x1068] sm:$0xf0]  ;;  %v8435_v17 = vld [vmem:[%s13147_s4 + $0x1160] sm:$0xf] }
 0x8a3   : > { %4831 = vmatpush.bf16.msra.mxu1 %v8044_v34  ;;  %v8053_v34 = vld [vmem:[%s13147_s4 + $0xce8] sm:$0xf0] }
 0x8a4   : > { %4844 = vmatpush.bf16.msra.mxu2 %v8108_v12  ;;  %4910 = vmatpush.bf16.msrb.mxu3 %v8168_v47  ;;  %v8136_v12 = vor.u32 %v8956_v22, %v8133_v25  ;;  %v8056_v7 = vor.u32 %v8936_v26, %v8053_v34  ;;  %v8120_v47 = vor.u32 %v8952_v2, %v8117_v59  ;;  %v8275_v22 = vld [vmem:[%s13147_s4 + $0x1020] sm:$0xf]  ;;  %v9041_v25 = vld [vmem:[%s13147_s4 + $0x1024] sm:$0xf0]  ;;  %v8013_v2 = vld [vmem:[%s13147_s4 + $0xc98] sm:$0xf0] }
 0x8a5   : > { %v9089_v26 = vld [vmem:[%s13147_s4 + $0x11a4] sm:$0xf0]  ;;  %v8942_v59 = vld [vmem:[%s13147_s4 + $0xd14] sm:$0xf]  ;;  %v8016_v44 = vor.u32 %v8926_v57, %v8013_v2  ;;  %v8493_v2 = vld [vmem:[%s13147_s4 + $0x11d8] sm:$0xf0] }
 0x8a7   : > { %4832 = vmatpush.bf16.msra.mxu1 %v8036_v62  ;;  %v9097_v62 = vld [vmem:[%s13147_s4 + $0x11e4] sm:$0xf0] }
 0x8a8   : > { %4845 = vmatpush.bf16.msra.mxu2 %v8100_v29  ;;  %4911 = vmatpush.bf16.msrb.mxu3 %v8160_v54  ;;  %v8308_v29 = vor.u32 %v9049_v42, %v8307_v36  ;;  %v8500_v50 = vor.u32 %v9097_v62, %v8499_v38  ;;  %v9039_v36 = vld [vmem:[%s13147_s4 + $0x1014] sm:$0xf0]  ;;  %v8468_v38 = vor.u32 %v9089_v26, %v8467_v31  ;;  %v8924_v62 = vld [vmem:[%s13147_s4 + $0xc84] sm:$0xf]  ;;  %v9046_v26 = vld [vmem:[%s13147_s4 + $0x1054] sm:$0xf] }
 0x8a9   : > { %v4927_v31 = vld [vmem:[#allocation2 + $0x38] sm:$0x3] }
 0x8aa   : > { %4465 = vmatmul.bf16.vlgmr.msrb.gmra.mxu1 %v12433_v40  ;;  %v8067_v40 = vld [vmem:[%s13147_s4 + $0xd00] sm:$0xf]  ;;  %5330 = vmatpush.bf16.msra.mxu0 %v8308_v29  ;;  %v8005_v29 = vld [vmem:[%s13147_s4 + $0xc88] sm:$0xf0] }
 0x8ab   : > { %4478 = vmatmul.bf16.vlgmr.msrb.gmra.mxu2 %v4060_v19  ;;  %4833 = vmatpush.bf16.msra.mxu1 %v8028_v35  ;;  %v8954_v19 = vld [vmem:[%s13147_s4 + $0xd74] sm:$0xf]  ;;  %v8068_v27 = vor.u32 %v8941_v15, %v8067_v40  ;;  %v9047_v35 = vld [vmem:[%s13147_s4 + $0x1054] sm:$0xf0]  ;;  %v8029_v15 = vld [vmem:[%s13147_s4 + $0xcb8] sm:$0xf0] }
 0x8ac   : > { %4846 = vmatpush.bf16.msra.mxu2 %v8092_v14  ;;  %4912 = vmatpush.bf16.msrb.mxu3 %v8152_v0  ;;  %v8128_v32 = vor.u32 %v8954_v19, %v8125_v24  ;;  %v8950_v14 = vld [vmem:[%s13147_s4 + $0xd54] sm:$0xf]  ;;  %v8300_v54 = vor.u32 %v9047_v35, %v8299_v23  ;;  %v8483_v0 = vld [vmem:[%s13147_s4 + $0x11c0] sm:$0xf]  ;;  %v9087_v23 = vld [vmem:[%s13147_s4 + $0x1194] sm:$0xf0] }
 0x8ad   : > { %v8484_v19 = vor.u32 %v9093_v4, %v8483_v0  ;;  %v8259_v35 = vld [vmem:[%s13147_s4 + $0x1000] sm:$0xf]  ;;  %v8509_v0 = vld [vmem:[%s13147_s4 + $0x11f8] sm:$0xf0] }
 0x8ae   : > { %5331 = vmatpush.bf16.msra.mxu0 %v8300_v54  ;;  %v8443_v54 = vld [vmem:[%s13147_s4 + $0x1170] sm:$0xf] }
 0x8af   : > { %4834 = vmatpush.bf16.msra.mxu1 %v8020_v56  ;;  %v9045_v56 = vld [vmem:[%s13147_s4 + $0x1044] sm:$0xf0] }
 0x8b0   : > { %4847 = vmatpush.bf16.msra.mxu2 %v8084_v10  ;;  %4913 = vmatpush.bf16.msrb.mxu3 %v8144_v6  ;;  %v8112_v10 = vor.u32 %v8950_v14, %v8109_v49  ;;  %v8292_v52 = vor.u32 %v9045_v56, %v8291_v3  ;;  %v8475_v6 = vld [vmem:[%s13147_s4 + $0x11b0] sm:$0xf]  ;;  %v9037_v14 = vld [vmem:[%s13147_s4 + $0x1004] sm:$0xf0]  ;;  %v9050_v3 = vld [vmem:[%s13147_s4 + $0x1074] sm:$0xf] }
 0x8b1   : > { %v8317_v56 = vld [vmem:[%s13147_s4 + $0x1078] sm:$0xf0] }
 0x8b2   : > { %5332 = vmatpush.bf16.msra.mxu0 %v8292_v52  ;;  %v8320_v4 = vor.u32 %v9050_v3, %v8317_v56  ;;  %v9059_v3 = vld [vmem:[%s13147_s4 + $0x10b4] sm:$0xf0]  ;;  %v8411_v56 = vld [vmem:[%s13147_s4 + $0x1130] sm:$0xf] }
 0x8b3   : > { %4835 = vmatpush.bf16.msra.mxu1 %v8012_v1  ;;  %v8040_v1 = vor.u32 %v8932_v30, %v8037_v58  ;;  %v8451_v30 = vld [vmem:[%s13147_s4 + $0x1180] sm:$0xf]  ;;  %v9085_v58 = vld [vmem:[%s13147_s4 + $0x1184] sm:$0xf0] }
 0x8b4   : > { %4848 = vmatpush.bf16.msra.mxu2 %v8076_v13  ;;  %4914 = vmatpush.bf16.msrb.mxu3 %v8136_v12  ;;  %v8930_v13 = vld [vmem:[%s13147_s4 + $0xcb4] sm:$0xf]  ;;  %v8267_v12 = vld [vmem:[%s13147_s4 + $0x1010] sm:$0xf] }
 0x8b5   : > { %v8032_v24 = vor.u32 %v8930_v13, %v8029_v15  ;;  %v8452_v13 = vor.u32 %v9085_v58, %v8451_v30  ;;  %v9048_v15 = vld [vmem:[%s13147_s4 + $0x1064] sm:$0xf]  ;;  %v12888_v58 = vpop.f32.mrf.mxu0 }
 0x8b6   : > { %5333 = vmatpush.bf16.msra.mxu0 %v8284_v21  ;;  %v8501_v21 = vld [vmem:[%s13147_s4 + $0x11e8] sm:$0xf0] }
 0x8b7   : > { %4836 = vmatpush.bf16.msra.mxu1 %v8004_v28  ;;  %4915 = vmatmul.bf16.vlgmr.msrb.gmra.mxu3 %v12472_v33  ;;  %v8948_v33 = vld [vmem:[%s13147_s4 + $0xd44] sm:$0xf] }
 0x8b8   : > { %4849 = vmatpush.bf16.msra.mxu2 %v8068_v27  ;;  %5368 = vmatpush.bf16.msra.mxu3 %v8508_v37  ;;  %v8104_v40 = vor.u32 %v8948_v33, %v8101_v63  ;;  %v8928_v28 = vld [vmem:[%s13147_s4 + $0xca4] sm:$0xf]  ;;  %v8085_v27 = vld [vmem:[%s13147_s4 + $0xd28] sm:$0xf0]  ;;  %v8077_v37 = vld [vmem:[%s13147_s4 + $0xd18] sm:$0xf0]  ;;  %v8260_v33 = vor.u32 %v9037_v14, %v8259_v35  ;;  %v8008_v63 = vor.u32 %v8924_v62, %v8005_v29 }
 0x8b9   : > { %v8024_v34 = vor.u32 %v8928_v28, %v8021_v18  ;;  %v8088_v42 = vor.u32 %v8944_v9, %v8085_v27  ;;  %v8080_v49 = vor.u32 %v8942_v59, %v8077_v37  ;;  %v8363_v28 = vld [vmem:[%s13147_s4 + $0x10d0] sm:$0xf]  ;;  %v9063_v18 = vld [vmem:[%s13147_s4 + $0x10d4] sm:$0xf0]  ;;  %v8355_v29 = vld [vmem:[%s13147_s4 + $0x10c0] sm:$0xf] }
 0x8ba   : > { %4837 = vmatmul.bf16.vlgmr.msra.gmra.mxu1 %v12615_v39  ;;  %v4923_v27 = vld [vmem:[#allocation2 + $0x18] sm:$0xfc]  ;;  %v8364_v37 = vor.u32 %v9063_v18, %v8363_v28  ;;  %v9092_v35 = vld [vmem:[%s13147_s4 + $0x11c4] sm:$0xf]  ;;  %v8485_v14 = vld [vmem:[%s13147_s4 + $0x11c8] sm:$0xf0] }
 0x8bb   : > { %4881 = vmatpush.bf16.msrb.mxu1 %v8064_v11  ;;  %4850 = vmatmul.bf16.vlgmr.msra.gmra.mxu2 %v12620_v43  ;;  %v8476_v11 = vor.u32 %v9091_v20, %v8475_v6  ;;  %v9096_v20 = vld [vmem:[%s13147_s4 + $0x11e4] sm:$0xf]  ;;  %v4931_v57 = vpack.c.bf16 %v4927_v31, %v4923_v27  ;;  %v8488_v30 = vor.u32 %v9092_v35, %v8485_v14  ;;  %v9071_v28 = vld [vmem:[%s13147_s4 + $0x1114] sm:$0xf0]  ;;  %v9086_v27 = vld [vmem:[%s13147_s4 + $0x1194] sm:$0xf] }
 0x8bc   : > { %4894 = vmatpush.bf16.msrb.mxu2 %v8128_v32  ;;  %5369 = vmatpush.bf16.msra.mxu3 %v8500_v50  ;;  %v8276_v32 = vor.u32 %v9041_v25, %v8275_v22  ;;  %v8069_v50 = vld [vmem:[%s13147_s4 + $0xd08] sm:$0xf0]  ;;  %v4920_v22 = vld [vmem:[#allocation2] sm:$0xfc]  ;;  %v4924_v25 = vld [vmem:[#allocation2 + $0x20] sm:$0x3] }
 0x8bd   : > { %v8072_v52 = vor.u32 %v8940_v48, %v8069_v50  ;;  %v4928_v9 = vpack.c.bf16 %v4924_v25, %v4920_v22  ;;  %v8331_v22 = vld [vmem:[%s13147_s4 + $0x1090] sm:$0xf]  ;;  %v9055_v25 = vld [vmem:[%s13147_s4 + $0x1094] sm:$0xf0]  ;;  %v8453_v35 = vld [vmem:[%s13147_s4 + $0x1188] sm:$0xf0] }
 0x8be   : > { %5334 = vmatpush.bf16.msra.mxu0 %v8276_v32  ;;  %v8301_v32 = vld [vmem:[%s13147_s4 + $0x1058] sm:$0xf0] }
 0x8bf   : > { %4882 = vmatpush.bf16.msrb.mxu1 %v8056_v7  ;;  %v8459_v7 = vld [vmem:[%s13147_s4 + $0x1190] sm:$0xf]  ;;  %v8304_v59 = vor.u32 %v9046_v26, %v8301_v32  ;;  %v8332_v26 = vor.u32 %v9055_v25, %v8331_v22  ;;  %v8323_v32 = vld [vmem:[%s13147_s4 + $0x1080] sm:$0xf]  ;;  %v9074_v22 = vld [vmem:[%s13147_s4 + $0x1134] sm:$0xf] }
 0x8c0   : > { %4895 = vmatpush.bf16.msrb.mxu2 %v8120_v47  ;;  %5370 = vmatpush.bf16.msra.mxu3 %v8492_v5  ;;  %v8268_v47 = vor.u32 %v9039_v36, %v8267_v12  ;;  %v9098_v5 = vld [vmem:[%s13147_s4 + $0x11f4] sm:$0xf]  ;;  %v9079_v12 = vld [vmem:[%s13147_s4 + $0x1154] sm:$0xf0]  ;;  %v8504_v36 = vor.u32 %v9096_v20, %v8501_v21  ;;  %v8269_v21 = vld [vmem:[%s13147_s4 + $0x1018] sm:$0xf0] }
 0x8c1   : > { %v8512_v6 = vor.u32 %v9098_v5, %v8509_v0  ;;  %v9038_v20 = vld [vmem:[%s13147_s4 + $0x1014] sm:$0xf]  ;;  %v8413_v25 = vld [vmem:[%s13147_s4 + $0x1138] sm:$0xf0] }
 0x8c2   : > { %5335 = vmatpush.bf16.msra.mxu0 %v8268_v47  ;;  %v8419_v47 = vld [vmem:[%s13147_s4 + $0x1140] sm:$0xf]  ;;  %v8272_v31 = vor.u32 %v9038_v20, %v8269_v21  ;;  %v9058_v21 = vld [vmem:[%s13147_s4 + $0x10b4] sm:$0xf] }
 0x8c3   : > { %4883 = vmatpush.bf16.msrb.mxu1 %v8048_v55  ;;  %v8460_v55 = vor.u32 %v9087_v23, %v8459_v7  ;;  %v9061_v7 = vld [vmem:[%s13147_s4 + $0x10c4] sm:$0xf0]  ;;  %v8293_v23 = vld [vmem:[%s13147_s4 + $0x1048] sm:$0xf0] }
 0x8c4   : > { %4896 = vmatpush.bf16.msrb.mxu2 %v8112_v10  ;;  %5371 = vmatpush.bf16.msra.mxu3 %v8484_v19  ;;  %v9083_v10 = vld [vmem:[%s13147_s4 + $0x1174] sm:$0xf0]  ;;  %v9081_v19 = vld [vmem:[%s13147_s4 + $0x1164] sm:$0xf0]  ;;  %v8356_v50 = vor.u32 %v9061_v7, %v8355_v29  ;;  %v9066_v29 = vld [vmem:[%s13147_s4 + $0x10f4] sm:$0xf] }
 0x8c5   : > { %v8444_v45 = vor.u32 %v9083_v10, %v8443_v54  ;;  %v9075_v10 = vld [vmem:[%s13147_s4 + $0x1134] sm:$0xf0]  ;;  %v8381_v7 = vld [vmem:[%s13147_s4 + $0x10f8] sm:$0xf0] }
 0x8c6   : > { %5336 = vmatpush.bf16.msra.mxu0 %v8260_v33  ;;  %v9090_v33 = vld [vmem:[%s13147_s4 + $0x11b4] sm:$0xf] }
 0x8c7   : > { %4884 = vmatpush.bf16.msrb.mxu1 %v8040_v1  ;;  %v8380_v1 = vor.u32 %v9067_v51, %v8379_v41  ;;  %v9042_v41 = vld [vmem:[%s13147_s4 + $0x1034] sm:$0xf]  ;;  %v8285_v51 = vld [vmem:[%s13147_s4 + $0x1038] sm:$0xf0] }
 0x8c8   : > { %4897 = vmatpush.bf16.msrb.mxu2 %v8104_v40  ;;  %5372 = vmatpush.bf16.msra.mxu3 %v8476_v11  ;;  %v9065_v40 = vld [vmem:[%s13147_s4 + $0x10e4] sm:$0xf0]  ;;  %v8436_v11 = vor.u32 %v9081_v19, %v8435_v17  ;;  %v8288_v5 = vor.u32 %v9042_v41, %v8285_v51  ;;  %v8469_v17 = vld [vmem:[%s13147_s4 + $0x11a8] sm:$0xf0]  ;;  %v8384_v41 = vor.u32 %v9066_v29, %v8381_v7 }
 0x8c9   : > { %v8389_v29 = vld [vmem:[%s13147_s4 + $0x1108] sm:$0xf0] }
 0x8ca   : > { %5381 = vmatpush.bf16.msrb.mxu0 %v8320_v4  ;;  %v9040_v4 = vld [vmem:[%s13147_s4 + $0x1024] sm:$0xf] }
 0x8cb   : > { %4885 = vmatpush.bf16.msrb.mxu1 %v8032_v24  ;;  %v8312_v24 = vor.u32 %v9048_v15, %v8309_v16  ;;  %v9088_v16 = vld [vmem:[%s13147_s4 + $0x11a4] sm:$0xf] }
 0x8cc   : > { %4898 = vmatpush.bf16.msrb.mxu2 %v8096_v46  ;;  %5373 = vmatpush.bf16.msra.mxu3 %v8468_v38  ;;  %v8372_v46 = vor.u32 %v9065_v40, %v8371_v8  ;;  %v12843_v38 = vrot.slane %v4931_v57, 1  ;;  %v8339_v8 = vld [vmem:[%s13147_s4 + $0x10a0] sm:$0xf]  ;;  %v8472_v18 = vor.u32 %v9088_v16, %v8469_v17  ;;  %v8261_v57 = vld [vmem:[%s13147_s4 + $0x1008] sm:$0xf0] }
 0x8cd   : > { %v8403_v40 = vld [vmem:[%s13147_s4 + $0x1120] sm:$0xf]  ;;  %v9060_v16 = vld [vmem:[%s13147_s4 + $0x10c4] sm:$0xf]  ;;  %v8357_v17 = vld [vmem:[%s13147_s4 + $0x10c8] sm:$0xf0] }
 0x8ce   : > { %5382 = vmatpush.bf16.msrb.mxu0 %v8312_v24 }
 0x8cf   : > { %4886 = vmatpush.bf16.msrb.mxu1 %v8024_v34  ;;  %v8427_v34 = vld [vmem:[%s13147_s4 + $0x1150] sm:$0xf] }
 0x8d0   : > { %4899 = vmatpush.bf16.msrb.mxu2 %v8088_v42  ;;  %5374 = vmatpush.bf16.msra.mxu3 %v8460_v55  ;;  %v12833_v42 = vrot.slane %v4928_v9, 1  ;;  %v8428_v62 = vor.u32 %v9079_v12, %v8427_v34  ;;  %v8347_v55 = vld [vmem:[%s13147_s4 + $0x10b0] sm:$0xf]  ;;  %v4403_v9 = vpop.f32.mrf.mxu0  ;;  %v4921_v34 = vld [vmem:[#allocation2 + $0x8] sm:$0xfc] }
 0x8d1   : > { %v8348_v0 = vor.u32 %v9059_v3, %v8347_v55  ;;  %v4925_v12 = vld [vmem:[#allocation2 + $0x28] sm:$0x3]  ;;  %v9064_v3 = vld [vmem:[%s13147_s4 + $0x10e4] sm:$0xf]  ;;  %v8341_v9 = vld [vmem:[%s13147_s4 + $0x10a8] sm:$0xf0] }
 0x8d2   : > { %5337 = vmatmul.bf16.vlgmr.msra.gmra.mxu0 %v12833_v42  ;;  %v4929_v51 = vpack.c.bf16 %v4925_v12, %v4921_v34  ;;  %v9054_v34 = vld [vmem:[%s13147_s4 + $0x1094] sm:$0xf]  ;;  %v8333_v12 = vld [vmem:[%s13147_s4 + $0x1098] sm:$0xf0] }
 0x8d3   : > { %4887 = vmatpush.bf16.msrb.mxu1 %v8016_v44  ;;  %v9077_v44 = vld [vmem:[%s13147_s4 + $0x1144] sm:$0xf0]  ;;  %5383 = vmatpush.bf16.msrb.mxu0 %v8304_v59  ;;  %v8387_v59 = vld [vmem:[%s13147_s4 + $0x1100] sm:$0xf] }
 0x8d4   : > { %4900 = vmatpush.bf16.msrb.mxu2 %v8080_v49  ;;  %5375 = vmatpush.bf16.msra.mxu3 %v8452_v13  ;;  %v8420_v54 = vor.u32 %v9077_v44, %v8419_v47  ;;  %v9073_v13 = vld [vmem:[%s13147_s4 + $0x1124] sm:$0xf0]  ;;  %v8445_v44 = vld [vmem:[%s13147_s4 + $0x1178] sm:$0xf0] }
 0x8d5   : > { %v8404_v24 = vor.u32 %v9073_v13, %v8403_v40  ;;  %v8429_v40 = vld [vmem:[%s13147_s4 + $0x1158] sm:$0xf0] }
 0x8d7   : > { %4888 = vmatpush.bf16.msrb.mxu1 %v8008_v63  ;;  %5376 = vmatmul.bf16.vlgmr.msra.gmra.mxu3 %v12843_v38  ;;  %v8477_v63 = vld [vmem:[%s13147_s4 + $0x11b8] sm:$0xf0] }
 0x8d8   : > { %4901 = vmatpush.bf16.msrb.mxu2 %v8072_v52  ;;  %5420 = vmatpush.bf16.msrb.mxu3 %v8512_v6  ;;  %v8277_v52 = vld [vmem:[%s13147_s4 + $0x1028] sm:$0xf0]  ;;  %v8480_v15 = vor.u32 %v9090_v33, %v8477_v63  ;;  %v12992_v63 = vrot.slane %v4929_v51, 1 }
 0x8d9   : > { %v8280_v19 = vor.u32 %v9040_v4, %v8277_v52  ;;  %v8437_v33 = vld [vmem:[%s13147_s4 + $0x1168] sm:$0xf0] }
 0x8da   : > { %4889 = vmatmul.bf16.vlgmr.msrb.gmra.mxu1 %v12615_v39  ;;  %v9094_v39 = vld [vmem:[%s13147_s4 + $0x11d4] sm:$0xf] }
 0x8db   : > { %5342 = vmatpush.bf16.msra.mxu1 %v8380_v1  ;;  %4902 = vmatmul.bf16.vlgmr.msrb.gmra.mxu2 %v12620_v43  ;;  %v9044_v43 = vld [vmem:[%s13147_s4 + $0x1044] sm:$0xf]  ;;  %v8496_v48 = vor.u32 %v9094_v39, %v8493_v2  ;;  %v8412_v1 = vor.u32 %v9075_v10, %v8411_v56  ;;  %v9053_v2 = vld [vmem:[%s13147_s4 + $0x1084] sm:$0xf0]  ;;  %v8373_v56 = vld [vmem:[%s13147_s4 + $0x10e8] sm:$0xf0] }
 0x8dc   : > { %5355 = vmatpush.bf16.msra.mxu2 %v8444_v45  ;;  %5421 = vmatpush.bf16.msrb.mxu3 %v8504_v36  ;;  %v8296_v49 = vor.u32 %v9044_v43, %v8293_v23  ;;  %v9057_v45 = vld [vmem:[%s13147_s4 + $0x10a4] sm:$0xf0]  ;;  %v9036_v36 = vld [vmem:[%s13147_s4 + $0x1004] sm:$0xf]  ;;  %v4922_v43 = vld [vmem:[#allocation2 + $0x10] sm:$0xfc] }
 0x8dd   : > { %v8340_v6 = vor.u32 %v9057_v45, %v8339_v8  ;;  %v9082_v23 = vld [vmem:[%s13147_s4 + $0x1174] sm:$0xf]  ;;  %v8264_v14 = vor.u32 %v9036_v36, %v8261_v57  ;;  %v8365_v8 = vld [vmem:[%s13147_s4 + $0x10d8] sm:$0xf0] }
 0x8de   : > { %5384 = vmatpush.bf16.msrb.mxu0 %v8296_v49  ;;  %v8324_v49 = vor.u32 %v9053_v2, %v8323_v32  ;;  %v9078_v45 = vld [vmem:[%s13147_s4 + $0x1154] sm:$0xf]  ;;  %v8397_v57 = vld [vmem:[%s13147_s4 + $0x1118] sm:$0xf0]  ;;  %v8336_v2 = vor.u32 %v9054_v34, %v8333_v12  ;;  %v8513_v34 = vld [vmem:[%s13148_s5 + $0x4] sm:$0x3] }
 0x8df   : > { %5343 = vmatpush.bf16.msra.mxu1 %v8372_v46  ;;  %v8395_v46 = vld [vmem:[%s13147_s4 + $0x1110] sm:$0xf]  ;;  %v9070_v36 = vld [vmem:[%s13147_s4 + $0x1114] sm:$0xf] }
 0x8e0   : > { %5356 = vmatpush.bf16.msra.mxu2 %v8436_v11  ;;  %5422 = vmatpush.bf16.msrb.mxu3 %v8496_v48  ;;  %v8461_v11 = vld [vmem:[%s13147_s4 + $0x1198] sm:$0xf0]  ;;  %v8396_v39 = vor.u32 %v9071_v28, %v8395_v46  ;;  %v9084_v48 = vld [vmem:[%s13147_s4 + $0x1184] sm:$0xf]  ;;  %v8416_v28 = vor.u32 %v9074_v22, %v8413_v25 }
 0x8e1   : > { %v8464_v47 = vor.u32 %v9086_v27, %v8461_v11  ;;  %v8456_v10 = vor.u32 %v9084_v48, %v8453_v35  ;;  %v9072_v27 = vld [vmem:[%s13147_s4 + $0x1124] sm:$0xf]  ;;  %v8405_v11 = vld [vmem:[%s13147_s4 + $0x1128] sm:$0xf0] }
 0x8e2   : > { %5385 = vmatpush.bf16.msrb.mxu0 %v8288_v5  ;;  %v8376_v5 = vor.u32 %v9064_v3, %v8373_v56  ;;  %v8408_v32 = vor.u32 %v9072_v27, %v8405_v11 }
 0x8e3   : > { %5344 = vmatpush.bf16.msra.mxu1 %v8364_v37  ;;  %v9069_v37 = vld [vmem:[%s13147_s4 + $0x1104] sm:$0xf0] }
 0x8e4   : > { %5357 = vmatpush.bf16.msra.mxu2 %v8428_v62  ;;  %5423 = vmatpush.bf16.msrb.mxu3 %v8488_v30  ;;  %v4926_v62 = vld [vmem:[#allocation2 + $0x30] sm:$0x3]  ;;  %v9080_v30 = vld [vmem:[%s13147_s4 + $0x1164] sm:$0xf] }
 0x8e5   : > { %v4930_v55 = vpack.c.bf16 %v4926_v62, %v4922_v43  ;;  %v8440_v52 = vor.u32 %v9080_v30, %v8437_v33  ;;  %v8325_v43 = vld [vmem:[%s13147_s4 + $0x1088] sm:$0xf0]  ;;  %v9068_v62 = vld [vmem:[%s13147_s4 + $0x1104] sm:$0xf] }
 0x8e6   : > { %5386 = vmatpush.bf16.msrb.mxu0 %v8280_v19  ;;  %v8421_v19 = vld [vmem:[%s13147_s4 + $0x1148] sm:$0xf0] }
 0x8e7   : > { %5345 = vmatpush.bf16.msra.mxu1 %v8356_v50  ;;  %v8388_v50 = vor.u32 %v9069_v37, %v8387_v59  ;;  %v12996_v4 = vrot.slane %v4930_v55, 1  ;;  %v8400_v59 = vor.u32 %v9070_v36, %v8397_v57  ;;  %v9052_v37 = vld [vmem:[%s13147_s4 + $0x1084] sm:$0xf] }
 0x8e8   : > { %5358 = vmatpush.bf16.msra.mxu2 %v8420_v54  ;;  %5424 = vmatpush.bf16.msrb.mxu3 %v8480_v15  ;;  %v8448_v54 = vor.u32 %v9082_v23, %v8445_v44  ;;  %v8432_v15 = vor.u32 %v9078_v45, %v8429_v40  ;;  %v8328_v23 = vor.u32 %v9052_v37, %v8325_v43 }
 0x8ea   : > { %5387 = vmatpush.bf16.msrb.mxu0 %v8272_v31 }
 0x8eb   : > { %5346 = vmatpush.bf16.msra.mxu1 %v8348_v0  ;;  %v12994_v0 = vpop.f32.mrf.mxu0 }
 0x8ec   : > { %5359 = vmatpush.bf16.msra.mxu2 %v8412_v1  ;;  %5425 = vmatpush.bf16.msrb.mxu3 %v8472_v18  ;;  %v9062_v1 = vld [vmem:[%s13147_s4 + $0x10d4] sm:$0xf]  ;;  %v9056_v18 = vld [vmem:[%s13147_s4 + $0x10a4] sm:$0xf] }
 0x8ed   : > { %v8368_v13 = vor.u32 %v9062_v1, %v8365_v8 }
 0x8ee   : > { %5388 = vmatpush.bf16.msrb.mxu0 %v8264_v14 }
 0x8ef   : > { %5347 = vmatpush.bf16.msra.mxu1 %v8340_v6 }
 0x8f0   : > { %5360 = vmatpush.bf16.msra.mxu2 %v8404_v24  ;;  %5426 = vmatpush.bf16.msrb.mxu3 %v8464_v47  ;;  %v8349_v24 = vld [vmem:[%s13147_s4 + $0x10b8] sm:$0xf0]  ;;  %v8392_v47 = vor.u32 %v9068_v62, %v8389_v29 }
 0x8f1   : > { %5389 = vmatmul.bf16.vlgmr.msrb.gmra.mxu0 %v12833_v42  ;;  %v9076_v42 = vld [vmem:[%s13147_s4 + $0x1144] sm:$0xf]  ;;  %v8352_v46 = vor.u32 %v9058_v21, %v8349_v24 }
 0x8f2   : > { %v8424_v20 = vor.u32 %v9076_v42, %v8421_v19 }
 0x8f3   : > { %5348 = vmatpush.bf16.msra.mxu1 %v8332_v26  ;;  %v4455_v6 = vpop.f32.mrf.mxu0  ;;  %v8344_v26 = vor.u32 %v9056_v18, %v8341_v9 }
 0x8f4   : > { %5361 = vmatpush.bf16.msra.mxu2 %v8396_v39  ;;  %5427 = vmatpush.bf16.msrb.mxu3 %v8456_v10 }
 0x8f7   : > { %5349 = vmatpush.bf16.msra.mxu1 %v8324_v49  ;;  %5428 = vmatmul.bf16.vlgmr.msrb.gmra.mxu3 %v12843_v38  ;;  %v8360_v38 = vor.u32 %v9060_v16, %v8357_v17  ;;  %v4440_v31 = vpop.f32.mrf.mxu3 }
 0x8f8   : > { %5362 = vmatpush.bf16.msra.mxu2 %v8388_v50 }
 0x8fa   : > { %5350 = vmatmul.bf16.vlgmr.msra.gmra.mxu1 %v12992_v63 }
 0x8fb   : > { %5394 = vmatpush.bf16.msrb.mxu1 %v8384_v41  ;;  %5363 = vmatmul.bf16.vlgmr.msra.gmra.mxu2 %v12996_v4  ;;  %v4825_v39 = vpop.f32.mrf.mxu0 }
 0x8fc   : > { %5407 = vmatpush.bf16.msrb.mxu2 %v8448_v54 }
 0x8ff   : > { %5395 = vmatpush.bf16.msrb.mxu1 %v8376_v5  ;;  %v4442_v7 = vpop.f32.mrf.mxu3 }
 0x900   : > { %5408 = vmatpush.bf16.msrb.mxu2 %v8440_v52 }
 0x903   : > { %5396 = vmatpush.bf16.msrb.mxu1 %v8368_v13  ;;  %v4827_v44 = vpop.f32.mrf.mxu0 }
 0x904   : > { %5409 = vmatpush.bf16.msrb.mxu2 %v8432_v15 }
 0x907   : > { %5397 = vmatpush.bf16.msrb.mxu1 %v8360_v38 }
 0x908   : > { %5410 = vmatpush.bf16.msrb.mxu2 %v8424_v20  ;;  %v4492_v48 = vpop.f32.mrf.mxu3 }
 0x90b   : > { %5398 = vmatpush.bf16.msrb.mxu1 %v8352_v46 }
 0x90c   : > { %5411 = vmatpush.bf16.msrb.mxu2 %v8416_v28 }
 0x90f   : > { %5399 = vmatpush.bf16.msrb.mxu1 %v8344_v26 }
 0x910   : > { %5412 = vmatpush.bf16.msrb.mxu2 %v8408_v32  ;;  %v4494_v49 = vpop.f32.mrf.mxu3 }
 0x913   : > { %5400 = vmatpush.bf16.msrb.mxu1 %v8336_v2 }
 0x914   : > { %5413 = vmatpush.bf16.msrb.mxu2 %v8400_v59  ;;  %v5438_v59 = vperm.slane %v8513_v34, 0 }
 0x916   : > { %v4877_v50 = vpop.f32.mrf.mxu0 }
 0x917   : > { %5401 = vmatpush.bf16.msrb.mxu1 %v8328_v23  ;;  %v4414_v35 = vpop.f32.mrf.mxu1 }
 0x918   : > { %5414 = vmatpush.bf16.msrb.mxu2 %v8392_v47  ;;  %v4415_v14 = vadd.f32 %v4414_v35, %v12888_v58 }
 0x91a   : > { %5402 = vmatmul.bf16.vlgmr.msrb.gmra.mxu1 %v12992_v63  ;;  %v4864_v56 = vpop.f32.mrf.mxu3 }
 0x91b   : > { %5415 = vmatmul.bf16.vlgmr.msrb.gmra.mxu2 %v12996_v4 }
 0x91e   : > { %v4427_v41 = vpop.f32.mrf.mxu2  ;;  %v4879_v10 = vpop.f32.mrf.mxu0 }
 0x91f   : > { %v4428_v51 = vadd.f32 %v4427_v41, %v4415_v14  ;;  %v4416_v54 = vpop.f32.mrf.mxu1 }
 0x921   : > { %v4441_v55 = vadd.f32 %v4440_v31, %v4428_v51 }
 0x922   : > { %v4866_v52 = vpop.f32.mrf.mxu3 }
 0x923   : > { %v4826_v3 = vadd.f32 %v4825_v39, %v4441_v55  ;;  %v5439_v55 = vperm.slane %v8513_v34, 1 }
 0x926   : > { %v4429_v30 = vpop.f32.mrf.mxu2 }
 0x927   : > { %v4466_v33 = vpop.f32.mrf.mxu1 }
 0x928   : > { %v4467_v5 = vadd.f32 %v4466_v33, %v12994_v0 }
 0x92e   : > { %v4479_v63 = vpop.f32.mrf.mxu2 }
 0x92f   : > { %v4480_v1 = vadd.f32 %v4479_v63, %v4467_v5  ;;  %v4468_v4 = vpop.f32.mrf.mxu1 }
 0x931   : > { %v4493_v8 = vadd.f32 %v4492_v48, %v4480_v1 }
 0x933   : > { %v4878_v45 = vadd.f32 %v4877_v50, %v4493_v8 }
 0x936   : > { %v4481_v58 = vpop.f32.mrf.mxu2 }
 0x937   : > { %v4838_v40 = vpop.f32.mrf.mxu1 }
 0x938   : > { %v4839_v13 = vadd.f32 %v4838_v40, %v4826_v3 }
 0x93a   : > { %v4916_v42 = vpop.f32.mrf.mxu3 }
 0x93e   : > { %v4851_v15 = vpop.f32.mrf.mxu2 }
 0x93f   : > { %v4852_v16 = vadd.f32 %v4851_v15, %v4839_v13  ;;  %v4840_v17 = vpop.f32.mrf.mxu1 }
 0x941   : > { %v4865_v19 = vadd.f32 %v4864_v56, %v4852_v16 }
 0x942   : > { %v4918_v6 = vpop.f32.mrf.mxu3 }
 0x946   : > { %v4853_v38 = vpop.f32.mrf.mxu2 }
 0x94f   : > { %v5338_v21 = vpop.f32.mrf.mxu0 }
 0x957   : > { %v4890_v20 = vpop.f32.mrf.mxu1  ;;  %v5340_v28 = vpop.f32.mrf.mxu0 }
 0x958   : > { %v4891_v24 = vadd.f32 %v4890_v20, %v4878_v45 }
 0x95a   : > { %v5377_v18 = vpop.f32.mrf.mxu3 }
 0x95e   : > { %v4903_v0 = vpop.f32.mrf.mxu2 }
 0x95f   : > { %v4904_v22 = vadd.f32 %v4903_v0, %v4891_v24  ;;  %v4892_v25 = vpop.f32.mrf.mxu1 }
 0x961   : > { %v4917_v46 = vadd.f32 %v4916_v42, %v4904_v22 }
 0x962   : > { %v5379_v27 = vpop.f32.mrf.mxu3 }
 0x966   : > { %v4905_v9 = vpop.f32.mrf.mxu2 }
 0x96e   : > { %v5390_v31 = vpop.f32.mrf.mxu0 }
 0x976   : > { %v5392_v39 = vpop.f32.mrf.mxu0 }
 0x977   : > { %v5351_v11 = vpop.f32.mrf.mxu1 }
 0x978   : > { %v5352_v26 = vadd.f32 %v5351_v11, %v5338_v21 }
 0x97a   : > { %v5429_v57 = vpop.f32.mrf.mxu3 }
 0x97e   : > { %v5364_v32 = vpop.f32.mrf.mxu2 }
 0x97f   : > { %v5365_v12 = vadd.f32 %v5364_v32, %v5352_v26  ;;  %v5353_v36 = vpop.f32.mrf.mxu1 }
 0x981   : > { %v5378_v2 = vadd.f32 %v5377_v18, %v5365_v12 }
 0x982   : > { %v5431_v7 = vpop.f32.mrf.mxu3 }
 0x983   : > { %v5433_v37 = vadd.f32 %v5378_v2, %v4865_v19 }
 0x985   : > { %v5442_v43 = vadd.f32 %v5438_v59, %v5433_v37 }
 0x986   : > { %v5366_v62 = vpop.f32.mrf.mxu2 }
 0x987   : > { %v5444_v29 = vrot.slane %v5442_v43, 4 }
 0x989   : > { %v5445_v23 = vadd.f32 %v5444_v29, %v5442_v43 }
 0x98b   : > { %v5446_v47 = vrot.slane %v5445_v23, 2 }
 0x98d   : > { %v5447_v44 = vadd.f32 %v5446_v47, %v5445_v23 }
 0x98f   : > { %v5448_v48 = vrot.slane %v5447_v44, 1 }
 0x991   : > { %v5449_v35 = vadd.f32 %v5448_v48, %v5447_v44 }
 0x993   : > { %5456 = vrot.lane.b32.xlu0 %v5449_v35, %s9134_s14 }
 0x997   : > { %v5403_v14 = vpop.f32.mrf.mxu1 }
 0x998   : > { %v5404_v49 = vadd.f32 %v5403_v14, %v5390_v31 }
 0x99e   : > { %v5416_v50 = vpop.f32.mrf.mxu2 }
 0x99f   : > { %v5417_v41 = vadd.f32 %v5416_v50, %v5404_v49  ;;  %v5405_v51 = vpop.f32.mrf.mxu1 }
 0x9a1   : > { %v5430_v54 = vadd.f32 %v5429_v57, %v5417_v41 }
 0x9a3   : > { %v5434_v3 = vadd.f32 %v5430_v54, %v4917_v46 }
 0x9a5   : > { %v5443_v56 = vadd.f32 %v5439_v55, %v5434_v3 }
 0x9a6   : > { %v5418_v10 = vpop.f32.mrf.mxu2 }
 0x9a7   : > { %v5450_v30 = vrot.slane %v5443_v56, 4 }
 0x9a9   : > { %v5451_v33 = vadd.f32 %v5450_v30, %v5443_v56 }
 0x9ab   : > { %v5452_v5 = vrot.slane %v5451_v33, 2 }
 0x9ad   : > { %v5453_v52 = vadd.f32 %v5452_v5, %v5451_v33 }
 0x9af   : > { %v5454_v63 = vrot.slane %v5453_v52, 1 }
 0x9b1   : > { %v5455_v1 = vadd.f32 %v5454_v63, %v5453_v52 }
 0x9b3   : > { %5458 = vrot.lane.b32.xlu1 %v5455_v1, %s9134_s14 }
 0xa05   : > { %v5457_v4 = vpop.permute.xlu0 %5456 }
 0xa25   : > { %v5459_v8 = vpop.permute.xlu1 %5458 }
 0xa26   : > { %v5460_v45 = vsel %vm2025_vm1, %v5457_v4, %v5459_v8  ;;  %v5461_v58 = vsel %vm2025_vm1, %v5459_v8, %v5457_v4 }
 0xa27   : > { %v5462_v40 = vadd.f32 %v5461_v58, %v5449_v35  ;;  %v5463_v13 = vadd.f32 %v5460_v45, %v5455_v1 }
 0xa29   : > { %5464 = vrot.lane.b32.xlu2 %v5462_v40, %s9135_s15  ;;  %5466 = vrot.lane.b32.xlu0 %v5463_v13, %s9135_s15 }
 0xa83   : > { %v5465_v15 = vpop.permute.xlu2 %5464 }
 0xa9b   : > { %v5467_v16 = vpop.permute.xlu0 %5466 }
 0xa9c   : > { %v5468_v17 = vsel %vm2034_vm2, %v5465_v15, %v5467_v16  ;;  %v5469_v42 = vsel %vm2034_vm2, %v5467_v16, %v5465_v15 }
 0xa9d   : > { %v5470_v19 = vadd.f32 %v5469_v42, %v5462_v40  ;;  %v5471_v38 = vadd.f32 %v5468_v17, %v5463_v13  ;;  %v8514_v17 = vld [vmem:[%s13149_s6 + $0x4] sm:$0x3] }
 0xa9f   : > { %v5472_v6 = vadd.f32 %v5471_v38, %v5470_v19  ;;  %v8515_v38 = vld [vmem:[%s13150_s7 + $0x4] sm:$0x3] }
 0xaa1   : > { %5475 = vrot.lane.b32.xlu2 %v5472_v6, %s9137_s17  ;;  %5473 = vrot.lane.b32.xlu1 %v5472_v6, %s9136_s16 }
 0xafb   : > { %v5476_v20 = vpop.permute.xlu2 %5475 }
 0xb13   : > { %v5474_v21 = vpop.permute.xlu1 %5473 }
 0xb14   : > { %v5477_v24 = vsel %vm2068_vm3, %v5474_v21, %v5476_v20  ;;  %v5478_v0 = vsel %vm2069_vm4, %v5474_v21, %v5476_v20  ;;  %v5557_v20 = vperm.slane %v8514_v17, 0 }
 0xb15   : > { %v5479_v22 = vadd.f32 %v5477_v24, %v5472_v6  ;;  %v5480_v25 = vadd.f32 %v5478_v0, %v5472_v6  ;;  %v5558_v0 = vperm.slane %v8514_v17, 1 }
 0xb17   : > { %v5481_v46 = vmul.f32 0.0078125, %v5479_v22  ;;  %v5482_v28 = vmul.f32 0.0078125, %v5480_v25  ;;  %v8516_v22 = vld [vmem:[%s13151_s8 + $0x4] sm:$0x3] }
 0xb19   : > { %v5483_v18 = vperm.slane %v5481_v46, 0  ;;  %v5484_v9 = vperm.slane %v5482_v28, 0  ;;  %v5566_v46 = vperm.slane %v8515_v38, 0 }
 0xb1b   : > { %v13099_v27 = vsub.f32 %v5442_v43, %v5483_v18  ;;  %v13101_v11 = vsub.f32 %v5443_v56, %v5484_v9  ;;  %v5567_v18 = vperm.slane %v8515_v38, 1 }
 0xb1d   : > { %v5487_v31 = vmul.f32 %v13099_v27, %v13099_v27  ;;  %v5488_v26 = vmul.f32 %v13101_v11, %v13101_v11 }
 0xb1f   : > { %v5489_v32 = vrot.slane %v5487_v31, 4  ;;  %v5495_v34 = vrot.slane %v5488_v26, 4 }
 0xb21   : > { %v5496_v12 = vadd.f32 %v5495_v34, %v5488_v26  ;;  %v5490_v36 = vadd.f32 %v5489_v32, %v5487_v31  ;;  %v5577_v31 = vperm.slane %v8516_v22, 0  ;;  %v5578_v32 = vperm.slane %v8516_v22, 1 }
 0xb23   : > { %v5497_v57 = vrot.slane %v5496_v12, 2  ;;  %v5491_v39 = vrot.slane %v5490_v36, 2 }
 0xb25   : > { %v5498_v2 = vadd.f32 %v5497_v57, %v5496_v12  ;;  %v5492_v59 = vadd.f32 %v5491_v39, %v5490_v36 }
 0xb27   : > { %v5499_v37 = vrot.slane %v5498_v2, 1  ;;  %v5493_v62 = vrot.slane %v5492_v59, 1 }
 0xb29   : > { %v5500_v43 = vadd.f32 %v5499_v37, %v5498_v2  ;;  %v5494_v29 = vadd.f32 %v5493_v62, %v5492_v59 }
 0xb2b   : > { %5503 = vrot.lane.b32.xlu1 %v5500_v43, %s9134_s14  ;;  %5501 = vrot.lane.b32.xlu0 %v5494_v29, %s9134_s14 }
 0xb9d   : > { %v5504_v7 = vpop.permute.xlu1 %5503  ;;  %v5502_v23 = vpop.permute.xlu0 %5501 }
 0xb9e   : > { %v5505_v47 = vsel %vm2025_vm1, %v5502_v23, %v5504_v7  ;;  %v5506_v44 = vsel %vm2025_vm1, %v5504_v7, %v5502_v23 }
 0xb9f   : > { %v5507_v48 = vadd.f32 %v5506_v44, %v5494_v29  ;;  %v5508_v35 = vadd.f32 %v5505_v47, %v5500_v43 }
 0xba1   : > { %5509 = vrot.lane.b32.xlu2 %v5507_v48, %s9135_s15  ;;  %5511 = vrot.lane.b32.xlu0 %v5508_v35, %s9135_s15 }
 0xbfb   : > { %v5510_v14 = vpop.permute.xlu2 %5509 }
 0xc13   : > { %v5512_v49 = vpop.permute.xlu0 %5511 }
 0xc14   : > { %v5513_v50 = vsel %vm2034_vm2, %v5510_v14, %v5512_v49  ;;  %v5514_v41 = vsel %vm2034_vm2, %v5512_v49, %v5510_v14 }
 0xc15   : > { %v5515_v51 = vadd.f32 %v5514_v41, %v5507_v48  ;;  %v5516_v54 = vadd.f32 %v5513_v50, %v5508_v35 }
 0xc17   : > { %v5517_v55 = vadd.f32 %v5516_v54, %v5515_v51 }
 0xc19   : > { %5520 = vrot.lane.b32.xlu2 %v5517_v55, %s9137_s17  ;;  %5518 = vrot.lane.b32.xlu1 %v5517_v55, %s9136_s16 }
 0xc73   : > { %v5521_v3 = vpop.permute.xlu2 %5520 }
 0xc8b   : > { %v5519_v56 = vpop.permute.xlu1 %5518 }
 0xc8c   : > { %v5522_v10 = vsel %vm2068_vm3, %v5519_v56, %v5521_v3  ;;  %v5523_v30 = vsel %vm2069_vm4, %v5519_v56, %v5521_v3 }
 0xc8d   : > { %v5524_v33 = vadd.f32 %v5522_v10, %v5517_v55  ;;  %v5525_v5 = vadd.f32 %v5523_v30, %v5517_v55 }
 0xc8f   : > { %v5526_v52 = vmul.f32 0.0078125, %v5524_v33  ;;  %v5527_v53 = vmul.f32 0.0078125, %v5525_v5 }
 0xc91   : > { %v5528_v63 = vadd.f32 1e-05, %v5526_v52  ;;  %v5529_v1 = vadd.f32 1e-05, %v5527_v53 }
 0xc93   : > { %9121 = vrsqrt.f32 %v5528_v63  ;;  %vm5536_vm3 = vweird.f32 %v5528_v63  ;;  %vm5546_vm9 = vweird.f32 %v5529_v1 }
 0xc94   : > { %9123 = vrsqrt.f32 %v5529_v1 }
 0xc99   : > { %v9122_v4 = vpop.eup %9121 }
 0xc9a   : > { %v9124_v8 = vpop.eup %9123  ;;  %v5531_v45 = vmul.f32 %v9122_v4, %v5528_v63  ;;  %vm5537_vm1 = vweird.f32 %v9122_v4 }
 0xc9b   : > { %v5541_v58 = vmul.f32 %v9124_v8, %v5529_v1  ;;  %vm5547_vm2 = vweird.f32 %v9124_v8  ;;  %vm5538_vm4 = vmor %vm5536_vm3, %vm5537_vm1 }
 0xc9c   : > { %v5532_v40 = vmul.f32 %v9122_v4, %v5531_v45  ;;  %vm5548_vm10 = vmor %vm5546_vm9, %vm5547_vm2 }
 0xc9d   : > { %v5542_v13 = vmul.f32 %v9124_v8, %v5541_v58 }
 0xc9e   : > { %v5533_v15 = vmul.f32 0.5, %v5532_v40 }
 0xc9f   : > { %v5543_v60 = vmul.f32 0.5, %v5542_v13 }
 0xca0   : > { %v5534_v16 = vsub.f32 1.5, %v5533_v15 }
 0xca1   : > { %v5544_v61 = vsub.f32 1.5, %v5543_v60 }
 0xca2   : > { %v5535_v42 = vmul.f32 %v9122_v4, %v5534_v16 }
 0xca3   : > { %v5545_v19 = vmul.f32 %v9124_v8, %v5544_v61 }
 0xca4   : > { %v5539_v6 = vsel %vm5538_vm4, %v9122_v4, %v5535_v42 }
 0xca5   : > { %v5549_v21 = vsel %vm5548_vm10, %v9124_v8, %v5545_v19  ;;  %v5550_v24 = vperm.slane %v5539_v6, 0 }
 0xca6   : > { %v5551_v25 = vperm.slane %v5549_v21, 0 }
 0xca7   : > { %v5552_v28 = vmul.f32 %v5550_v24, %v13099_v27 }
 0xca8   : > { %v5553_v9 = vmul.f32 %v5551_v25, %v13101_v11 }
 0xca9   : > { %v5561_v26 = vmul.f32 %v5557_v20, %v5552_v28 }
 0xcaa   : > { %v5562_v34 = vmul.f32 %v5558_v0, %v5553_v9 }
 0xcab   : > { %v5570_v12 = vadd.f32 %v5566_v46, %v5561_v26 }
 0xcac   : > { %v5571_v36 = vadd.f32 %v5567_v18, %v5562_v34 }
 0xcad   : > { %vm5572_vm11 = vcmp.gt.f32.partialorder %v5570_v12, 0.0  ;;  %v5581_v57 = vmul.f32 %v5577_v31, %v5570_v12 }
 0xcae   : > { %vm5573_vm12 = vcmp.gt.f32.partialorder %v5571_v36, 0.0  ;;  %v5582_v39 = vmul.f32 %v5578_v32, %v5571_v36 }
 0xcaf   : > { %v5583_v2 = vsel %vm5572_vm11, %v5570_v12, %v5581_v57 }
 0xcb0   : > { %v5584_v59 = vsel %vm5573_vm12, %v5571_v36, %v5582_v39  ;;  %5585 = vst [vmem:[%s392_s29] sm:$0xff] %v5583_v2 }
 0xcb1   : > { %5586 = vst [vmem:[%s392_s29 + $0x8] sm:$0xff] %v5584_v59 }
 0xcb2 PF: > { %s19_s30 = sadd.s32 1, %s9131_s30  }
 0xcb3   : > { %p16_p4 = scmp.ge.s32.totalorder %s19_s30, 4  }
 0xcb5   :  { %18 = sbr.rel (!%p16_p4) target bundleno = 1 (0x1), region = 112 }

</bundles_post_ra>
